<compile_context>
chip_gen: v7x
topology: tpu7x:2x2x1
jax: 0.10.0
libtpu: 0.0.40
codegen_flags: <defaults>
</compile_context>

<pallas_src>
from functools import partial

import jax
import jax.numpy as jnp
from jax.experimental import pallas as pl
from jax.experimental.pallas import tpu as pltpu

# ----------------------------- small config -----------------------------
# Vision tower (SigLIP-like)
V_IMG = 16            # image_size
V_PATCH = 8           # patch_size
V_CH = 3              # channels
V_HID = 32            # vision hidden_size
V_INT = 64            # vision intermediate_size
V_LAYERS = 2
V_HEADS = 4
V_HEAD_DIM = V_HID // V_HEADS
V_EPS = 1e-6
NUM_IMG_TOKENS = (V_IMG // V_PATCH) ** 2        # 4

# Language model (Gemma-like)
VOCAB = 64
VOCAB_PAD = 128       # lane-dense lm_head output (multiple of 128)
IMG_TOKEN_ID = 63     # image_token_index
T_HID = 32            # text hidden_size (== projection_dim)
T_INT = 64
T_LAYERS = 2
T_HEADS = 4
T_KV_HEADS = 2
T_HEAD_DIM = 8
T_EPS = 1e-6
ROPE_THETA = 10000.0
PROJ_DIM = T_HID

_V_LAYER_REFS = 16    # refs per vision encoder layer
_T_LAYER_REFS = 9     # refs per Gemma decoder layer


# ----------------------------- in-kernel helpers -----------------------------
def _gelu_tanh(x):
    # PyTorch gelu(approximate="tanh"), f32 on the VPU/EUP.
    c = 0.7978845608028654  # sqrt(2/pi)
    return 0.5 * x * (1.0 + jnp.tanh(c * (x + 0.044715 * x * x * x)))


def _layernorm(x, w, b, eps):
    mean = jnp.mean(x, axis=-1, keepdims=True)
    var = jnp.mean((x - mean) * (x - mean), axis=-1, keepdims=True)
    return (x - mean) * jax.lax.rsqrt(var + eps) * w + b


def _rmsnorm(x, w, eps):
    # Gemma RMSNorm: x * rsqrt(mean(x^2)+eps) * (1 + weight)
    var = jnp.mean(x * x, axis=-1, keepdims=True)
    return x * jax.lax.rsqrt(var + eps) * (1.0 + w)


def _bmm(a, b):
    # (n, m, k) x (n, k, p) -> (n, m, p), f32 accumulation on the MXU.
    return jax.lax.dot_general(a, b, (((2,), (1,)), ((0,), (0,))),
                               preferred_element_type=jnp.float32)


def _bmm_nt(a, b):
    # (n, m, k) x (n, p, k) -> (n, m, p)   ('nqd,nkd->nqk')
    return jax.lax.dot_general(a, b, (((2,), (2,)), ((0,), (0,))),
                               preferred_element_type=jnp.float32)


def _rope(x, cos, sin):
    # x: (nh, S, hd) f32; cos/sin: (S, hd) f32.
    d = x.shape[-1]
    x1 = x[..., : d // 2]
    x2 = x[..., d // 2:]
    rot = jnp.concatenate([-x2, x1], axis=-1)
    return x * cos[None] + rot * sin[None]


def _mha(h, qw, kw, vw, ow, *, scale, qb=None, kb=None, vb=None,
         cos=None, sin=None):
    """Batched multi-head attention on an (S, H) activation slab.

    Weights are head-major: qw/kw/vw (nh, H, hd) bf16, ow (nh, hd, H) bf16.
    All heads' score / P@V / output-projection matmuls are single batched
    dot_generals (heads on the leading batch axis) -> no per-head unrolling,
    no lane concats.  Everything besides MXU operands stays f32.
    """
    bf16 = jnp.bfloat16
    nh = qw.shape[0]
    hb = jnp.broadcast_to(h.astype(bf16), (nh,) + h.shape)     # (nh, S, H)
    q = _bmm(hb, qw)                                            # (nh, S, hd) f32
    k = _bmm(hb, kw)
    v = _bmm(hb, vw)
    if qb is not None:
        q = q + qb
        k = k + kb
        v = v + vb
    if cos is not None:
        q = _rope(q, cos, sin)
        k = _rope(k, cos, sin)
    s = _bmm_nt(q.astype(bf16), k.astype(bf16)) * scale         # (nh, S, S)
    m = jnp.max(s, axis=-1, keepdims=True)
    p = jnp.exp(s - m)
    p = p * pl.reciprocal(jnp.sum(p, axis=-1, keepdims=True), approx=True)
    o = _bmm(p.astype(bf16), v.astype(bf16))                    # (nh, S, hd)
    op = _bmm(o.astype(bf16), ow)                               # (nh, S, H)
    return jnp.sum(op, axis=0)                                  # (S, H)


# ----------------------------- the fused kernel -----------------------------
def _paligemma_kernel(*refs, n_img, S):
    """Vision tower + projector + image/text merge + Gemma LM + tied lm_head.

    One grid step == one batch element (grid=(B,), "parallel").
    """
    out_ref = refs[-1]
    (patches_ref, embeds_ref, mask_ref, cos_ref, sin_ref,
     pw_ref, pb_ref, pos_ref) = refs[:8]
    idx = 8
    v_layers = [refs[idx + i * _V_LAYER_REFS: idx + (i + 1) * _V_LAYER_REFS]
                for i in range(V_LAYERS)]
    idx += V_LAYERS * _V_LAYER_REFS
    v_post_w, v_post_b, proj_w, proj_b = refs[idx: idx + 4]
    idx += 4
    t_layers = [refs[idx + i * _T_LAYER_REFS: idx + (i + 1) * _T_LAYER_REFS]
                for i in range(T_LAYERS)]
    idx += T_LAYERS * _T_LAYER_REFS
    final_ln_ref, embed_ref = refs[idx: idx + 2]

    bf16 = jnp.bfloat16

    # ---------------- SigLIP vision tower (n_img tokens) ----------------
    # Patch embedding (stride=patch Conv2d as matmul) + positional embedding.
    xv = jnp.dot(patches_ref[...].astype(bf16), pw_ref[...],
                 preferred_element_type=jnp.float32)
    xv = xv + pb_ref[...] + pos_ref[...]

    for (ln1_w, ln1_b, qw, qb, kw, kb, vw, vb, ow, ob,
         ln2_w, ln2_b, f1w, f1b, f2w, f2b) in v_layers:
        hn = _layernorm(xv, ln1_w[...], ln1_b[...], V_EPS)
        attn = _mha(hn, qw[...], kw[...], vw[...], ow[...],
                    scale=V_HEAD_DIM ** -0.5,
                    qb=qb[...], kb=kb[...], vb=vb[...])
        xv = xv + attn + ob[...]
        hn = _layernorm(xv, ln2_w[...], ln2_b[...], V_EPS)
        h1 = jnp.dot(hn.astype(bf16), f1w[...],
                     preferred_element_type=jnp.float32) + f1b[...]
        h1 = _gelu_tanh(h1)
        h2 = jnp.dot(h1.astype(bf16), f2w[...],
                     preferred_element_type=jnp.float32) + f2b[...]
        xv = xv + h2

    xv = _layernorm(xv, v_post_w[...], v_post_b[...], V_EPS)
    img = jnp.dot(xv.astype(bf16), proj_w[...],
                  preferred_element_type=jnp.float32) + proj_b[...]   # (n_img, H)

    # ---------------- merge image features with text embeddings ----------------
    # Original: img * H^-0.5 merged, then Gemma normalizer * sqrt(H); the two
    # cancel on image rows, so image rows take `img` directly.
    cos = cos_ref[...]
    sin = sin_ref[...]
    text = embeds_ref[...] * (T_HID ** 0.5)                    # Gemma normalizer
    img_slab = jnp.concatenate(
        [img, jnp.zeros((S - n_img, T_HID), jnp.float32)], axis=0)
    x = jnp.where(mask_ref[...] > 0.0, img_slab, text)          # (S, H)

    # ---------------- Gemma decoder ----------------
    for (in_ln, qw, kw, vw, ow, post_ln, gate_w, up_w, down_w) in t_layers:
        hn = _rmsnorm(x, in_ln[...], T_EPS)
        attn = _mha(hn, qw[...], kw[...], vw[...], ow[...],
                    scale=T_HEAD_DIM ** -0.5, cos=cos, sin=sin)
        x = x + attn
        hn = _rmsnorm(x, post_ln[...], T_EPS)
        hb = hn.astype(bf16)
        g = _gelu_tanh(jnp.dot(hb, gate_w[...],
                               preferred_element_type=jnp.float32))
        u = jnp.dot(hb, up_w[...], preferred_element_type=jnp.float32)
        x = x + jnp.dot((g * u).astype(bf16), down_w[...],
                        preferred_element_type=jnp.float32)

    x = _rmsnorm(x, final_ln_ref[...], T_EPS)
    # Tied lm_head: logits = x @ embed.T (contract hidden dim; vocab padded to 128
    # -> lane-dense, unmasked stores).
    out_ref[...] = jax.lax.dot_general(
        x.astype(bf16), embed_ref[...].astype(bf16),
        (((1,), (1,)), ((), ())), preferred_element_type=jnp.float32)


# ----------------------------- wrapper -----------------------------
def rope_tables(seq_len):
    inv_freq = 1.0 / (
        ROPE_THETA ** (jnp.arange(0, T_HEAD_DIM, 2, dtype=jnp.float32) / T_HEAD_DIM))
    pos = jnp.arange(seq_len, dtype=jnp.float32)
    freqs = jnp.outer(pos, inv_freq)                          # (S, D/2)
    emb = jnp.concatenate([freqs, freqs], axis=-1)            # (S, D)
    return jnp.cos(emb), jnp.sin(emb)


def paligemma_forward(params, input_ids, pixel_values, attention_mask):
    """PaliGemma prefill forward: returns logits (B, S, VOCAB).

    attention_mask is expected to be all ones (prefill) -> full attention.
    """
    # TODO(synk): KV-cache decode / causal & padding masks are not modelled.
    del attention_mask
    B, S = input_ids.shape
    _, C, Hi, Wi = pixel_values.shape
    P = V_PATCH
    nh_, nw_ = Hi // P, Wi // P
    n_img = nh_ * nw_

    # Patchify (pure layout glue; bit-equivalent to a stride=P Conv2d) — XLA side.
    patches = (pixel_values.reshape(B, C, nh_, P, nw_, P)
               .transpose(0, 2, 4, 1, 3, 5)
               .reshape(B, n_img, C * P * P))
    # Text embedding gather (left to XLA); table is padded, ids < VOCAB.
    inputs_embeds = jnp.take(params["embed"], input_ids, axis=0)       # (B,S,H)
    img_mask = (input_ids == IMG_TOKEN_ID).astype(jnp.float32)[..., None]
    cos, sin = rope_tables(S)

    inputs = [patches, inputs_embeds, img_mask, cos, sin,
              params["v_patch_w"], params["v_patch_b"], params["v_pos"]]
    for lp in params["v_layers"]:
        inputs += [lp[k] for k in ("ln1_w", "ln1_b", "q_w", "q_b", "k_w", "k_b",
                                   "v_w", "v_b", "o_w", "o_b", "ln2_w", "ln2_b",
                                   "fc1_w", "fc1_b", "fc2_w", "fc2_b")]
    inputs += [params["v_post_ln_w"], params["v_post_ln_b"],
               params["proj_w"], params["proj_b"]]
    for lp in params["t_layers"]:
        inputs += [lp[k] for k in ("in_ln", "q_w", "k_w", "v_w", "o_w",
                                   "post_ln", "gate_w", "up_w", "down_w")]
    inputs += [params["final_ln"], params["embed"]]

    n_per_batch = 3   # patches, inputs_embeds, img_mask are sliced per batch
    in_specs = []
    for a in inputs[:n_per_batch]:
        in_specs.append(pl.BlockSpec(
            (None,) + a.shape[1:],
            lambda b, nd=a.ndim: (b,) + (0,) * (nd - 1)))
    for a in inputs[n_per_batch:]:
        in_specs.append(pl.BlockSpec(
            a.shape, lambda b, nd=a.ndim: (0,) * nd))

    flops = 2 * B * (
        n_img * (C * P * P) * V_HID
        + V_LAYERS * n_img * (4 * V_HID * V_HID + 2 * n_img * V_HID
                              + 2 * V_HID * V_INT)
        + n_img * V_HID * PROJ_DIM
        + T_LAYERS * S * (4 * T_HID * T_HID + 2 * S * T_HID + 3 * T_HID * T_INT)
        + S * T_HID * VOCAB_PAD)
    transc = B * (V_LAYERS * n_img * (V_INT + n_img * V_HEADS)
                  + T_LAYERS * S * (T_INT + S * T_HEADS))
    bytes_accessed = (sum(int(a.size) * a.dtype.itemsize for a in inputs)
                      + B * S * VOCAB_PAD * 4)

    out_shape = (B, S, VOCAB_PAD)
    logits = pl.pallas_call(
        partial(_paligemma_kernel, n_img=n_img, S=S),
        out_shape=jax.ShapeDtypeStruct(out_shape, jnp.float32),
        grid=(B,),
        in_specs=in_specs,
        out_specs=pl.BlockSpec((None, S, VOCAB_PAD), lambda b: (b, 0, 0)),
        compiler_params=pltpu.CompilerParams(
            dimension_semantics=("parallel",)),   # shards batches across v7x TCs
        cost_estimate=pl.CostEstimate(
            flops=flops, transcendentals=transc, bytes_accessed=bytes_accessed),
    )(*inputs)
    return logits[:, :, :VOCAB]


# ----------------------------- parameter init -----------------------------
def _init(key, shape, scale=0.02):
    return jax.random.normal(key, shape, dtype=jnp.float32) * scale


def init_params(key):
    keys = iter(jax.random.split(key, 256))
    nk = lambda: next(keys)
    bf16 = jnp.bfloat16
    p = {}
    # Vision patch embedding (Conv2d as matmul), weight (C*P*P, V_HID) bf16.
    p["v_patch_w"] = _init(nk(), (V_CH * V_PATCH * V_PATCH, V_HID)).astype(bf16)
    p["v_patch_b"] = jnp.zeros((1, V_HID), jnp.float32)
    p["v_pos"] = _init(nk(), (NUM_IMG_TOKENS, V_HID))
    p["v_layers"] = []
    for _ in range(V_LAYERS):
        p["v_layers"].append(dict(
            ln1_w=jnp.ones((1, V_HID), jnp.float32),
            ln1_b=jnp.zeros((1, V_HID), jnp.float32),
            q_w=_init(nk(), (V_HEADS, V_HID, V_HEAD_DIM)).astype(bf16),
            q_b=jnp.zeros((V_HEADS, 1, V_HEAD_DIM), jnp.float32),
            k_w=_init(nk(), (V_HEADS, V_HID, V_HEAD_DIM)).astype(bf16),
            k_b=jnp.zeros((V_HEADS, 1, V_HEAD_DIM), jnp.float32),
            v_w=_init(nk(), (V_HEADS, V_HID, V_HEAD_DIM)).astype(bf16),
            v_b=jnp.zeros((V_HEADS, 1, V_HEAD_DIM), jnp.float32),
            o_w=_init(nk(), (V_HEADS, V_HEAD_DIM, V_HID)).astype(bf16),
            o_b=jnp.zeros((1, V_HID), jnp.float32),
            ln2_w=jnp.ones((1, V_HID), jnp.float32),
            ln2_b=jnp.zeros((1, V_HID), jnp.float32),
            fc1_w=_init(nk(), (V_HID, V_INT)).astype(bf16),
            fc1_b=jnp.zeros((1, V_INT), jnp.float32),
            fc2_w=_init(nk(), (V_INT, V_HID)).astype(bf16),
            fc2_b=jnp.zeros((1, V_HID), jnp.float32),
        ))
    p["v_post_ln_w"] = jnp.ones((1, V_HID), jnp.float32)
    p["v_post_ln_b"] = jnp.zeros((1, V_HID), jnp.float32)
    # Multimodal projector.
    p["proj_w"] = _init(nk(), (V_HID, PROJ_DIM)).astype(bf16)
    p["proj_b"] = jnp.zeros((1, PROJ_DIM), jnp.float32)
    # Gemma embedding table, padded to VOCAB_PAD rows for a lane-dense lm_head
    # output (padded rows are zero and sliced off in the wrapper).
    emb = _init(nk(), (VOCAB, T_HID))
    p["embed"] = jnp.concatenate(
        [emb, jnp.zeros((VOCAB_PAD - VOCAB, T_HID), jnp.float32)], axis=0)
    rep = T_HEADS // T_KV_HEADS
    p["t_layers"] = []
    for _ in range(T_LAYERS):
        kw = _init(nk(), (T_KV_HEADS, T_HID, T_HEAD_DIM))
        vw = _init(nk(), (T_KV_HEADS, T_HID, T_HEAD_DIM))
        p["t_layers"].append(dict(
            in_ln=jnp.zeros((1, T_HID), jnp.float32),
            q_w=_init(nk(), (T_HEADS, T_HID, T_HEAD_DIM)).astype(bf16),
            # GQA: replicate each kv group's projection weights per query head
            # (static, build time) so the kernel never repeats K/V at runtime.
            k_w=jnp.repeat(kw, rep, axis=0).astype(bf16),
            v_w=jnp.repeat(vw, rep, axis=0).astype(bf16),
            o_w=_init(nk(), (T_HEADS, T_HEAD_DIM, T_HID)).astype(bf16),
            post_ln=jnp.zeros((1, T_HID), jnp.float32),
            gate_w=_init(nk(), (T_HID, T_INT)).astype(bf16),
            up_w=_init(nk(), (T_HID, T_INT)).astype(bf16),
            down_w=_init(nk(), (T_INT, T_HID)).astype(bf16),
        ))
    p["final_ln"] = jnp.zeros((1, T_HID), jnp.float32)
    return p


# ----------------------------- main -----------------------------
if __name__ == "__main__":
    key = jax.random.PRNGKey(0)
    k_param, k_pix, k_ids = jax.random.split(key, 3)
    params = init_params(k_param)

    B = 2
    S = NUM_IMG_TOKENS + 4            # 4 image tokens + 4 text tokens = 8
    pixel_values = jax.random.normal(k_pix, (B, V_CH, V_IMG, V_IMG),
                                     dtype=jnp.float32)
    text_ids = jax.random.randint(k_ids, (B, S - NUM_IMG_TOKENS), 0, IMG_TOKEN_ID,
                                  dtype=jnp.int32)
    image_ids = jnp.full((B, NUM_IMG_TOKENS), IMG_TOKEN_ID, dtype=jnp.int32)
    input_ids = jnp.concatenate([image_ids, text_ids], axis=1)
    attention_mask = jnp.ones((B, S), dtype=jnp.int32)

    logits = jax.jit(paligemma_forward)(params, input_ids, pixel_values,
                                        attention_mask)
    logits = jax.block_until_ready(logits)

    assert logits.shape == (B, S, VOCAB), logits.shape
    assert bool(jnp.isfinite(logits).all())
    print("KERNEL_OK")
</pallas_src>

<mosaic_0001>
module attributes {stable_mosaic.version = 11 : i64} {
  func.func @_paligemma_kernel(%arg0: i32, %arg1: memref<1x4x192xf32, #tpu.memory_space<vmem>>, %arg2: memref<1x8x32xf32, #tpu.memory_space<vmem>>, %arg3: memref<1x8x1xf32, #tpu.memory_space<vmem>>, %arg4: memref<8x8xf32, #tpu.memory_space<vmem>>, %arg5: memref<8x8xf32, #tpu.memory_space<vmem>>, %arg6: memref<192x32xbf16, #tpu.memory_space<vmem>>, %arg7: memref<1x32xf32, #tpu.memory_space<vmem>>, %arg8: memref<4x32xf32, #tpu.memory_space<vmem>>, %arg9: memref<1x32xf32, #tpu.memory_space<vmem>>, %arg10: memref<1x32xf32, #tpu.memory_space<vmem>>, %arg11: memref<4x32x8xbf16, #tpu.memory_space<vmem>>, %arg12: memref<4x1x8xf32, #tpu.memory_space<vmem>>, %arg13: memref<4x32x8xbf16, #tpu.memory_space<vmem>>, %arg14: memref<4x1x8xf32, #tpu.memory_space<vmem>>, %arg15: memref<4x32x8xbf16, #tpu.memory_space<vmem>>, %arg16: memref<4x1x8xf32, #tpu.memory_space<vmem>>, %arg17: memref<4x8x32xbf16, #tpu.memory_space<vmem>>, %arg18: memref<1x32xf32, #tpu.memory_space<vmem>>, %arg19: memref<1x32xf32, #tpu.memory_space<vmem>>, %arg20: memref<1x32xf32, #tpu.memory_space<vmem>>, %arg21: memref<32x64xbf16, #tpu.memory_space<vmem>>, %arg22: memref<1x64xf32, #tpu.memory_space<vmem>>, %arg23: memref<64x32xbf16, #tpu.memory_space<vmem>>, %arg24: memref<1x32xf32, #tpu.memory_space<vmem>>, %arg25: memref<1x32xf32, #tpu.memory_space<vmem>>, %arg26: memref<1x32xf32, #tpu.memory_space<vmem>>, %arg27: memref<4x32x8xbf16, #tpu.memory_space<vmem>>, %arg28: memref<4x1x8xf32, #tpu.memory_space<vmem>>, %arg29: memref<4x32x8xbf16, #tpu.memory_space<vmem>>, %arg30: memref<4x1x8xf32, #tpu.memory_space<vmem>>, %arg31: memref<4x32x8xbf16, #tpu.memory_space<vmem>>, %arg32: memref<4x1x8xf32, #tpu.memory_space<vmem>>, %arg33: memref<4x8x32xbf16, #tpu.memory_space<vmem>>, %arg34: memref<1x32xf32, #tpu.memory_space<vmem>>, %arg35: memref<1x32xf32, #tpu.memory_space<vmem>>, %arg36: memref<1x32xf32, #tpu.memory_space<vmem>>, %arg37: memref<32x64xbf16, #tpu.memory_space<vmem>>, %arg38: memref<1x64xf32, #tpu.memory_space<vmem>>, %arg39: memref<64x32xbf16, #tpu.memory_space<vmem>>, %arg40: memref<1x32xf32, #tpu.memory_space<vmem>>, %arg41: memref<1x32xf32, #tpu.memory_space<vmem>>, %arg42: memref<1x32xf32, #tpu.memory_space<vmem>>, %arg43: memref<32x32xbf16, #tpu.memory_space<vmem>>, %arg44: memref<1x32xf32, #tpu.memory_space<vmem>>, %arg45: memref<1x32xf32, #tpu.memory_space<vmem>>, %arg46: memref<4x32x8xbf16, #tpu.memory_space<vmem>>, %arg47: memref<4x32x8xbf16, #tpu.memory_space<vmem>>, %arg48: memref<4x32x8xbf16, #tpu.memory_space<vmem>>, %arg49: memref<4x8x32xbf16, #tpu.memory_space<vmem>>, %arg50: memref<1x32xf32, #tpu.memory_space<vmem>>, %arg51: memref<32x64xbf16, #tpu.memory_space<vmem>>, %arg52: memref<32x64xbf16, #tpu.memory_space<vmem>>, %arg53: memref<64x32xbf16, #tpu.memory_space<vmem>>, %arg54: memref<1x32xf32, #tpu.memory_space<vmem>>, %arg55: memref<4x32x8xbf16, #tpu.memory_space<vmem>>, %arg56: memref<4x32x8xbf16, #tpu.memory_space<vmem>>, %arg57: memref<4x32x8xbf16, #tpu.memory_space<vmem>>, %arg58: memref<4x8x32xbf16, #tpu.memory_space<vmem>>, %arg59: memref<1x32xf32, #tpu.memory_space<vmem>>, %arg60: memref<32x64xbf16, #tpu.memory_space<vmem>>, %arg61: memref<32x64xbf16, #tpu.memory_space<vmem>>, %arg62: memref<64x32xbf16, #tpu.memory_space<vmem>>, %arg63: memref<1x32xf32, #tpu.memory_space<vmem>>, %arg64: memref<128x32xf32, #tpu.memory_space<vmem>>, %arg65: memref<1x8x128xf32, #tpu.memory_space<vmem>>) attributes {dimension_semantics = [#tpu.dimension_semantics<parallel>], iteration_bounds = array<i64: 2>, scalar_prefetch = 0 : i64, scratch_operands = 0 : i64, tpu.core_type = #tpu.core_type<tc>, window_params = [{transform_indices = @transform_0, window_bounds = array<i64: 1, 4, 192>}, {transform_indices = @transform_1, window_bounds = array<i64: 1, 8, 32>}, {transform_indices = @transform_2, window_bounds = array<i64: 1, 8, 1>}, {pipeline_mode = #tpu.pipeline_mode<synchronous>, transform_indices = @transform_3, window_bounds = array<i64: 8, 8>}, {pipeline_mode = #tpu.pipeline_mode<synchronous>, transform_indices = @transform_4, window_bounds = array<i64: 8, 8>}, {pipeline_mode = #tpu.pipeline_mode<synchronous>, transform_indices = @transform_5, window_bounds = array<i64: 192, 32>}, {pipeline_mode = #tpu.pipeline_mode<synchronous>, transform_indices = @transform_6, window_bounds = array<i64: 1, 32>}, {pipeline_mode = #tpu.pipeline_mode<synchronous>, transform_indices = @transform_7, window_bounds = array<i64: 4, 32>}, {pipeline_mode = #tpu.pipeline_mode<synchronous>, transform_indices = @transform_8, window_bounds = array<i64: 1, 32>}, {pipeline_mode = #tpu.pipeline_mode<synchronous>, transform_indices = @transform_9, window_bounds = array<i64: 1, 32>}, {pipeline_mode = #tpu.pipeline_mode<synchronous>, transform_indices = @transform_10, window_bounds = array<i64: 4, 32, 8>}, {pipeline_mode = #tpu.pipeline_mode<synchronous>, transform_indices = @transform_11, window_bounds = array<i64: 4, 1, 8>}, {pipeline_mode = #tpu.pipeline_mode<synchronous>, transform_indices = @transform_12, window_bounds = array<i64: 4, 32, 8>}, {pipeline_mode = #tpu.pipeline_mode<synchronous>, transform_indices = @transform_13, window_bounds = array<i64: 4, 1, 8>}, {pipeline_mode = #tpu.pipeline_mode<synchronous>, transform_indices = @transform_14, window_bounds = array<i64: 4, 32, 8>}, {pipeline_mode = #tpu.pipeline_mode<synchronous>, transform_indices = @transform_15, window_bounds = array<i64: 4, 1, 8>}, {pipeline_mode = #tpu.pipeline_mode<synchronous>, transform_indices = @transform_16, window_bounds = array<i64: 4, 8, 32>}, {pipeline_mode = #tpu.pipeline_mode<synchronous>, transform_indices = @transform_17, window_bounds = array<i64: 1, 32>}, {pipeline_mode = #tpu.pipeline_mode<synchronous>, transform_indices = @transform_18, window_bounds = array<i64: 1, 32>}, {pipeline_mode = #tpu.pipeline_mode<synchronous>, transform_indices = @transform_19, window_bounds = array<i64: 1, 32>}, {pipeline_mode = #tpu.pipeline_mode<synchronous>, transform_indices = @transform_20, window_bounds = array<i64: 32, 64>}, {pipeline_mode = #tpu.pipeline_mode<synchronous>, transform_indices = @transform_21, window_bounds = array<i64: 1, 64>}, {pipeline_mode = #tpu.pipeline_mode<synchronous>, transform_indices = @transform_22, window_bounds = array<i64: 64, 32>}, {pipeline_mode = #tpu.pipeline_mode<synchronous>, transform_indices = @transform_23, window_bounds = array<i64: 1, 32>}, {pipeline_mode = #tpu.pipeline_mode<synchronous>, transform_indices = @transform_24, window_bounds = array<i64: 1, 32>}, {pipeline_mode = #tpu.pipeline_mode<synchronous>, transform_indices = @transform_25, window_bounds = array<i64: 1, 32>}, {pipeline_mode = #tpu.pipeline_mode<synchronous>, transform_indices = @transform_26, window_bounds = array<i64: 4, 32, 8>}, {pipeline_mode = #tpu.pipeline_mode<synchronous>, transform_indices = @transform_27, window_bounds = array<i64: 4, 1, 8>}, {pipeline_mode = #tpu.pipeline_mode<synchronous>, transform_indices = @transform_28, window_bounds = array<i64: 4, 32, 8>}, {pipeline_mode = #tpu.pipeline_mode<synchronous>, transform_indices = @transform_29, window_bounds = array<i64: 4, 1, 8>}, {pipeline_mode = #tpu.pipeline_mode<synchronous>, transform_indices = @transform_30, window_bounds = array<i64: 4, 32, 8>}, {pipeline_mode = #tpu.pipeline_mode<synchronous>, transform_indices = @transform_31, window_bounds = array<i64: 4, 1, 8>}, {pipeline_mode = #tpu.pipeline_mode<synchronous>, transform_indices = @transform_32, window_bounds = array<i64: 4, 8, 32>}, {pipeline_mode = #tpu.pipeline_mode<synchronous>, transform_indices = @transform_33, window_bounds = array<i64: 1, 32>}, {pipeline_mode = #tpu.pipeline_mode<synchronous>, transform_indices = @transform_34, window_bounds = array<i64: 1, 32>}, {pipeline_mode = #tpu.pipeline_mode<synchronous>, transform_indices = @transform_35, window_bounds = array<i64: 1, 32>}, {pipeline_mode = #tpu.pipeline_mode<synchronous>, transform_indices = @transform_36, window_bounds = array<i64: 32, 64>}, {pipeline_mode = #tpu.pipeline_mode<synchronous>, transform_indices = @transform_37, window_bounds = array<i64: 1, 64>}, {pipeline_mode = #tpu.pipeline_mode<synchronous>, transform_indices = @transform_38, window_bounds = array<i64: 64, 32>}, {pipeline_mode = #tpu.pipeline_mode<synchronous>, transform_indices = @transform_39, window_bounds = array<i64: 1, 32>}, {pipeline_mode = #tpu.pipeline_mode<synchronous>, transform_indices = @transform_40, window_bounds = array<i64: 1, 32>}, {pipeline_mode = #tpu.pipeline_mode<synchronous>, transform_indices = @transform_41, window_bounds = array<i64: 1, 32>}, {pipeline_mode = #tpu.pipeline_mode<synchronous>, transform_indices = @transform_42, window_bounds = array<i64: 32, 32>}, {pipeline_mode = #tpu.pipeline_mode<synchronous>, transform_indices = @transform_43, window_bounds = array<i64: 1, 32>}, {pipeline_mode = #tpu.pipeline_mode<synchronous>, transform_indices = @transform_44, window_bounds = array<i64: 1, 32>}, {pipeline_mode = #tpu.pipeline_mode<synchronous>, transform_indices = @transform_45, window_bounds = array<i64: 4, 32, 8>}, {pipeline_mode = #tpu.pipeline_mode<synchronous>, transform_indices = @transform_46, window_bounds = array<i64: 4, 32, 8>}, {pipeline_mode = #tpu.pipeline_mode<synchronous>, transform_indices = @transform_47, window_bounds = array<i64: 4, 32, 8>}, {pipeline_mode = #tpu.pipeline_mode<synchronous>, transform_indices = @transform_48, window_bounds = array<i64: 4, 8, 32>}, {pipeline_mode = #tpu.pipeline_mode<synchronous>, transform_indices = @transform_49, window_bounds = array<i64: 1, 32>}, {pipeline_mode = #tpu.pipeline_mode<synchronous>, transform_indices = @transform_50, window_bounds = array<i64: 32, 64>}, {pipeline_mode = #tpu.pipeline_mode<synchronous>, transform_indices = @transform_51, window_bounds = array<i64: 32, 64>}, {pipeline_mode = #tpu.pipeline_mode<synchronous>, transform_indices = @transform_52, window_bounds = array<i64: 64, 32>}, {pipeline_mode = #tpu.pipeline_mode<synchronous>, transform_indices = @transform_53, window_bounds = array<i64: 1, 32>}, {pipeline_mode = #tpu.pipeline_mode<synchronous>, transform_indices = @transform_54, window_bounds = array<i64: 4, 32, 8>}, {pipeline_mode = #tpu.pipeline_mode<synchronous>, transform_indices = @transform_55, window_bounds = array<i64: 4, 32, 8>}, {pipeline_mode = #tpu.pipeline_mode<synchronous>, transform_indices = @transform_56, window_bounds = array<i64: 4, 32, 8>}, {pipeline_mode = #tpu.pipeline_mode<synchronous>, transform_indices = @transform_57, window_bounds = array<i64: 4, 8, 32>}, {pipeline_mode = #tpu.pipeline_mode<synchronous>, transform_indices = @transform_58, window_bounds = array<i64: 1, 32>}, {pipeline_mode = #tpu.pipeline_mode<synchronous>, transform_indices = @transform_59, window_bounds = array<i64: 32, 64>}, {pipeline_mode = #tpu.pipeline_mode<synchronous>, transform_indices = @transform_60, window_bounds = array<i64: 32, 64>}, {pipeline_mode = #tpu.pipeline_mode<synchronous>, transform_indices = @transform_61, window_bounds = array<i64: 64, 32>}, {pipeline_mode = #tpu.pipeline_mode<synchronous>, transform_indices = @transform_62, window_bounds = array<i64: 1, 32>}, {pipeline_mode = #tpu.pipeline_mode<synchronous>, transform_indices = @transform_63, window_bounds = array<i64: 128, 32>}, {transform_indices = @transform_64, window_bounds = array<i64: 1, 8, 128>}]} {
    %c0 = arith.constant 0 : index
    %c0_0 = arith.constant 0 : index
    %c0_1 = arith.constant 0 : index
    %0 = vector.load %arg1[%c0, %c0_0, %c0_1] : memref<1x4x192xf32, #tpu.memory_space<vmem>>, vector<1x4x192xf32>
    %1 = vector.shape_cast %0 : vector<1x4x192xf32> to vector<4x192xf32>
    %2 = arith.truncf %1 : vector<4x192xf32> to vector<4x192xbf16>
    %c0_2 = arith.constant 0 : index
    %c0_3 = arith.constant 0 : index
    %3 = vector.load %arg6[%c0_2, %c0_3] : memref<192x32xbf16, #tpu.memory_space<vmem>>, vector<192x32xbf16>
    %cst = arith.constant dense<0.000000e+00> : vector<4x32xf32>
    %4 = tpu.matmul %2, %3, %cst {dimension_numbers = #tpu.dot_dimension_numbers<[1], [0], [0], [1], [0, 0, 1, 1], [], []>} : vector<4x192xbf16>, vector<192x32xbf16>, vector<4x32xf32> -> vector<4x32xf32>
    %c0_4 = arith.constant 0 : index
    %c0_5 = arith.constant 0 : index
    %5 = vector.load %arg7[%c0_4, %c0_5] : memref<1x32xf32, #tpu.memory_space<vmem>>, vector<1x32xf32>
    %6 = vector.broadcast %5 : vector<1x32xf32> to vector<4x32xf32>
    %7 = arith.addf %4, %6 : vector<4x32xf32>
    %c0_6 = arith.constant 0 : index
    %c0_7 = arith.constant 0 : index
    %8 = vector.load %arg8[%c0_6, %c0_7] : memref<4x32xf32, #tpu.memory_space<vmem>>, vector<4x32xf32>
    %9 = arith.addf %7, %8 : vector<4x32xf32>
    %c0_8 = arith.constant 0 : index
    %c0_9 = arith.constant 0 : index
    %10 = vector.load %arg9[%c0_8, %c0_9] : memref<1x32xf32, #tpu.memory_space<vmem>>, vector<1x32xf32>
    %c0_10 = arith.constant 0 : index
    %c0_11 = arith.constant 0 : index
    %11 = vector.load %arg10[%c0_10, %c0_11] : memref<1x32xf32, #tpu.memory_space<vmem>>, vector<1x32xf32>
    %cst_12 = arith.constant dense<0.000000e+00> : vector<4xf32>
    %12 = vector.multi_reduction <add>, %9, %cst_12 [1] : vector<4x32xf32> to vector<4xf32>
    %13 = vector.shape_cast %12 : vector<4xf32> to vector<4x1xf32>
    %cst_13 = arith.constant 3.200000e+01 : f32
    %14 = vector.broadcast %cst_13 : f32 to vector<4x1xf32>
    %15 = arith.divf %13, %14 : vector<4x1xf32>
    %16 = vector.broadcast %15 : vector<4x1xf32> to vector<4x32xf32>
    %17 = arith.subf %9, %16 : vector<4x32xf32>
    %18 = vector.broadcast %15 : vector<4x1xf32> to vector<4x32xf32>
    %19 = arith.subf %9, %18 : vector<4x32xf32>
    %20 = arith.mulf %17, %19 : vector<4x32xf32>
    %cst_14 = arith.constant dense<0.000000e+00> : vector<4xf32>
    %21 = vector.multi_reduction <add>, %20, %cst_14 [1] : vector<4x32xf32> to vector<4xf32>
    %22 = vector.shape_cast %21 : vector<4xf32> to vector<4x1xf32>
    %cst_15 = arith.constant 3.200000e+01 : f32
    %23 = vector.broadcast %cst_15 : f32 to vector<4x1xf32>
    %24 = arith.divf %22, %23 : vector<4x1xf32>
    %25 = vector.broadcast %15 : vector<4x1xf32> to vector<4x32xf32>
    %26 = arith.subf %9, %25 : vector<4x32xf32>
    %cst_16 = arith.constant 9.99999997E-7 : f32
    %27 = vector.broadcast %cst_16 : f32 to vector<4x1xf32>
    %28 = arith.addf %24, %27 : vector<4x1xf32>
    %29 = math.rsqrt %28 : vector<4x1xf32>
    %30 = vector.broadcast %29 : vector<4x1xf32> to vector<4x32xf32>
    %31 = arith.mulf %26, %30 : vector<4x32xf32>
    %32 = vector.broadcast %10 : vector<1x32xf32> to vector<4x32xf32>
    %33 = arith.mulf %31, %32 : vector<4x32xf32>
    %34 = vector.broadcast %11 : vector<1x32xf32> to vector<4x32xf32>
    %35 = arith.addf %33, %34 : vector<4x32xf32>
    %c0_17 = arith.constant 0 : index
    %c0_18 = arith.constant 0 : index
    %c0_19 = arith.constant 0 : index
    %36 = vector.load %arg11[%c0_17, %c0_18, %c0_19] : memref<4x32x8xbf16, #tpu.memory_space<vmem>>, vector<4x32x8xbf16>
    %c0_20 = arith.constant 0 : index
    %c0_21 = arith.constant 0 : index
    %c0_22 = arith.constant 0 : index
    %37 = vector.load %arg13[%c0_20, %c0_21, %c0_22] : memref<4x32x8xbf16, #tpu.memory_space<vmem>>, vector<4x32x8xbf16>
    %c0_23 = arith.constant 0 : index
    %c0_24 = arith.constant 0 : index
    %c0_25 = arith.constant 0 : index
    %38 = vector.load %arg15[%c0_23, %c0_24, %c0_25] : memref<4x32x8xbf16, #tpu.memory_space<vmem>>, vector<4x32x8xbf16>
    %c0_26 = arith.constant 0 : index
    %c0_27 = arith.constant 0 : index
    %c0_28 = arith.constant 0 : index
    %39 = vector.load %arg17[%c0_26, %c0_27, %c0_28] : memref<4x8x32xbf16, #tpu.memory_space<vmem>>, vector<4x8x32xbf16>
    %c0_29 = arith.constant 0 : index
    %c0_30 = arith.constant 0 : index
    %c0_31 = arith.constant 0 : index
    %40 = vector.load %arg12[%c0_29, %c0_30, %c0_31] : memref<4x1x8xf32, #tpu.memory_space<vmem>>, vector<4x1x8xf32>
    %c0_32 = arith.constant 0 : index
    %c0_33 = arith.constant 0 : index
    %c0_34 = arith.constant 0 : index
    %41 = vector.load %arg14[%c0_32, %c0_33, %c0_34] : memref<4x1x8xf32, #tpu.memory_space<vmem>>, vector<4x1x8xf32>
    %c0_35 = arith.constant 0 : index
    %c0_36 = arith.constant 0 : index
    %c0_37 = arith.constant 0 : index
    %42 = vector.load %arg16[%c0_35, %c0_36, %c0_37] : memref<4x1x8xf32, #tpu.memory_space<vmem>>, vector<4x1x8xf32>
    %43 = arith.truncf %35 : vector<4x32xf32> to vector<4x32xbf16>
    %44 = vector.shape_cast %43 : vector<4x32xbf16> to vector<1x4x32xbf16>
    %45 = vector.broadcast %44 : vector<1x4x32xbf16> to vector<4x4x32xbf16>
    %cst_38 = arith.constant dense<0.000000e+00> : vector<4x4x8xf32>
    %46 = tpu.matmul %45, %36, %cst_38 {dimension_numbers = #tpu.dot_dimension_numbers<[2], [1], [1], [2], [0, 0, 0, 1, 1, 2], [0], [0]>} : vector<4x4x32xbf16>, vector<4x32x8xbf16>, vector<4x4x8xf32> -> vector<4x4x8xf32>
    %cst_39 = arith.constant dense<0.000000e+00> : vector<4x4x8xf32>
    %47 = tpu.matmul %45, %37, %cst_39 {dimension_numbers = #tpu.dot_dimension_numbers<[2], [1], [1], [2], [0, 0, 0, 1, 1, 2], [0], [0]>} : vector<4x4x32xbf16>, vector<4x32x8xbf16>, vector<4x4x8xf32> -> vector<4x4x8xf32>
    %cst_40 = arith.constant dense<0.000000e+00> : vector<4x4x8xf32>
    %48 = tpu.matmul %45, %38, %cst_40 {dimension_numbers = #tpu.dot_dimension_numbers<[2], [1], [1], [2], [0, 0, 0, 1, 1, 2], [0], [0]>} : vector<4x4x32xbf16>, vector<4x32x8xbf16>, vector<4x4x8xf32> -> vector<4x4x8xf32>
    %49 = vector.broadcast %40 : vector<4x1x8xf32> to vector<4x4x8xf32>
    %50 = arith.addf %46, %49 : vector<4x4x8xf32>
    %51 = vector.broadcast %41 : vector<4x1x8xf32> to vector<4x4x8xf32>
    %52 = arith.addf %47, %51 : vector<4x4x8xf32>
    %53 = vector.broadcast %42 : vector<4x1x8xf32> to vector<4x4x8xf32>
    %54 = arith.addf %48, %53 : vector<4x4x8xf32>
    %55 = arith.truncf %50 : vector<4x4x8xf32> to vector<4x4x8xbf16>
    %56 = arith.truncf %52 : vector<4x4x8xf32> to vector<4x4x8xbf16>
    %cst_41 = arith.constant dense<0.000000e+00> : vector<4x4x4xf32>
    %57 = tpu.matmul %55, %56, %cst_41 {dimension_numbers = #tpu.dot_dimension_numbers<[2], [2], [1], [1], [0, 0, 0, 1, 1, 1], [0], [0]>} : vector<4x4x8xbf16>, vector<4x4x8xbf16>, vector<4x4x4xf32> -> vector<4x4x4xf32>
    %cst_42 = arith.constant 0.353553385 : f32
    %58 = vector.broadcast %cst_42 : f32 to vector<4x4x4xf32>
    %59 = arith.mulf %57, %58 : vector<4x4x4xf32>
    %cst_43 = arith.constant dense<0xFF800000> : vector<4x4xf32>
    %60 = vector.multi_reduction <maximumf>, %59, %cst_43 [2] : vector<4x4x4xf32> to vector<4x4xf32>
    %61 = vector.shape_cast %60 : vector<4x4xf32> to vector<4x4x1xf32>
    %62 = vector.broadcast %61 : vector<4x4x1xf32> to vector<4x4x4xf32>
    %63 = arith.subf %59, %62 : vector<4x4x4xf32>
    %64 = math.exp %63 : vector<4x4x4xf32>
    %cst_44 = arith.constant dense<0.000000e+00> : vector<4x4xf32>
    %65 = vector.multi_reduction <add>, %64, %cst_44 [2] : vector<4x4x4xf32> to vector<4x4xf32>
    %66 = vector.shape_cast %65 : vector<4x4xf32> to vector<4x4x1xf32>
    %67 = tpu.reciprocal %66 {approx = true} : vector<4x4x1xf32> -> vector<4x4x1xf32>
    %68 = vector.broadcast %67 : vector<4x4x1xf32> to vector<4x4x4xf32>
    %69 = arith.mulf %64, %68 : vector<4x4x4xf32>
    %70 = arith.truncf %69 : vector<4x4x4xf32> to vector<4x4x4xbf16>
    %71 = arith.truncf %54 : vector<4x4x8xf32> to vector<4x4x8xbf16>
    %cst_45 = arith.constant dense<0.000000e+00> : vector<4x4x8xf32>
    %72 = tpu.matmul %70, %71, %cst_45 {dimension_numbers = #tpu.dot_dimension_numbers<[2], [1], [1], [2], [0, 0, 0, 1, 1, 2], [0], [0]>} : vector<4x4x4xbf16>, vector<4x4x8xbf16>, vector<4x4x8xf32> -> vector<4x4x8xf32>
    %73 = arith.truncf %72 : vector<4x4x8xf32> to vector<4x4x8xbf16>
    %cst_46 = arith.constant dense<0.000000e+00> : vector<4x4x32xf32>
    %74 = tpu.matmul %73, %39, %cst_46 {dimension_numbers = #tpu.dot_dimension_numbers<[2], [1], [1], [2], [0, 0, 0, 1, 1, 2], [0], [0]>} : vector<4x4x8xbf16>, vector<4x8x32xbf16>, vector<4x4x32xf32> -> vector<4x4x32xf32>
    %cst_47 = arith.constant dense<0.000000e+00> : vector<4x32xf32>
    %75 = vector.multi_reduction <add>, %74, %cst_47 [0] : vector<4x4x32xf32> to vector<4x32xf32>
    %76 = arith.addf %9, %75 : vector<4x32xf32>
    %c0_48 = arith.constant 0 : index
    %c0_49 = arith.constant 0 : index
    %77 = vector.load %arg18[%c0_48, %c0_49] : memref<1x32xf32, #tpu.memory_space<vmem>>, vector<1x32xf32>
    %78 = vector.broadcast %77 : vector<1x32xf32> to vector<4x32xf32>
    %79 = arith.addf %76, %78 : vector<4x32xf32>
    %c0_50 = arith.constant 0 : index
    %c0_51 = arith.constant 0 : index
    %80 = vector.load %arg19[%c0_50, %c0_51] : memref<1x32xf32, #tpu.memory_space<vmem>>, vector<1x32xf32>
    %c0_52 = arith.constant 0 : index
    %c0_53 = arith.constant 0 : index
    %81 = vector.load %arg20[%c0_52, %c0_53] : memref<1x32xf32, #tpu.memory_space<vmem>>, vector<1x32xf32>
    %cst_54 = arith.constant dense<0.000000e+00> : vector<4xf32>
    %82 = vector.multi_reduction <add>, %79, %cst_54 [1] : vector<4x32xf32> to vector<4xf32>
    %83 = vector.shape_cast %82 : vector<4xf32> to vector<4x1xf32>
    %cst_55 = arith.constant 3.200000e+01 : f32
    %84 = vector.broadcast %cst_55 : f32 to vector<4x1xf32>
    %85 = arith.divf %83, %84 : vector<4x1xf32>
    %86 = vector.broadcast %85 : vector<4x1xf32> to vector<4x32xf32>
    %87 = arith.subf %79, %86 : vector<4x32xf32>
    %88 = vector.broadcast %85 : vector<4x1xf32> to vector<4x32xf32>
    %89 = arith.subf %79, %88 : vector<4x32xf32>
    %90 = arith.mulf %87, %89 : vector<4x32xf32>
    %cst_56 = arith.constant dense<0.000000e+00> : vector<4xf32>
    %91 = vector.multi_reduction <add>, %90, %cst_56 [1] : vector<4x32xf32> to vector<4xf32>
    %92 = vector.shape_cast %91 : vector<4xf32> to vector<4x1xf32>
    %cst_57 = arith.constant 3.200000e+01 : f32
    %93 = vector.broadcast %cst_57 : f32 to vector<4x1xf32>
    %94 = arith.divf %92, %93 : vector<4x1xf32>
    %95 = vector.broadcast %85 : vector<4x1xf32> to vector<4x32xf32>
    %96 = arith.subf %79, %95 : vector<4x32xf32>
    %cst_58 = arith.constant 9.99999997E-7 : f32
    %97 = vector.broadcast %cst_58 : f32 to vector<4x1xf32>
    %98 = arith.addf %94, %97 : vector<4x1xf32>
    %99 = math.rsqrt %98 : vector<4x1xf32>
    %100 = vector.broadcast %99 : vector<4x1xf32> to vector<4x32xf32>
    %101 = arith.mulf %96, %100 : vector<4x32xf32>
    %102 = vector.broadcast %80 : vector<1x32xf32> to vector<4x32xf32>
    %103 = arith.mulf %101, %102 : vector<4x32xf32>
    %104 = vector.broadcast %81 : vector<1x32xf32> to vector<4x32xf32>
    %105 = arith.addf %103, %104 : vector<4x32xf32>
    %106 = arith.truncf %105 : vector<4x32xf32> to vector<4x32xbf16>
    %c0_59 = arith.constant 0 : index
    %c0_60 = arith.constant 0 : index
    %107 = vector.load %arg21[%c0_59, %c0_60] : memref<32x64xbf16, #tpu.memory_space<vmem>>, vector<32x64xbf16>
    %cst_61 = arith.constant dense<0.000000e+00> : vector<4x64xf32>
    %108 = tpu.matmul %106, %107, %cst_61 {dimension_numbers = #tpu.dot_dimension_numbers<[1], [0], [0], [1], [0, 0, 1, 1], [], []>} : vector<4x32xbf16>, vector<32x64xbf16>, vector<4x64xf32> -> vector<4x64xf32>
    %c0_62 = arith.constant 0 : index
    %c0_63 = arith.constant 0 : index
    %109 = vector.load %arg22[%c0_62, %c0_63] : memref<1x64xf32, #tpu.memory_space<vmem>>, vector<1x64xf32>
    %110 = vector.broadcast %109 : vector<1x64xf32> to vector<4x64xf32>
    %111 = arith.addf %108, %110 : vector<4x64xf32>
    %cst_64 = arith.constant 5.000000e-01 : f32
    %112 = vector.broadcast %cst_64 : f32 to vector<4x64xf32>
    %113 = arith.mulf %112, %111 : vector<4x64xf32>
    %cst_65 = arith.constant 4.471500e-02 : f32
    %114 = vector.broadcast %cst_65 : f32 to vector<4x64xf32>
    %115 = arith.mulf %114, %111 : vector<4x64xf32>
    %116 = arith.mulf %115, %111 : vector<4x64xf32>
    %117 = arith.mulf %116, %111 : vector<4x64xf32>
    %118 = arith.addf %111, %117 : vector<4x64xf32>
    %cst_66 = arith.constant 0.797884583 : f32
    %119 = vector.broadcast %cst_66 : f32 to vector<4x64xf32>
    %120 = arith.mulf %119, %118 : vector<4x64xf32>
    %121 = math.tanh %120 : vector<4x64xf32>
    %cst_67 = arith.constant 1.000000e+00 : f32
    %122 = vector.broadcast %cst_67 : f32 to vector<4x64xf32>
    %123 = arith.addf %122, %121 : vector<4x64xf32>
    %124 = arith.mulf %113, %123 : vector<4x64xf32>
    %125 = arith.truncf %124 : vector<4x64xf32> to vector<4x64xbf16>
    %c0_68 = arith.constant 0 : index
    %c0_69 = arith.constant 0 : index
    %126 = vector.load %arg23[%c0_68, %c0_69] : memref<64x32xbf16, #tpu.memory_space<vmem>>, vector<64x32xbf16>
    %cst_70 = arith.constant dense<0.000000e+00> : vector<4x32xf32>
    %127 = tpu.matmul %125, %126, %cst_70 {dimension_numbers = #tpu.dot_dimension_numbers<[1], [0], [0], [1], [0, 0, 1, 1], [], []>} : vector<4x64xbf16>, vector<64x32xbf16>, vector<4x32xf32> -> vector<4x32xf32>
    %c0_71 = arith.constant 0 : index
    %c0_72 = arith.constant 0 : index
    %128 = vector.load %arg24[%c0_71, %c0_72] : memref<1x32xf32, #tpu.memory_space<vmem>>, vector<1x32xf32>
    %129 = vector.broadcast %128 : vector<1x32xf32> to vector<4x32xf32>
    %130 = arith.addf %127, %129 : vector<4x32xf32>
    %131 = arith.addf %79, %130 : vector<4x32xf32>
    %c0_73 = arith.constant 0 : index
    %c0_74 = arith.constant 0 : index
    %132 = vector.load %arg25[%c0_73, %c0_74] : memref<1x32xf32, #tpu.memory_space<vmem>>, vector<1x32xf32>
    %c0_75 = arith.constant 0 : index
    %c0_76 = arith.constant 0 : index
    %133 = vector.load %arg26[%c0_75, %c0_76] : memref<1x32xf32, #tpu.memory_space<vmem>>, vector<1x32xf32>
    %cst_77 = arith.constant dense<0.000000e+00> : vector<4xf32>
    %134 = vector.multi_reduction <add>, %131, %cst_77 [1] : vector<4x32xf32> to vector<4xf32>
    %135 = vector.shape_cast %134 : vector<4xf32> to vector<4x1xf32>
    %cst_78 = arith.constant 3.200000e+01 : f32
    %136 = vector.broadcast %cst_78 : f32 to vector<4x1xf32>
    %137 = arith.divf %135, %136 : vector<4x1xf32>
    %138 = vector.broadcast %137 : vector<4x1xf32> to vector<4x32xf32>
    %139 = arith.subf %131, %138 : vector<4x32xf32>
    %140 = vector.broadcast %137 : vector<4x1xf32> to vector<4x32xf32>
    %141 = arith.subf %131, %140 : vector<4x32xf32>
    %142 = arith.mulf %139, %141 : vector<4x32xf32>
    %cst_79 = arith.constant dense<0.000000e+00> : vector<4xf32>
    %143 = vector.multi_reduction <add>, %142, %cst_79 [1] : vector<4x32xf32> to vector<4xf32>
    %144 = vector.shape_cast %143 : vector<4xf32> to vector<4x1xf32>
    %cst_80 = arith.constant 3.200000e+01 : f32
    %145 = vector.broadcast %cst_80 : f32 to vector<4x1xf32>
    %146 = arith.divf %144, %145 : vector<4x1xf32>
    %147 = vector.broadcast %137 : vector<4x1xf32> to vector<4x32xf32>
    %148 = arith.subf %131, %147 : vector<4x32xf32>
    %cst_81 = arith.constant 9.99999997E-7 : f32
    %149 = vector.broadcast %cst_81 : f32 to vector<4x1xf32>
    %150 = arith.addf %146, %149 : vector<4x1xf32>
    %151 = math.rsqrt %150 : vector<4x1xf32>
    %152 = vector.broadcast %151 : vector<4x1xf32> to vector<4x32xf32>
    %153 = arith.mulf %148, %152 : vector<4x32xf32>
    %154 = vector.broadcast %132 : vector<1x32xf32> to vector<4x32xf32>
    %155 = arith.mulf %153, %154 : vector<4x32xf32>
    %156 = vector.broadcast %133 : vector<1x32xf32> to vector<4x32xf32>
    %157 = arith.addf %155, %156 : vector<4x32xf32>
    %c0_82 = arith.constant 0 : index
    %c0_83 = arith.constant 0 : index
    %c0_84 = arith.constant 0 : index
    %158 = vector.load %arg27[%c0_82, %c0_83, %c0_84] : memref<4x32x8xbf16, #tpu.memory_space<vmem>>, vector<4x32x8xbf16>
    %c0_85 = arith.constant 0 : index
    %c0_86 = arith.constant 0 : index
    %c0_87 = arith.constant 0 : index
    %159 = vector.load %arg29[%c0_85, %c0_86, %c0_87] : memref<4x32x8xbf16, #tpu.memory_space<vmem>>, vector<4x32x8xbf16>
    %c0_88 = arith.constant 0 : index
    %c0_89 = arith.constant 0 : index
    %c0_90 = arith.constant 0 : index
    %160 = vector.load %arg31[%c0_88, %c0_89, %c0_90] : memref<4x32x8xbf16, #tpu.memory_space<vmem>>, vector<4x32x8xbf16>
    %c0_91 = arith.constant 0 : index
    %c0_92 = arith.constant 0 : index
    %c0_93 = arith.constant 0 : index
    %161 = vector.load %arg33[%c0_91, %c0_92, %c0_93] : memref<4x8x32xbf16, #tpu.memory_space<vmem>>, vector<4x8x32xbf16>
    %c0_94 = arith.constant 0 : index
    %c0_95 = arith.constant 0 : index
    %c0_96 = arith.constant 0 : index
    %162 = vector.load %arg28[%c0_94, %c0_95, %c0_96] : memref<4x1x8xf32, #tpu.memory_space<vmem>>, vector<4x1x8xf32>
    %c0_97 = arith.constant 0 : index
    %c0_98 = arith.constant 0 : index
    %c0_99 = arith.constant 0 : index
    %163 = vector.load %arg30[%c0_97, %c0_98, %c0_99] : memref<4x1x8xf32, #tpu.memory_space<vmem>>, vector<4x1x8xf32>
    %c0_100 = arith.constant 0 : index
    %c0_101 = arith.constant 0 : index
    %c0_102 = arith.constant 0 : index
    %164 = vector.load %arg32[%c0_100, %c0_101, %c0_102] : memref<4x1x8xf32, #tpu.memory_space<vmem>>, vector<4x1x8xf32>
    %165 = arith.truncf %157 : vector<4x32xf32> to vector<4x32xbf16>
    %166 = vector.shape_cast %165 : vector<4x32xbf16> to vector<1x4x32xbf16>
    %167 = vector.broadcast %166 : vector<1x4x32xbf16> to vector<4x4x32xbf16>
    %cst_103 = arith.constant dense<0.000000e+00> : vector<4x4x8xf32>
    %168 = tpu.matmul %167, %158, %cst_103 {dimension_numbers = #tpu.dot_dimension_numbers<[2], [1], [1], [2], [0, 0, 0, 1, 1, 2], [0], [0]>} : vector<4x4x32xbf16>, vector<4x32x8xbf16>, vector<4x4x8xf32> -> vector<4x4x8xf32>
    %cst_104 = arith.constant dense<0.000000e+00> : vector<4x4x8xf32>
    %169 = tpu.matmul %167, %159, %cst_104 {dimension_numbers = #tpu.dot_dimension_numbers<[2], [1], [1], [2], [0, 0, 0, 1, 1, 2], [0], [0]>} : vector<4x4x32xbf16>, vector<4x32x8xbf16>, vector<4x4x8xf32> -> vector<4x4x8xf32>
    %cst_105 = arith.constant dense<0.000000e+00> : vector<4x4x8xf32>
    %170 = tpu.matmul %167, %160, %cst_105 {dimension_numbers = #tpu.dot_dimension_numbers<[2], [1], [1], [2], [0, 0, 0, 1, 1, 2], [0], [0]>} : vector<4x4x32xbf16>, vector<4x32x8xbf16>, vector<4x4x8xf32> -> vector<4x4x8xf32>
    %171 = vector.broadcast %162 : vector<4x1x8xf32> to vector<4x4x8xf32>
    %172 = arith.addf %168, %171 : vector<4x4x8xf32>
    %173 = vector.broadcast %163 : vector<4x1x8xf32> to vector<4x4x8xf32>
    %174 = arith.addf %169, %173 : vector<4x4x8xf32>
    %175 = vector.broadcast %164 : vector<4x1x8xf32> to vector<4x4x8xf32>
    %176 = arith.addf %170, %175 : vector<4x4x8xf32>
    %177 = arith.truncf %172 : vector<4x4x8xf32> to vector<4x4x8xbf16>
    %178 = arith.truncf %174 : vector<4x4x8xf32> to vector<4x4x8xbf16>
    %cst_106 = arith.constant dense<0.000000e+00> : vector<4x4x4xf32>
    %179 = tpu.matmul %177, %178, %cst_106 {dimension_numbers = #tpu.dot_dimension_numbers<[2], [2], [1], [1], [0, 0, 0, 1, 1, 1], [0], [0]>} : vector<4x4x8xbf16>, vector<4x4x8xbf16>, vector<4x4x4xf32> -> vector<4x4x4xf32>
    %cst_107 = arith.constant 0.353553385 : f32
    %180 = vector.broadcast %cst_107 : f32 to vector<4x4x4xf32>
    %181 = arith.mulf %179, %180 : vector<4x4x4xf32>
    %cst_108 = arith.constant dense<0xFF800000> : vector<4x4xf32>
    %182 = vector.multi_reduction <maximumf>, %181, %cst_108 [2] : vector<4x4x4xf32> to vector<4x4xf32>
    %183 = vector.shape_cast %182 : vector<4x4xf32> to vector<4x4x1xf32>
    %184 = vector.broadcast %183 : vector<4x4x1xf32> to vector<4x4x4xf32>
    %185 = arith.subf %181, %184 : vector<4x4x4xf32>
    %186 = math.exp %185 : vector<4x4x4xf32>
    %cst_109 = arith.constant dense<0.000000e+00> : vector<4x4xf32>
    %187 = vector.multi_reduction <add>, %186, %cst_109 [2] : vector<4x4x4xf32> to vector<4x4xf32>
    %188 = vector.shape_cast %187 : vector<4x4xf32> to vector<4x4x1xf32>
    %189 = tpu.reciprocal %188 {approx = true} : vector<4x4x1xf32> -> vector<4x4x1xf32>
    %190 = vector.broadcast %189 : vector<4x4x1xf32> to vector<4x4x4xf32>
    %191 = arith.mulf %186, %190 : vector<4x4x4xf32>
    %192 = arith.truncf %191 : vector<4x4x4xf32> to vector<4x4x4xbf16>
    %193 = arith.truncf %176 : vector<4x4x8xf32> to vector<4x4x8xbf16>
    %cst_110 = arith.constant dense<0.000000e+00> : vector<4x4x8xf32>
    %194 = tpu.matmul %192, %193, %cst_110 {dimension_numbers = #tpu.dot_dimension_numbers<[2], [1], [1], [2], [0, 0, 0, 1, 1, 2], [0], [0]>} : vector<4x4x4xbf16>, vector<4x4x8xbf16>, vector<4x4x8xf32> -> vector<4x4x8xf32>
    %195 = arith.truncf %194 : vector<4x4x8xf32> to vector<4x4x8xbf16>
    %cst_111 = arith.constant dense<0.000000e+00> : vector<4x4x32xf32>
    %196 = tpu.matmul %195, %161, %cst_111 {dimension_numbers = #tpu.dot_dimension_numbers<[2], [1], [1], [2], [0, 0, 0, 1, 1, 2], [0], [0]>} : vector<4x4x8xbf16>, vector<4x8x32xbf16>, vector<4x4x32xf32> -> vector<4x4x32xf32>
    %cst_112 = arith.constant dense<0.000000e+00> : vector<4x32xf32>
    %197 = vector.multi_reduction <add>, %196, %cst_112 [0] : vector<4x4x32xf32> to vector<4x32xf32>
    %198 = arith.addf %131, %197 : vector<4x32xf32>
    %c0_113 = arith.constant 0 : index
    %c0_114 = arith.constant 0 : index
    %199 = vector.load %arg34[%c0_113, %c0_114] : memref<1x32xf32, #tpu.memory_space<vmem>>, vector<1x32xf32>
    %200 = vector.broadcast %199 : vector<1x32xf32> to vector<4x32xf32>
    %201 = arith.addf %198, %200 : vector<4x32xf32>
    %c0_115 = arith.constant 0 : index
    %c0_116 = arith.constant 0 : index
    %202 = vector.load %arg35[%c0_115, %c0_116] : memref<1x32xf32, #tpu.memory_space<vmem>>, vector<1x32xf32>
    %c0_117 = arith.constant 0 : index
    %c0_118 = arith.constant 0 : index
    %203 = vector.load %arg36[%c0_117, %c0_118] : memref<1x32xf32, #tpu.memory_space<vmem>>, vector<1x32xf32>
    %cst_119 = arith.constant dense<0.000000e+00> : vector<4xf32>
    %204 = vector.multi_reduction <add>, %201, %cst_119 [1] : vector<4x32xf32> to vector<4xf32>
    %205 = vector.shape_cast %204 : vector<4xf32> to vector<4x1xf32>
    %cst_120 = arith.constant 3.200000e+01 : f32
    %206 = vector.broadcast %cst_120 : f32 to vector<4x1xf32>
    %207 = arith.divf %205, %206 : vector<4x1xf32>
    %208 = vector.broadcast %207 : vector<4x1xf32> to vector<4x32xf32>
    %209 = arith.subf %201, %208 : vector<4x32xf32>
    %210 = vector.broadcast %207 : vector<4x1xf32> to vector<4x32xf32>
    %211 = arith.subf %201, %210 : vector<4x32xf32>
    %212 = arith.mulf %209, %211 : vector<4x32xf32>
    %cst_121 = arith.constant dense<0.000000e+00> : vector<4xf32>
    %213 = vector.multi_reduction <add>, %212, %cst_121 [1] : vector<4x32xf32> to vector<4xf32>
    %214 = vector.shape_cast %213 : vector<4xf32> to vector<4x1xf32>
    %cst_122 = arith.constant 3.200000e+01 : f32
    %215 = vector.broadcast %cst_122 : f32 to vector<4x1xf32>
    %216 = arith.divf %214, %215 : vector<4x1xf32>
    %217 = vector.broadcast %207 : vector<4x1xf32> to vector<4x32xf32>
    %218 = arith.subf %201, %217 : vector<4x32xf32>
    %cst_123 = arith.constant 9.99999997E-7 : f32
    %219 = vector.broadcast %cst_123 : f32 to vector<4x1xf32>
    %220 = arith.addf %216, %219 : vector<4x1xf32>
    %221 = math.rsqrt %220 : vector<4x1xf32>
    %222 = vector.broadcast %221 : vector<4x1xf32> to vector<4x32xf32>
    %223 = arith.mulf %218, %222 : vector<4x32xf32>
    %224 = vector.broadcast %202 : vector<1x32xf32> to vector<4x32xf32>
    %225 = arith.mulf %223, %224 : vector<4x32xf32>
    %226 = vector.broadcast %203 : vector<1x32xf32> to vector<4x32xf32>
    %227 = arith.addf %225, %226 : vector<4x32xf32>
    %228 = arith.truncf %227 : vector<4x32xf32> to vector<4x32xbf16>
    %c0_124 = arith.constant 0 : index
    %c0_125 = arith.constant 0 : index
    %229 = vector.load %arg37[%c0_124, %c0_125] : memref<32x64xbf16, #tpu.memory_space<vmem>>, vector<32x64xbf16>
    %cst_126 = arith.constant dense<0.000000e+00> : vector<4x64xf32>
    %230 = tpu.matmul %228, %229, %cst_126 {dimension_numbers = #tpu.dot_dimension_numbers<[1], [0], [0], [1], [0, 0, 1, 1], [], []>} : vector<4x32xbf16>, vector<32x64xbf16>, vector<4x64xf32> -> vector<4x64xf32>
    %c0_127 = arith.constant 0 : index
    %c0_128 = arith.constant 0 : index
    %231 = vector.load %arg38[%c0_127, %c0_128] : memref<1x64xf32, #tpu.memory_space<vmem>>, vector<1x64xf32>
    %232 = vector.broadcast %231 : vector<1x64xf32> to vector<4x64xf32>
    %233 = arith.addf %230, %232 : vector<4x64xf32>
    %cst_129 = arith.constant 5.000000e-01 : f32
    %234 = vector.broadcast %cst_129 : f32 to vector<4x64xf32>
    %235 = arith.mulf %234, %233 : vector<4x64xf32>
    %cst_130 = arith.constant 4.471500e-02 : f32
    %236 = vector.broadcast %cst_130 : f32 to vector<4x64xf32>
    %237 = arith.mulf %236, %233 : vector<4x64xf32>
    %238 = arith.mulf %237, %233 : vector<4x64xf32>
    %239 = arith.mulf %238, %233 : vector<4x64xf32>
    %240 = arith.addf %233, %239 : vector<4x64xf32>
    %cst_131 = arith.constant 0.797884583 : f32
    %241 = vector.broadcast %cst_131 : f32 to vector<4x64xf32>
    %242 = arith.mulf %241, %240 : vector<4x64xf32>
    %243 = math.tanh %242 : vector<4x64xf32>
    %cst_132 = arith.constant 1.000000e+00 : f32
    %244 = vector.broadcast %cst_132 : f32 to vector<4x64xf32>
    %245 = arith.addf %244, %243 : vector<4x64xf32>
    %246 = arith.mulf %235, %245 : vector<4x64xf32>
    %247 = arith.truncf %246 : vector<4x64xf32> to vector<4x64xbf16>
    %c0_133 = arith.constant 0 : index
    %c0_134 = arith.constant 0 : index
    %248 = vector.load %arg39[%c0_133, %c0_134] : memref<64x32xbf16, #tpu.memory_space<vmem>>, vector<64x32xbf16>
    %cst_135 = arith.constant dense<0.000000e+00> : vector<4x32xf32>
    %249 = tpu.matmul %247, %248, %cst_135 {dimension_numbers = #tpu.dot_dimension_numbers<[1], [0], [0], [1], [0, 0, 1, 1], [], []>} : vector<4x64xbf16>, vector<64x32xbf16>, vector<4x32xf32> -> vector<4x32xf32>
    %c0_136 = arith.constant 0 : index
    %c0_137 = arith.constant 0 : index
    %250 = vector.load %arg40[%c0_136, %c0_137] : memref<1x32xf32, #tpu.memory_space<vmem>>, vector<1x32xf32>
    %251 = vector.broadcast %250 : vector<1x32xf32> to vector<4x32xf32>
    %252 = arith.addf %249, %251 : vector<4x32xf32>
    %253 = arith.addf %201, %252 : vector<4x32xf32>
    %c0_138 = arith.constant 0 : index
    %c0_139 = arith.constant 0 : index
    %254 = vector.load %arg41[%c0_138, %c0_139] : memref<1x32xf32, #tpu.memory_space<vmem>>, vector<1x32xf32>
    %c0_140 = arith.constant 0 : index
    %c0_141 = arith.constant 0 : index
    %255 = vector.load %arg42[%c0_140, %c0_141] : memref<1x32xf32, #tpu.memory_space<vmem>>, vector<1x32xf32>
    %cst_142 = arith.constant dense<0.000000e+00> : vector<4xf32>
    %256 = vector.multi_reduction <add>, %253, %cst_142 [1] : vector<4x32xf32> to vector<4xf32>
    %257 = vector.shape_cast %256 : vector<4xf32> to vector<4x1xf32>
    %cst_143 = arith.constant 3.200000e+01 : f32
    %258 = vector.broadcast %cst_143 : f32 to vector<4x1xf32>
    %259 = arith.divf %257, %258 : vector<4x1xf32>
    %260 = vector.broadcast %259 : vector<4x1xf32> to vector<4x32xf32>
    %261 = arith.subf %253, %260 : vector<4x32xf32>
    %262 = vector.broadcast %259 : vector<4x1xf32> to vector<4x32xf32>
    %263 = arith.subf %253, %262 : vector<4x32xf32>
    %264 = arith.mulf %261, %263 : vector<4x32xf32>
    %cst_144 = arith.constant dense<0.000000e+00> : vector<4xf32>
    %265 = vector.multi_reduction <add>, %264, %cst_144 [1] : vector<4x32xf32> to vector<4xf32>
    %266 = vector.shape_cast %265 : vector<4xf32> to vector<4x1xf32>
    %cst_145 = arith.constant 3.200000e+01 : f32
    %267 = vector.broadcast %cst_145 : f32 to vector<4x1xf32>
    %268 = arith.divf %266, %267 : vector<4x1xf32>
    %269 = vector.broadcast %259 : vector<4x1xf32> to vector<4x32xf32>
    %270 = arith.subf %253, %269 : vector<4x32xf32>
    %cst_146 = arith.constant 9.99999997E-7 : f32
    %271 = vector.broadcast %cst_146 : f32 to vector<4x1xf32>
    %272 = arith.addf %268, %271 : vector<4x1xf32>
    %273 = math.rsqrt %272 : vector<4x1xf32>
    %274 = vector.broadcast %273 : vector<4x1xf32> to vector<4x32xf32>
    %275 = arith.mulf %270, %274 : vector<4x32xf32>
    %276 = vector.broadcast %254 : vector<1x32xf32> to vector<4x32xf32>
    %277 = arith.mulf %275, %276 : vector<4x32xf32>
    %278 = vector.broadcast %255 : vector<1x32xf32> to vector<4x32xf32>
    %279 = arith.addf %277, %278 : vector<4x32xf32>
    %280 = arith.truncf %279 : vector<4x32xf32> to vector<4x32xbf16>
    %c0_147 = arith.constant 0 : index
    %c0_148 = arith.constant 0 : index
    %281 = vector.load %arg43[%c0_147, %c0_148] : memref<32x32xbf16, #tpu.memory_space<vmem>>, vector<32x32xbf16>
    %cst_149 = arith.constant dense<0.000000e+00> : vector<4x32xf32>
    %282 = tpu.matmul %280, %281, %cst_149 {dimension_numbers = #tpu.dot_dimension_numbers<[1], [0], [0], [1], [0, 0, 1, 1], [], []>} : vector<4x32xbf16>, vector<32x32xbf16>, vector<4x32xf32> -> vector<4x32xf32>
    %c0_150 = arith.constant 0 : index
    %c0_151 = arith.constant 0 : index
    %283 = vector.load %arg44[%c0_150, %c0_151] : memref<1x32xf32, #tpu.memory_space<vmem>>, vector<1x32xf32>
    %284 = vector.broadcast %283 : vector<1x32xf32> to vector<4x32xf32>
    %285 = arith.addf %282, %284 : vector<4x32xf32>
    %c0_152 = arith.constant 0 : index
    %c0_153 = arith.constant 0 : index
    %286 = vector.load %arg4[%c0_152, %c0_153] : memref<8x8xf32, #tpu.memory_space<vmem>>, vector<8x8xf32>
    %c0_154 = arith.constant 0 : index
    %c0_155 = arith.constant 0 : index
    %287 = vector.load %arg5[%c0_154, %c0_155] : memref<8x8xf32, #tpu.memory_space<vmem>>, vector<8x8xf32>
    %c0_156 = arith.constant 0 : index
    %c0_157 = arith.constant 0 : index
    %c0_158 = arith.constant 0 : index
    %288 = vector.load %arg2[%c0_156, %c0_157, %c0_158] : memref<1x8x32xf32, #tpu.memory_space<vmem>>, vector<1x8x32xf32>
    %289 = vector.shape_cast %288 : vector<1x8x32xf32> to vector<8x32xf32>
    %cst_159 = arith.constant 5.65685415 : f32
    %290 = vector.broadcast %cst_159 : f32 to vector<8x32xf32>
    %291 = arith.mulf %289, %290 : vector<8x32xf32>
    %cst_160 = arith.constant 0.000000e+00 : f32
    %292 = vector.broadcast %cst_160 : f32 to vector<4x32xf32>
    %293 = tpu.concatenate %285, %292 in 0 : vector<4x32xf32>, vector<4x32xf32> -> vector<8x32xf32>
    %c0_161 = arith.constant 0 : index
    %c0_162 = arith.constant 0 : index
    %c0_163 = arith.constant 0 : index
    %294 = vector.load %arg3[%c0_161, %c0_162, %c0_163] : memref<1x8x1xf32, #tpu.memory_space<vmem>>, vector<1x8x1xf32>
    %295 = vector.shape_cast %294 : vector<1x8x1xf32> to vector<8x1xf32>
    %cst_164 = arith.constant 0.000000e+00 : f32
    %296 = vector.broadcast %cst_164 : f32 to vector<8x1xf32>
    %297 = arith.cmpf ogt, %295, %296 : vector<8x1xf32>
    %298 = vector.shape_cast %297 : vector<8x1xi1> to vector<8x1xi1>
    %299 = vector.broadcast %298 : vector<8x1xi1> to vector<8x32xi1>
    %300 = arith.select %299, %293, %291 : vector<8x32xi1>, vector<8x32xf32>
    %c0_165 = arith.constant 0 : index
    %c0_166 = arith.constant 0 : index
    %301 = vector.load %arg45[%c0_165, %c0_166] : memref<1x32xf32, #tpu.memory_space<vmem>>, vector<1x32xf32>
    %302 = arith.mulf %300, %300 : vector<8x32xf32>
    %cst_167 = arith.constant dense<0.000000e+00> : vector<8xf32>
    %303 = vector.multi_reduction <add>, %302, %cst_167 [1] : vector<8x32xf32> to vector<8xf32>
    %304 = vector.shape_cast %303 : vector<8xf32> to vector<8x1xf32>
    %cst_168 = arith.constant 3.200000e+01 : f32
    %305 = vector.broadcast %cst_168 : f32 to vector<8x1xf32>
    %306 = arith.divf %304, %305 : vector<8x1xf32>
    %cst_169 = arith.constant 9.99999997E-7 : f32
    %307 = vector.broadcast %cst_169 : f32 to vector<8x1xf32>
    %308 = arith.addf %306, %307 : vector<8x1xf32>
    %309 = math.rsqrt %308 : vector<8x1xf32>
    %310 = vector.broadcast %309 : vector<8x1xf32> to vector<8x32xf32>
    %311 = arith.mulf %300, %310 : vector<8x32xf32>
    %cst_170 = arith.constant 1.000000e+00 : f32
    %312 = vector.broadcast %cst_170 : f32 to vector<1x32xf32>
    %313 = arith.addf %312, %301 : vector<1x32xf32>
    %314 = vector.broadcast %313 : vector<1x32xf32> to vector<8x32xf32>
    %315 = arith.mulf %311, %314 : vector<8x32xf32>
    %c0_171 = arith.constant 0 : index
    %c0_172 = arith.constant 0 : index
    %c0_173 = arith.constant 0 : index
    %316 = vector.load %arg46[%c0_171, %c0_172, %c0_173] : memref<4x32x8xbf16, #tpu.memory_space<vmem>>, vector<4x32x8xbf16>
    %c0_174 = arith.constant 0 : index
    %c0_175 = arith.constant 0 : index
    %c0_176 = arith.constant 0 : index
    %317 = vector.load %arg47[%c0_174, %c0_175, %c0_176] : memref<4x32x8xbf16, #tpu.memory_space<vmem>>, vector<4x32x8xbf16>
    %c0_177 = arith.constant 0 : index
    %c0_178 = arith.constant 0 : index
    %c0_179 = arith.constant 0 : index
    %318 = vector.load %arg48[%c0_177, %c0_178, %c0_179] : memref<4x32x8xbf16, #tpu.memory_space<vmem>>, vector<4x32x8xbf16>
    %c0_180 = arith.constant 0 : index
    %c0_181 = arith.constant 0 : index
    %c0_182 = arith.constant 0 : index
    %319 = vector.load %arg49[%c0_180, %c0_181, %c0_182] : memref<4x8x32xbf16, #tpu.memory_space<vmem>>, vector<4x8x32xbf16>
    %320 = arith.truncf %315 : vector<8x32xf32> to vector<8x32xbf16>
    %321 = vector.shape_cast %320 : vector<8x32xbf16> to vector<1x8x32xbf16>
    %322 = vector.broadcast %321 : vector<1x8x32xbf16> to vector<4x8x32xbf16>
    %cst_183 = arith.constant dense<0.000000e+00> : vector<4x8x8xf32>
    %323 = tpu.matmul %322, %316, %cst_183 {dimension_numbers = #tpu.dot_dimension_numbers<[2], [1], [1], [2], [0, 0, 0, 1, 1, 2], [0], [0]>} : vector<4x8x32xbf16>, vector<4x32x8xbf16>, vector<4x8x8xf32> -> vector<4x8x8xf32>
    %cst_184 = arith.constant dense<0.000000e+00> : vector<4x8x8xf32>
    %324 = tpu.matmul %322, %317, %cst_184 {dimension_numbers = #tpu.dot_dimension_numbers<[2], [1], [1], [2], [0, 0, 0, 1, 1, 2], [0], [0]>} : vector<4x8x32xbf16>, vector<4x32x8xbf16>, vector<4x8x8xf32> -> vector<4x8x8xf32>
    %cst_185 = arith.constant dense<0.000000e+00> : vector<4x8x8xf32>
    %325 = tpu.matmul %322, %318, %cst_185 {dimension_numbers = #tpu.dot_dimension_numbers<[2], [1], [1], [2], [0, 0, 0, 1, 1, 2], [0], [0]>} : vector<4x8x32xbf16>, vector<4x32x8xbf16>, vector<4x8x8xf32> -> vector<4x8x8xf32>
    %326 = vector.extract_strided_slice %323 {offsets = [0, 0, 0], sizes = [4, 8, 4], strides = [1, 1, 1]} : vector<4x8x8xf32> to vector<4x8x4xf32>
    %327 = vector.extract_strided_slice %323 {offsets = [0, 0, 4], sizes = [4, 8, 4], strides = [1, 1, 1]} : vector<4x8x8xf32> to vector<4x8x4xf32>
    %cst_186 = arith.constant 0.000000e+00 : f32
    %328 = vector.broadcast %cst_186 : f32 to vector<4x8x4xf32>
    %329 = arith.subf %328, %327 : vector<4x8x4xf32>
    %330 = tpu.concatenate %329, %326 in 2 : vector<4x8x4xf32>, vector<4x8x4xf32> -> vector<4x8x8xf32>
    %331 = vector.shape_cast %286 : vector<8x8xf32> to vector<1x8x8xf32>
    %332 = vector.broadcast %331 : vector<1x8x8xf32> to vector<4x8x8xf32>
    %333 = arith.mulf %323, %332 : vector<4x8x8xf32>
    %334 = vector.shape_cast %287 : vector<8x8xf32> to vector<1x8x8xf32>
    %335 = vector.broadcast %334 : vector<1x8x8xf32> to vector<4x8x8xf32>
    %336 = arith.mulf %330, %335 : vector<4x8x8xf32>
    %337 = arith.addf %333, %336 : vector<4x8x8xf32>
    %338 = vector.extract_strided_slice %324 {offsets = [0, 0, 0], sizes = [4, 8, 4], strides = [1, 1, 1]} : vector<4x8x8xf32> to vector<4x8x4xf32>
    %339 = vector.extract_strided_slice %324 {offsets = [0, 0, 4], sizes = [4, 8, 4], strides = [1, 1, 1]} : vector<4x8x8xf32> to vector<4x8x4xf32>
    %cst_187 = arith.constant 0.000000e+00 : f32
    %340 = vector.broadcast %cst_187 : f32 to vector<4x8x4xf32>
    %341 = arith.subf %340, %339 : vector<4x8x4xf32>
    %342 = tpu.concatenate %341, %338 in 2 : vector<4x8x4xf32>, vector<4x8x4xf32> -> vector<4x8x8xf32>
    %343 = vector.shape_cast %286 : vector<8x8xf32> to vector<1x8x8xf32>
    %344 = vector.broadcast %343 : vector<1x8x8xf32> to vector<4x8x8xf32>
    %345 = arith.mulf %324, %344 : vector<4x8x8xf32>
    %346 = vector.shape_cast %287 : vector<8x8xf32> to vector<1x8x8xf32>
    %347 = vector.broadcast %346 : vector<1x8x8xf32> to vector<4x8x8xf32>
    %348 = arith.mulf %342, %347 : vector<4x8x8xf32>
    %349 = arith.addf %345, %348 : vector<4x8x8xf32>
    %350 = arith.truncf %337 : vector<4x8x8xf32> to vector<4x8x8xbf16>
    %351 = arith.truncf %349 : vector<4x8x8xf32> to vector<4x8x8xbf16>
    %cst_188 = arith.constant dense<0.000000e+00> : vector<4x8x8xf32>
    %352 = tpu.matmul %350, %351, %cst_188 {dimension_numbers = #tpu.dot_dimension_numbers<[2], [2], [1], [1], [0, 0, 0, 1, 1, 1], [0], [0]>} : vector<4x8x8xbf16>, vector<4x8x8xbf16>, vector<4x8x8xf32> -> vector<4x8x8xf32>
    %cst_189 = arith.constant 0.353553385 : f32
    %353 = vector.broadcast %cst_189 : f32 to vector<4x8x8xf32>
    %354 = arith.mulf %352, %353 : vector<4x8x8xf32>
    %cst_190 = arith.constant dense<0xFF800000> : vector<4x8xf32>
    %355 = vector.multi_reduction <maximumf>, %354, %cst_190 [2] : vector<4x8x8xf32> to vector<4x8xf32>
    %356 = vector.shape_cast %355 : vector<4x8xf32> to vector<4x8x1xf32>
    %357 = vector.broadcast %356 : vector<4x8x1xf32> to vector<4x8x8xf32>
    %358 = arith.subf %354, %357 : vector<4x8x8xf32>
    %359 = math.exp %358 : vector<4x8x8xf32>
    %cst_191 = arith.constant dense<0.000000e+00> : vector<4x8xf32>
    %360 = vector.multi_reduction <add>, %359, %cst_191 [2] : vector<4x8x8xf32> to vector<4x8xf32>
    %361 = vector.shape_cast %360 : vector<4x8xf32> to vector<4x8x1xf32>
    %362 = tpu.reciprocal %361 {approx = true} : vector<4x8x1xf32> -> vector<4x8x1xf32>
    %363 = vector.broadcast %362 : vector<4x8x1xf32> to vector<4x8x8xf32>
    %364 = arith.mulf %359, %363 : vector<4x8x8xf32>
    %365 = arith.truncf %364 : vector<4x8x8xf32> to vector<4x8x8xbf16>
    %366 = arith.truncf %325 : vector<4x8x8xf32> to vector<4x8x8xbf16>
    %cst_192 = arith.constant dense<0.000000e+00> : vector<4x8x8xf32>
    %367 = tpu.matmul %365, %366, %cst_192 {dimension_numbers = #tpu.dot_dimension_numbers<[2], [1], [1], [2], [0, 0, 0, 1, 1, 2], [0], [0]>} : vector<4x8x8xbf16>, vector<4x8x8xbf16>, vector<4x8x8xf32> -> vector<4x8x8xf32>
    %368 = arith.truncf %367 : vector<4x8x8xf32> to vector<4x8x8xbf16>
    %cst_193 = arith.constant dense<0.000000e+00> : vector<4x8x32xf32>
    %369 = tpu.matmul %368, %319, %cst_193 {dimension_numbers = #tpu.dot_dimension_numbers<[2], [1], [1], [2], [0, 0, 0, 1, 1, 2], [0], [0]>} : vector<4x8x8xbf16>, vector<4x8x32xbf16>, vector<4x8x32xf32> -> vector<4x8x32xf32>
    %cst_194 = arith.constant dense<0.000000e+00> : vector<8x32xf32>
    %370 = vector.multi_reduction <add>, %369, %cst_194 [0] : vector<4x8x32xf32> to vector<8x32xf32>
    %371 = arith.addf %300, %370 : vector<8x32xf32>
    %c0_195 = arith.constant 0 : index
    %c0_196 = arith.constant 0 : index
    %372 = vector.load %arg50[%c0_195, %c0_196] : memref<1x32xf32, #tpu.memory_space<vmem>>, vector<1x32xf32>
    %373 = arith.mulf %371, %371 : vector<8x32xf32>
    %cst_197 = arith.constant dense<0.000000e+00> : vector<8xf32>
    %374 = vector.multi_reduction <add>, %373, %cst_197 [1] : vector<8x32xf32> to vector<8xf32>
    %375 = vector.shape_cast %374 : vector<8xf32> to vector<8x1xf32>
    %cst_198 = arith.constant 3.200000e+01 : f32
    %376 = vector.broadcast %cst_198 : f32 to vector<8x1xf32>
    %377 = arith.divf %375, %376 : vector<8x1xf32>
    %cst_199 = arith.constant 9.99999997E-7 : f32
    %378 = vector.broadcast %cst_199 : f32 to vector<8x1xf32>
    %379 = arith.addf %377, %378 : vector<8x1xf32>
    %380 = math.rsqrt %379 : vector<8x1xf32>
    %381 = vector.broadcast %380 : vector<8x1xf32> to vector<8x32xf32>
    %382 = arith.mulf %371, %381 : vector<8x32xf32>
    %cst_200 = arith.constant 1.000000e+00 : f32
    %383 = vector.broadcast %cst_200 : f32 to vector<1x32xf32>
    %384 = arith.addf %383, %372 : vector<1x32xf32>
    %385 = vector.broadcast %384 : vector<1x32xf32> to vector<8x32xf32>
    %386 = arith.mulf %382, %385 : vector<8x32xf32>
    %387 = arith.truncf %386 : vector<8x32xf32> to vector<8x32xbf16>
    %c0_201 = arith.constant 0 : index
    %c0_202 = arith.constant 0 : index
    %388 = vector.load %arg51[%c0_201, %c0_202] : memref<32x64xbf16, #tpu.memory_space<vmem>>, vector<32x64xbf16>
    %cst_203 = arith.constant dense<0.000000e+00> : vector<8x64xf32>
    %389 = tpu.matmul %387, %388, %cst_203 {dimension_numbers = #tpu.dot_dimension_numbers<[1], [0], [0], [1], [0, 0, 1, 1], [], []>} : vector<8x32xbf16>, vector<32x64xbf16>, vector<8x64xf32> -> vector<8x64xf32>
    %cst_204 = arith.constant 5.000000e-01 : f32
    %390 = vector.broadcast %cst_204 : f32 to vector<8x64xf32>
    %391 = arith.mulf %390, %389 : vector<8x64xf32>
    %cst_205 = arith.constant 4.471500e-02 : f32
    %392 = vector.broadcast %cst_205 : f32 to vector<8x64xf32>
    %393 = arith.mulf %392, %389 : vector<8x64xf32>
    %394 = arith.mulf %393, %389 : vector<8x64xf32>
    %395 = arith.mulf %394, %389 : vector<8x64xf32>
    %396 = arith.addf %389, %395 : vector<8x64xf32>
    %cst_206 = arith.constant 0.797884583 : f32
    %397 = vector.broadcast %cst_206 : f32 to vector<8x64xf32>
    %398 = arith.mulf %397, %396 : vector<8x64xf32>
    %399 = math.tanh %398 : vector<8x64xf32>
    %cst_207 = arith.constant 1.000000e+00 : f32
    %400 = vector.broadcast %cst_207 : f32 to vector<8x64xf32>
    %401 = arith.addf %400, %399 : vector<8x64xf32>
    %402 = arith.mulf %391, %401 : vector<8x64xf32>
    %c0_208 = arith.constant 0 : index
    %c0_209 = arith.constant 0 : index
    %403 = vector.load %arg52[%c0_208, %c0_209] : memref<32x64xbf16, #tpu.memory_space<vmem>>, vector<32x64xbf16>
    %cst_210 = arith.constant dense<0.000000e+00> : vector<8x64xf32>
    %404 = tpu.matmul %387, %403, %cst_210 {dimension_numbers = #tpu.dot_dimension_numbers<[1], [0], [0], [1], [0, 0, 1, 1], [], []>} : vector<8x32xbf16>, vector<32x64xbf16>, vector<8x64xf32> -> vector<8x64xf32>
    %405 = arith.mulf %402, %404 : vector<8x64xf32>
    %406 = arith.truncf %405 : vector<8x64xf32> to vector<8x64xbf16>
    %c0_211 = arith.constant 0 : index
    %c0_212 = arith.constant 0 : index
    %407 = vector.load %arg53[%c0_211, %c0_212] : memref<64x32xbf16, #tpu.memory_space<vmem>>, vector<64x32xbf16>
    %cst_213 = arith.constant dense<0.000000e+00> : vector<8x32xf32>
    %408 = tpu.matmul %406, %407, %cst_213 {dimension_numbers = #tpu.dot_dimension_numbers<[1], [0], [0], [1], [0, 0, 1, 1], [], []>} : vector<8x64xbf16>, vector<64x32xbf16>, vector<8x32xf32> -> vector<8x32xf32>
    %409 = arith.addf %371, %408 : vector<8x32xf32>
    %c0_214 = arith.constant 0 : index
    %c0_215 = arith.constant 0 : index
    %410 = vector.load %arg54[%c0_214, %c0_215] : memref<1x32xf32, #tpu.memory_space<vmem>>, vector<1x32xf32>
    %411 = arith.mulf %409, %409 : vector<8x32xf32>
    %cst_216 = arith.constant dense<0.000000e+00> : vector<8xf32>
    %412 = vector.multi_reduction <add>, %411, %cst_216 [1] : vector<8x32xf32> to vector<8xf32>
    %413 = vector.shape_cast %412 : vector<8xf32> to vector<8x1xf32>
    %cst_217 = arith.constant 3.200000e+01 : f32
    %414 = vector.broadcast %cst_217 : f32 to vector<8x1xf32>
    %415 = arith.divf %413, %414 : vector<8x1xf32>
    %cst_218 = arith.constant 9.99999997E-7 : f32
    %416 = vector.broadcast %cst_218 : f32 to vector<8x1xf32>
    %417 = arith.addf %415, %416 : vector<8x1xf32>
    %418 = math.rsqrt %417 : vector<8x1xf32>
    %419 = vector.broadcast %418 : vector<8x1xf32> to vector<8x32xf32>
    %420 = arith.mulf %409, %419 : vector<8x32xf32>
    %cst_219 = arith.constant 1.000000e+00 : f32
    %421 = vector.broadcast %cst_219 : f32 to vector<1x32xf32>
    %422 = arith.addf %421, %410 : vector<1x32xf32>
    %423 = vector.broadcast %422 : vector<1x32xf32> to vector<8x32xf32>
    %424 = arith.mulf %420, %423 : vector<8x32xf32>
    %c0_220 = arith.constant 0 : index
    %c0_221 = arith.constant 0 : index
    %c0_222 = arith.constant 0 : index
    %425 = vector.load %arg55[%c0_220, %c0_221, %c0_222] : memref<4x32x8xbf16, #tpu.memory_space<vmem>>, vector<4x32x8xbf16>
    %c0_223 = arith.constant 0 : index
    %c0_224 = arith.constant 0 : index
    %c0_225 = arith.constant 0 : index
    %426 = vector.load %arg56[%c0_223, %c0_224, %c0_225] : memref<4x32x8xbf16, #tpu.memory_space<vmem>>, vector<4x32x8xbf16>
    %c0_226 = arith.constant 0 : index
    %c0_227 = arith.constant 0 : index
    %c0_228 = arith.constant 0 : index
    %427 = vector.load %arg57[%c0_226, %c0_227, %c0_228] : memref<4x32x8xbf16, #tpu.memory_space<vmem>>, vector<4x32x8xbf16>
    %c0_229 = arith.constant 0 : index
    %c0_230 = arith.constant 0 : index
    %c0_231 = arith.constant 0 : index
    %428 = vector.load %arg58[%c0_229, %c0_230, %c0_231] : memref<4x8x32xbf16, #tpu.memory_space<vmem>>, vector<4x8x32xbf16>
    %429 = arith.truncf %424 : vector<8x32xf32> to vector<8x32xbf16>
    %430 = vector.shape_cast %429 : vector<8x32xbf16> to vector<1x8x32xbf16>
    %431 = vector.broadcast %430 : vector<1x8x32xbf16> to vector<4x8x32xbf16>
    %cst_232 = arith.constant dense<0.000000e+00> : vector<4x8x8xf32>
    %432 = tpu.matmul %431, %425, %cst_232 {dimension_numbers = #tpu.dot_dimension_numbers<[2], [1], [1], [2], [0, 0, 0, 1, 1, 2], [0], [0]>} : vector<4x8x32xbf16>, vector<4x32x8xbf16>, vector<4x8x8xf32> -> vector<4x8x8xf32>
    %cst_233 = arith.constant dense<0.000000e+00> : vector<4x8x8xf32>
    %433 = tpu.matmul %431, %426, %cst_233 {dimension_numbers = #tpu.dot_dimension_numbers<[2], [1], [1], [2], [0, 0, 0, 1, 1, 2], [0], [0]>} : vector<4x8x32xbf16>, vector<4x32x8xbf16>, vector<4x8x8xf32> -> vector<4x8x8xf32>
    %cst_234 = arith.constant dense<0.000000e+00> : vector<4x8x8xf32>
    %434 = tpu.matmul %431, %427, %cst_234 {dimension_numbers = #tpu.dot_dimension_numbers<[2], [1], [1], [2], [0, 0, 0, 1, 1, 2], [0], [0]>} : vector<4x8x32xbf16>, vector<4x32x8xbf16>, vector<4x8x8xf32> -> vector<4x8x8xf32>
    %435 = vector.extract_strided_slice %432 {offsets = [0, 0, 0], sizes = [4, 8, 4], strides = [1, 1, 1]} : vector<4x8x8xf32> to vector<4x8x4xf32>
    %436 = vector.extract_strided_slice %432 {offsets = [0, 0, 4], sizes = [4, 8, 4], strides = [1, 1, 1]} : vector<4x8x8xf32> to vector<4x8x4xf32>
    %cst_235 = arith.constant 0.000000e+00 : f32
    %437 = vector.broadcast %cst_235 : f32 to vector<4x8x4xf32>
    %438 = arith.subf %437, %436 : vector<4x8x4xf32>
    %439 = tpu.concatenate %438, %435 in 2 : vector<4x8x4xf32>, vector<4x8x4xf32> -> vector<4x8x8xf32>
    %440 = vector.shape_cast %286 : vector<8x8xf32> to vector<1x8x8xf32>
    %441 = vector.broadcast %440 : vector<1x8x8xf32> to vector<4x8x8xf32>
    %442 = arith.mulf %432, %441 : vector<4x8x8xf32>
    %443 = vector.shape_cast %287 : vector<8x8xf32> to vector<1x8x8xf32>
    %444 = vector.broadcast %443 : vector<1x8x8xf32> to vector<4x8x8xf32>
    %445 = arith.mulf %439, %444 : vector<4x8x8xf32>
    %446 = arith.addf %442, %445 : vector<4x8x8xf32>
    %447 = vector.extract_strided_slice %433 {offsets = [0, 0, 0], sizes = [4, 8, 4], strides = [1, 1, 1]} : vector<4x8x8xf32> to vector<4x8x4xf32>
    %448 = vector.extract_strided_slice %433 {offsets = [0, 0, 4], sizes = [4, 8, 4], strides = [1, 1, 1]} : vector<4x8x8xf32> to vector<4x8x4xf32>
    %cst_236 = arith.constant 0.000000e+00 : f32
    %449 = vector.broadcast %cst_236 : f32 to vector<4x8x4xf32>
    %450 = arith.subf %449, %448 : vector<4x8x4xf32>
    %451 = tpu.concatenate %450, %447 in 2 : vector<4x8x4xf32>, vector<4x8x4xf32> -> vector<4x8x8xf32>
    %452 = vector.shape_cast %286 : vector<8x8xf32> to vector<1x8x8xf32>
    %453 = vector.broadcast %452 : vector<1x8x8xf32> to vector<4x8x8xf32>
    %454 = arith.mulf %433, %453 : vector<4x8x8xf32>
    %455 = vector.shape_cast %287 : vector<8x8xf32> to vector<1x8x8xf32>
    %456 = vector.broadcast %455 : vector<1x8x8xf32> to vector<4x8x8xf32>
    %457 = arith.mulf %451, %456 : vector<4x8x8xf32>
    %458 = arith.addf %454, %457 : vector<4x8x8xf32>
    %459 = arith.truncf %446 : vector<4x8x8xf32> to vector<4x8x8xbf16>
    %460 = arith.truncf %458 : vector<4x8x8xf32> to vector<4x8x8xbf16>
    %cst_237 = arith.constant dense<0.000000e+00> : vector<4x8x8xf32>
    %461 = tpu.matmul %459, %460, %cst_237 {dimension_numbers = #tpu.dot_dimension_numbers<[2], [2], [1], [1], [0, 0, 0, 1, 1, 1], [0], [0]>} : vector<4x8x8xbf16>, vector<4x8x8xbf16>, vector<4x8x8xf32> -> vector<4x8x8xf32>
    %cst_238 = arith.constant 0.353553385 : f32
    %462 = vector.broadcast %cst_238 : f32 to vector<4x8x8xf32>
    %463 = arith.mulf %461, %462 : vector<4x8x8xf32>
    %cst_239 = arith.constant dense<0xFF800000> : vector<4x8xf32>
    %464 = vector.multi_reduction <maximumf>, %463, %cst_239 [2] : vector<4x8x8xf32> to vector<4x8xf32>
    %465 = vector.shape_cast %464 : vector<4x8xf32> to vector<4x8x1xf32>
    %466 = vector.broadcast %465 : vector<4x8x1xf32> to vector<4x8x8xf32>
    %467 = arith.subf %463, %466 : vector<4x8x8xf32>
    %468 = math.exp %467 : vector<4x8x8xf32>
    %cst_240 = arith.constant dense<0.000000e+00> : vector<4x8xf32>
    %469 = vector.multi_reduction <add>, %468, %cst_240 [2] : vector<4x8x8xf32> to vector<4x8xf32>
    %470 = vector.shape_cast %469 : vector<4x8xf32> to vector<4x8x1xf32>
    %471 = tpu.reciprocal %470 {approx = true} : vector<4x8x1xf32> -> vector<4x8x1xf32>
    %472 = vector.broadcast %471 : vector<4x8x1xf32> to vector<4x8x8xf32>
    %473 = arith.mulf %468, %472 : vector<4x8x8xf32>
    %474 = arith.truncf %473 : vector<4x8x8xf32> to vector<4x8x8xbf16>
    %475 = arith.truncf %434 : vector<4x8x8xf32> to vector<4x8x8xbf16>
    %cst_241 = arith.constant dense<0.000000e+00> : vector<4x8x8xf32>
    %476 = tpu.matmul %474, %475, %cst_241 {dimension_numbers = #tpu.dot_dimension_numbers<[2], [1], [1], [2], [0, 0, 0, 1, 1, 2], [0], [0]>} : vector<4x8x8xbf16>, vector<4x8x8xbf16>, vector<4x8x8xf32> -> vector<4x8x8xf32>
    %477 = arith.truncf %476 : vector<4x8x8xf32> to vector<4x8x8xbf16>
    %cst_242 = arith.constant dense<0.000000e+00> : vector<4x8x32xf32>
    %478 = tpu.matmul %477, %428, %cst_242 {dimension_numbers = #tpu.dot_dimension_numbers<[2], [1], [1], [2], [0, 0, 0, 1, 1, 2], [0], [0]>} : vector<4x8x8xbf16>, vector<4x8x32xbf16>, vector<4x8x32xf32> -> vector<4x8x32xf32>
    %cst_243 = arith.constant dense<0.000000e+00> : vector<8x32xf32>
    %479 = vector.multi_reduction <add>, %478, %cst_243 [0] : vector<4x8x32xf32> to vector<8x32xf32>
    %480 = arith.addf %409, %479 : vector<8x32xf32>
    %c0_244 = arith.constant 0 : index
    %c0_245 = arith.constant 0 : index
    %481 = vector.load %arg59[%c0_244, %c0_245] : memref<1x32xf32, #tpu.memory_space<vmem>>, vector<1x32xf32>
    %482 = arith.mulf %480, %480 : vector<8x32xf32>
    %cst_246 = arith.constant dense<0.000000e+00> : vector<8xf32>
    %483 = vector.multi_reduction <add>, %482, %cst_246 [1] : vector<8x32xf32> to vector<8xf32>
    %484 = vector.shape_cast %483 : vector<8xf32> to vector<8x1xf32>
    %cst_247 = arith.constant 3.200000e+01 : f32
    %485 = vector.broadcast %cst_247 : f32 to vector<8x1xf32>
    %486 = arith.divf %484, %485 : vector<8x1xf32>
    %cst_248 = arith.constant 9.99999997E-7 : f32
    %487 = vector.broadcast %cst_248 : f32 to vector<8x1xf32>
    %488 = arith.addf %486, %487 : vector<8x1xf32>
    %489 = math.rsqrt %488 : vector<8x1xf32>
    %490 = vector.broadcast %489 : vector<8x1xf32> to vector<8x32xf32>
    %491 = arith.mulf %480, %490 : vector<8x32xf32>
    %cst_249 = arith.constant 1.000000e+00 : f32
    %492 = vector.broadcast %cst_249 : f32 to vector<1x32xf32>
    %493 = arith.addf %492, %481 : vector<1x32xf32>
    %494 = vector.broadcast %493 : vector<1x32xf32> to vector<8x32xf32>
    %495 = arith.mulf %491, %494 : vector<8x32xf32>
    %496 = arith.truncf %495 : vector<8x32xf32> to vector<8x32xbf16>
    %c0_250 = arith.constant 0 : index
    %c0_251 = arith.constant 0 : index
    %497 = vector.load %arg60[%c0_250, %c0_251] : memref<32x64xbf16, #tpu.memory_space<vmem>>, vector<32x64xbf16>
    %cst_252 = arith.constant dense<0.000000e+00> : vector<8x64xf32>
    %498 = tpu.matmul %496, %497, %cst_252 {dimension_numbers = #tpu.dot_dimension_numbers<[1], [0], [0], [1], [0, 0, 1, 1], [], []>} : vector<8x32xbf16>, vector<32x64xbf16>, vector<8x64xf32> -> vector<8x64xf32>
    %cst_253 = arith.constant 5.000000e-01 : f32
    %499 = vector.broadcast %cst_253 : f32 to vector<8x64xf32>
    %500 = arith.mulf %499, %498 : vector<8x64xf32>
    %cst_254 = arith.constant 4.471500e-02 : f32
    %501 = vector.broadcast %cst_254 : f32 to vector<8x64xf32>
    %502 = arith.mulf %501, %498 : vector<8x64xf32>
    %503 = arith.mulf %502, %498 : vector<8x64xf32>
    %504 = arith.mulf %503, %498 : vector<8x64xf32>
    %505 = arith.addf %498, %504 : vector<8x64xf32>
    %cst_255 = arith.constant 0.797884583 : f32
    %506 = vector.broadcast %cst_255 : f32 to vector<8x64xf32>
    %507 = arith.mulf %506, %505 : vector<8x64xf32>
    %508 = math.tanh %507 : vector<8x64xf32>
    %cst_256 = arith.constant 1.000000e+00 : f32
    %509 = vector.broadcast %cst_256 : f32 to vector<8x64xf32>
    %510 = arith.addf %509, %508 : vector<8x64xf32>
    %511 = arith.mulf %500, %510 : vector<8x64xf32>
    %c0_257 = arith.constant 0 : index
    %c0_258 = arith.constant 0 : index
    %512 = vector.load %arg61[%c0_257, %c0_258] : memref<32x64xbf16, #tpu.memory_space<vmem>>, vector<32x64xbf16>
    %cst_259 = arith.constant dense<0.000000e+00> : vector<8x64xf32>
    %513 = tpu.matmul %496, %512, %cst_259 {dimension_numbers = #tpu.dot_dimension_numbers<[1], [0], [0], [1], [0, 0, 1, 1], [], []>} : vector<8x32xbf16>, vector<32x64xbf16>, vector<8x64xf32> -> vector<8x64xf32>
    %514 = arith.mulf %511, %513 : vector<8x64xf32>
    %515 = arith.truncf %514 : vector<8x64xf32> to vector<8x64xbf16>
    %c0_260 = arith.constant 0 : index
    %c0_261 = arith.constant 0 : index
    %516 = vector.load %arg62[%c0_260, %c0_261] : memref<64x32xbf16, #tpu.memory_space<vmem>>, vector<64x32xbf16>
    %cst_262 = arith.constant dense<0.000000e+00> : vector<8x32xf32>
    %517 = tpu.matmul %515, %516, %cst_262 {dimension_numbers = #tpu.dot_dimension_numbers<[1], [0], [0], [1], [0, 0, 1, 1], [], []>} : vector<8x64xbf16>, vector<64x32xbf16>, vector<8x32xf32> -> vector<8x32xf32>
    %518 = arith.addf %480, %517 : vector<8x32xf32>
    %c0_263 = arith.constant 0 : index
    %c0_264 = arith.constant 0 : index
    %519 = vector.load %arg63[%c0_263, %c0_264] : memref<1x32xf32, #tpu.memory_space<vmem>>, vector<1x32xf32>
    %520 = arith.mulf %518, %518 : vector<8x32xf32>
    %cst_265 = arith.constant dense<0.000000e+00> : vector<8xf32>
    %521 = vector.multi_reduction <add>, %520, %cst_265 [1] : vector<8x32xf32> to vector<8xf32>
    %522 = vector.shape_cast %521 : vector<8xf32> to vector<8x1xf32>
    %cst_266 = arith.constant 3.200000e+01 : f32
    %523 = vector.broadcast %cst_266 : f32 to vector<8x1xf32>
    %524 = arith.divf %522, %523 : vector<8x1xf32>
    %cst_267 = arith.constant 9.99999997E-7 : f32
    %525 = vector.broadcast %cst_267 : f32 to vector<8x1xf32>
    %526 = arith.addf %524, %525 : vector<8x1xf32>
    %527 = math.rsqrt %526 : vector<8x1xf32>
    %528 = vector.broadcast %527 : vector<8x1xf32> to vector<8x32xf32>
    %529 = arith.mulf %518, %528 : vector<8x32xf32>
    %cst_268 = arith.constant 1.000000e+00 : f32
    %530 = vector.broadcast %cst_268 : f32 to vector<1x32xf32>
    %531 = arith.addf %530, %519 : vector<1x32xf32>
    %532 = vector.broadcast %531 : vector<1x32xf32> to vector<8x32xf32>
    %533 = arith.mulf %529, %532 : vector<8x32xf32>
    %534 = arith.truncf %533 : vector<8x32xf32> to vector<8x32xbf16>
    %c0_269 = arith.constant 0 : index
    %c0_270 = arith.constant 0 : index
    %535 = vector.load %arg64[%c0_269, %c0_270] : memref<128x32xf32, #tpu.memory_space<vmem>>, vector<128x32xf32>
    %536 = arith.truncf %535 : vector<128x32xf32> to vector<128x32xbf16>
    %cst_271 = arith.constant dense<0.000000e+00> : vector<8x128xf32>
    %537 = tpu.matmul %534, %536, %cst_271 {dimension_numbers = #tpu.dot_dimension_numbers<[1], [1], [0], [0], [0, 0, 1, 0], [], []>} : vector<8x32xbf16>, vector<128x32xbf16>, vector<8x128xf32> -> vector<8x128xf32>
    %c0_272 = arith.constant 0 : index
    %c0_273 = arith.constant 0 : index
    %c0_274 = arith.constant 0 : index
    %538 = vector.load %arg65[%c0_272, %c0_273, %c0_274] : memref<1x8x128xf32, #tpu.memory_space<vmem>>, vector<1x8x128xf32>
    %539 = vector.shape_cast %538 : vector<1x8x128xf32> to vector<8x128xf32>
    %540 = vector.shape_cast %537 : vector<8x128xf32> to vector<1x8x128xf32>
    tpu.vector_store %arg65[%c0_272, %c0_273, %c0_274], %540 {strides = array<i32>} : memref<1x8x128xf32, #tpu.memory_space<vmem>>, vector<1x8x128xf32>,
    return
  }
  func.func @transform_0(%arg0: i32) -> (i32, i32, i32) {
    %c0_i32 = arith.constant 0 : i32
    %c0_i32_0 = arith.constant 0 : i32
    %c0_i32_1 = arith.constant 0 : i32
    return %arg0, %c0_i32, %c0_i32_0 : i32, i32, i32
  }
  func.func @transform_1(%arg0: i32) -> (i32, i32, i32) {
    %c0_i32 = arith.constant 0 : i32
    %c0_i32_0 = arith.constant 0 : i32
    %c0_i32_1 = arith.constant 0 : i32
    return %arg0, %c0_i32, %c0_i32_0 : i32, i32, i32
  }
  func.func @transform_2(%arg0: i32) -> (i32, i32, i32) {
    %c0_i32 = arith.constant 0 : i32
    %c0_i32_0 = arith.constant 0 : i32
    %c0_i32_1 = arith.constant 0 : i32
    return %arg0, %c0_i32, %c0_i32_0 : i32, i32, i32
  }
  func.func @transform_3(%arg0: i32) -> (i32, i32) {
    %c0_i32 = arith.constant 0 : i32
    %c0_i32_0 = arith.constant 0 : i32
    %c0_i32_1 = arith.constant 0 : i32
    return %c0_i32, %c0_i32_0 : i32, i32
  }
  func.func @transform_4(%arg0: i32) -> (i32, i32) {
    %c0_i32 = arith.constant 0 : i32
    %c0_i32_0 = arith.constant 0 : i32
    %c0_i32_1 = arith.constant 0 : i32
    return %c0_i32, %c0_i32_0 : i32, i32
  }
  func.func @transform_5(%arg0: i32) -> (i32, i32) {
    %c0_i32 = arith.constant 0 : i32
    %c0_i32_0 = arith.constant 0 : i32
    %c0_i32_1 = arith.constant 0 : i32
    return %c0_i32, %c0_i32_0 : i32, i32
  }
  func.func @transform_6(%arg0: i32) -> (i32, i32) {
    %c0_i32 = arith.constant 0 : i32
    %c0_i32_0 = arith.constant 0 : i32
    %c0_i32_1 = arith.constant 0 : i32
    return %c0_i32, %c0_i32_0 : i32, i32
  }
  func.func @transform_7(%arg0: i32) -> (i32, i32) {
    %c0_i32 = arith.constant 0 : i32
    %c0_i32_0 = arith.constant 0 : i32
    %c0_i32_1 = arith.constant 0 : i32
    return %c0_i32, %c0_i32_0 : i32, i32
  }
  func.func @transform_8(%arg0: i32) -> (i32, i32) {
    %c0_i32 = arith.constant 0 : i32
    %c0_i32_0 = arith.constant 0 : i32
    %c0_i32_1 = arith.constant 0 : i32
    return %c0_i32, %c0_i32_0 : i32, i32
  }
  func.func @transform_9(%arg0: i32) -> (i32, i32) {
    %c0_i32 = arith.constant 0 : i32
    %c0_i32_0 = arith.constant 0 : i32
    %c0_i32_1 = arith.constant 0 : i32
    return %c0_i32, %c0_i32_0 : i32, i32
  }
  func.func @transform_10(%arg0: i32) -> (i32, i32, i32) {
    %c0_i32 = arith.constant 0 : i32
    %c0_i32_0 = arith.constant 0 : i32
    %c0_i32_1 = arith.constant 0 : i32
    %c0_i32_2 = arith.constant 0 : i32
    return %c0_i32, %c0_i32_0, %c0_i32_1 : i32, i32, i32
  }
  func.func @transform_11(%arg0: i32) -> (i32, i32, i32) {
    %c0_i32 = arith.constant 0 : i32
    %c0_i32_0 = arith.constant 0 : i32
    %c0_i32_1 = arith.constant 0 : i32
    %c0_i32_2 = arith.constant 0 : i32
    return %c0_i32, %c0_i32_0, %c0_i32_1 : i32, i32, i32
  }
  func.func @transform_12(%arg0: i32) -> (i32, i32, i32) {
    %c0_i32 = arith.constant 0 : i32
    %c0_i32_0 = arith.constant 0 : i32
    %c0_i32_1 = arith.constant 0 : i32
    %c0_i32_2 = arith.constant 0 : i32
    return %c0_i32, %c0_i32_0, %c0_i32_1 : i32, i32, i32
  }
  func.func @transform_13(%arg0: i32) -> (i32, i32, i32) {
    %c0_i32 = arith.constant 0 : i32
    %c0_i32_0 = arith.constant 0 : i32
    %c0_i32_1 = arith.constant 0 : i32
    %c0_i32_2 = arith.constant 0 : i32
    return %c0_i32, %c0_i32_0, %c0_i32_1 : i32, i32, i32
  }
  func.func @transform_14(%arg0: i32) -> (i32, i32, i32) {
    %c0_i32 = arith.constant 0 : i32
    %c0_i32_0 = arith.constant 0 : i32
    %c0_i32_1 = arith.constant 0 : i32
    %c0_i32_2 = arith.constant 0 : i32
    return %c0_i32, %c0_i32_0, %c0_i32_1 : i32, i32, i32
  }
  func.func @transform_15(%arg0: i32) -> (i32, i32, i32) {
    %c0_i32 = arith.constant 0 : i32
    %c0_i32_0 = arith.constant 0 : i32
    %c0_i32_1 = arith.constant 0 : i32
    %c0_i32_2 = arith.constant 0 : i32
    return %c0_i32, %c0_i32_0, %c0_i32_1 : i32, i32, i32
  }
  func.func @transform_16(%arg0: i32) -> (i32, i32, i32) {
    %c0_i32 = arith.constant 0 : i32
    %c0_i32_0 = arith.constant 0 : i32
    %c0_i32_1 = arith.constant 0 : i32
    %c0_i32_2 = arith.constant 0 : i32
    return %c0_i32, %c0_i32_0, %c0_i32_1 : i32, i32, i32
  }
  func.func @transform_17(%arg0: i32) -> (i32, i32) {
    %c0_i32 = arith.constant 0 : i32
    %c0_i32_0 = arith.constant 0 : i32
    %c0_i32_1 = arith.constant 0 : i32
    return %c0_i32, %c0_i32_0 : i32, i32
  }
  func.func @transform_18(%arg0: i32) -> (i32, i32) {
    %c0_i32 = arith.constant 0 : i32
    %c0_i32_0 = arith.constant 0 : i32
    %c0_i32_1 = arith.constant 0 : i32
    return %c0_i32, %c0_i32_0 : i32, i32
  }
  func.func @transform_19(%arg0: i32) -> (i32, i32) {
    %c0_i32 = arith.constant 0 : i32
    %c0_i32_0 = arith.constant 0 : i32
    %c0_i32_1 = arith.constant 0 : i32
    return %c0_i32, %c0_i32_0 : i32, i32
  }
  func.func @transform_20(%arg0: i32) -> (i32, i32) {
    %c0_i32 = arith.constant 0 : i32
    %c0_i32_0 = arith.constant 0 : i32
    %c0_i32_1 = arith.constant 0 : i32
    return %c0_i32, %c0_i32_0 : i32, i32
  }
  func.func @transform_21(%arg0: i32) -> (i32, i32) {
    %c0_i32 = arith.constant 0 : i32
    %c0_i32_0 = arith.constant 0 : i32
    %c0_i32_1 = arith.constant 0 : i32
    return %c0_i32, %c0_i32_0 : i32, i32
  }
  func.func @transform_22(%arg0: i32) -> (i32, i32) {
    %c0_i32 = arith.constant 0 : i32
    %c0_i32_0 = arith.constant 0 : i32
    %c0_i32_1 = arith.constant 0 : i32
    return %c0_i32, %c0_i32_0 : i32, i32
  }
  func.func @transform_23(%arg0: i32) -> (i32, i32) {
    %c0_i32 = arith.constant 0 : i32
    %c0_i32_0 = arith.constant 0 : i32
    %c0_i32_1 = arith.constant 0 : i32
    return %c0_i32, %c0_i32_0 : i32, i32
  }
  func.func @transform_24(%arg0: i32) -> (i32, i32) {
    %c0_i32 = arith.constant 0 : i32
    %c0_i32_0 = arith.constant 0 : i32
    %c0_i32_1 = arith.constant 0 : i32
    return %c0_i32, %c0_i32_0 : i32, i32
  }
  func.func @transform_25(%arg0: i32) -> (i32, i32) {
    %c0_i32 = arith.constant 0 : i32
    %c0_i32_0 = arith.constant 0 : i32
    %c0_i32_1 = arith.constant 0 : i32
    return %c0_i32, %c0_i32_0 : i32, i32
  }
  func.func @transform_26(%arg0: i32) -> (i32, i32, i32) {
    %c0_i32 = arith.constant 0 : i32
    %c0_i32_0 = arith.constant 0 : i32
    %c0_i32_1 = arith.constant 0 : i32
    %c0_i32_2 = arith.constant 0 : i32
    return %c0_i32, %c0_i32_0, %c0_i32_1 : i32, i32, i32
  }
  func.func @transform_27(%arg0: i32) -> (i32, i32, i32) {
    %c0_i32 = arith.constant 0 : i32
    %c0_i32_0 = arith.constant 0 : i32
    %c0_i32_1 = arith.constant 0 : i32
    %c0_i32_2 = arith.constant 0 : i32
    return %c0_i32, %c0_i32_0, %c0_i32_1 : i32, i32, i32
  }
  func.func @transform_28(%arg0: i32) -> (i32, i32, i32) {
    %c0_i32 = arith.constant 0 : i32
    %c0_i32_0 = arith.constant 0 : i32
    %c0_i32_1 = arith.constant 0 : i32
    %c0_i32_2 = arith.constant 0 : i32
    return %c0_i32, %c0_i32_0, %c0_i32_1 : i32, i32, i32
  }
  func.func @transform_29(%arg0: i32) -> (i32, i32, i32) {
    %c0_i32 = arith.constant 0 : i32
    %c0_i32_0 = arith.constant 0 : i32
    %c0_i32_1 = arith.constant 0 : i32
    %c0_i32_2 = arith.constant 0 : i32
    return %c0_i32, %c0_i32_0, %c0_i32_1 : i32, i32, i32
  }
  func.func @transform_30(%arg0: i32) -> (i32, i32, i32) {
    %c0_i32 = arith.constant 0 : i32
    %c0_i32_0 = arith.constant 0 : i32
    %c0_i32_1 = arith.constant 0 : i32
    %c0_i32_2 = arith.constant 0 : i32
    return %c0_i32, %c0_i32_0, %c0_i32_1 : i32, i32, i32
  }
  func.func @transform_31(%arg0: i32) -> (i32, i32, i32) {
    %c0_i32 = arith.constant 0 : i32
    %c0_i32_0 = arith.constant 0 : i32
    %c0_i32_1 = arith.constant 0 : i32
    %c0_i32_2 = arith.constant 0 : i32
    return %c0_i32, %c0_i32_0, %c0_i32_1 : i32, i32, i32
  }
  func.func @transform_32(%arg0: i32) -> (i32, i32, i32) {
    %c0_i32 = arith.constant 0 : i32
    %c0_i32_0 = arith.constant 0 : i32
    %c0_i32_1 = arith.constant 0 : i32
    %c0_i32_2 = arith.constant 0 : i32
    return %c0_i32, %c0_i32_0, %c0_i32_1 : i32, i32, i32
  }
  func.func @transform_33(%arg0: i32) -> (i32, i32) {
    %c0_i32 = arith.constant 0 : i32
    %c0_i32_0 = arith.constant 0 : i32
    %c0_i32_1 = arith.constant 0 : i32
    return %c0_i32, %c0_i32_0 : i32, i32
  }
  func.func @transform_34(%arg0: i32) -> (i32, i32) {
    %c0_i32 = arith.constant 0 : i32
    %c0_i32_0 = arith.constant 0 : i32
    %c0_i32_1 = arith.constant 0 : i32
    return %c0_i32, %c0_i32_0 : i32, i32
  }
  func.func @transform_35(%arg0: i32) -> (i32, i32) {
    %c0_i32 = arith.constant 0 : i32
    %c0_i32_0 = arith.constant 0 : i32
    %c0_i32_1 = arith.constant 0 : i32
    return %c0_i32, %c0_i32_0 : i32, i32
  }
  func.func @transform_36(%arg0: i32) -> (i32, i32) {
    %c0_i32 = arith.constant 0 : i32
    %c0_i32_0 = arith.constant 0 : i32
    %c0_i32_1 = arith.constant 0 : i32
    return %c0_i32, %c0_i32_0 : i32, i32
  }
  func.func @transform_37(%arg0: i32) -> (i32, i32) {
    %c0_i32 = arith.constant 0 : i32
    %c0_i32_0 = arith.constant 0 : i32
    %c0_i32_1 = arith.constant 0 : i32
    return %c0_i32, %c0_i32_0 : i32, i32
  }
  func.func @transform_38(%arg0: i32) -> (i32, i32) {
    %c0_i32 = arith.constant 0 : i32
    %c0_i32_0 = arith.constant 0 : i32
    %c0_i32_1 = arith.constant 0 : i32
    return %c0_i32, %c0_i32_0 : i32, i32
  }
  func.func @transform_39(%arg0: i32) -> (i32, i32) {
    %c0_i32 = arith.constant 0 : i32
    %c0_i32_0 = arith.constant 0 : i32
    %c0_i32_1 = arith.constant 0 : i32
    return %c0_i32, %c0_i32_0 : i32, i32
  }
  func.func @transform_40(%arg0: i32) -> (i32, i32) {
    %c0_i32 = arith.constant 0 : i32
    %c0_i32_0 = arith.constant 0 : i32
    %c0_i32_1 = arith.constant 0 : i32
    return %c0_i32, %c0_i32_0 : i32, i32
  }
  func.func @transform_41(%arg0: i32) -> (i32, i32) {
    %c0_i32 = arith.constant 0 : i32
    %c0_i32_0 = arith.constant 0 : i32
    %c0_i32_1 = arith.constant 0 : i32
    return %c0_i32, %c0_i32_0 : i32, i32
  }
  func.func @transform_42(%arg0: i32) -> (i32, i32) {
    %c0_i32 = arith.constant 0 : i32
    %c0_i32_0 = arith.constant 0 : i32
    %c0_i32_1 = arith.constant 0 : i32
    return %c0_i32, %c0_i32_0 : i32, i32
  }
  func.func @transform_43(%arg0: i32) -> (i32, i32) {
    %c0_i32 = arith.constant 0 : i32
    %c0_i32_0 = arith.constant 0 : i32
    %c0_i32_1 = arith.constant 0 : i32
    return %c0_i32, %c0_i32_0 : i32, i32
  }
  func.func @transform_44(%arg0: i32) -> (i32, i32) {
    %c0_i32 = arith.constant 0 : i32
    %c0_i32_0 = arith.constant 0 : i32
    %c0_i32_1 = arith.constant 0 : i32
    return %c0_i32, %c0_i32_0 : i32, i32
  }
  func.func @transform_45(%arg0: i32) -> (i32, i32, i32) {
    %c0_i32 = arith.constant 0 : i32
    %c0_i32_0 = arith.constant 0 : i32
    %c0_i32_1 = arith.constant 0 : i32
    %c0_i32_2 = arith.constant 0 : i32
    return %c0_i32, %c0_i32_0, %c0_i32_1 : i32, i32, i32
  }
  func.func @transform_46(%arg0: i32) -> (i32, i32, i32) {
    %c0_i32 = arith.constant 0 : i32
    %c0_i32_0 = arith.constant 0 : i32
    %c0_i32_1 = arith.constant 0 : i32
    %c0_i32_2 = arith.constant 0 : i32
    return %c0_i32, %c0_i32_0, %c0_i32_1 : i32, i32, i32
  }
  func.func @transform_47(%arg0: i32) -> (i32, i32, i32) {
    %c0_i32 = arith.constant 0 : i32
    %c0_i32_0 = arith.constant 0 : i32
    %c0_i32_1 = arith.constant 0 : i32
    %c0_i32_2 = arith.constant 0 : i32
    return %c0_i32, %c0_i32_0, %c0_i32_1 : i32, i32, i32
  }
  func.func @transform_48(%arg0: i32) -> (i32, i32, i32) {
    %c0_i32 = arith.constant 0 : i32
    %c0_i32_0 = arith.constant 0 : i32
    %c0_i32_1 = arith.constant 0 : i32
    %c0_i32_2 = arith.constant 0 : i32
    return %c0_i32, %c0_i32_0, %c0_i32_1 : i32, i32, i32
  }
  func.func @transform_49(%arg0: i32) -> (i32, i32) {
    %c0_i32 = arith.constant 0 : i32
    %c0_i32_0 = arith.constant 0 : i32
    %c0_i32_1 = arith.constant 0 : i32
    return %c0_i32, %c0_i32_0 : i32, i32
  }
  func.func @transform_50(%arg0: i32) -> (i32, i32) {
    %c0_i32 = arith.constant 0 : i32
    %c0_i32_0 = arith.constant 0 : i32
    %c0_i32_1 = arith.constant 0 : i32
    return %c0_i32, %c0_i32_0 : i32, i32
  }
  func.func @transform_51(%arg0: i32) -> (i32, i32) {
    %c0_i32 = arith.constant 0 : i32
    %c0_i32_0 = arith.constant 0 : i32
    %c0_i32_1 = arith.constant 0 : i32
    return %c0_i32, %c0_i32_0 : i32, i32
  }
  func.func @transform_52(%arg0: i32) -> (i32, i32) {
    %c0_i32 = arith.constant 0 : i32
    %c0_i32_0 = arith.constant 0 : i32
    %c0_i32_1 = arith.constant 0 : i32
    return %c0_i32, %c0_i32_0 : i32, i32
  }
  func.func @transform_53(%arg0: i32) -> (i32, i32) {
    %c0_i32 = arith.constant 0 : i32
    %c0_i32_0 = arith.constant 0 : i32
    %c0_i32_1 = arith.constant 0 : i32
    return %c0_i32, %c0_i32_0 : i32, i32
  }
  func.func @transform_54(%arg0: i32) -> (i32, i32, i32) {
    %c0_i32 = arith.constant 0 : i32
    %c0_i32_0 = arith.constant 0 : i32
    %c0_i32_1 = arith.constant 0 : i32
    %c0_i32_2 = arith.constant 0 : i32
    return %c0_i32, %c0_i32_0, %c0_i32_1 : i32, i32, i32
  }
  func.func @transform_55(%arg0: i32) -> (i32, i32, i32) {
    %c0_i32 = arith.constant 0 : i32
    %c0_i32_0 = arith.constant 0 : i32
    %c0_i32_1 = arith.constant 0 : i32
    %c0_i32_2 = arith.constant 0 : i32
    return %c0_i32, %c0_i32_0, %c0_i32_1 : i32, i32, i32
  }
  func.func @transform_56(%arg0: i32) -> (i32, i32, i32) {
    %c0_i32 = arith.constant 0 : i32
    %c0_i32_0 = arith.constant 0 : i32
    %c0_i32_1 = arith.constant 0 : i32
    %c0_i32_2 = arith.constant 0 : i32
    return %c0_i32, %c0_i32_0, %c0_i32_1 : i32, i32, i32
  }
  func.func @transform_57(%arg0: i32) -> (i32, i32, i32) {
    %c0_i32 = arith.constant 0 : i32
    %c0_i32_0 = arith.constant 0 : i32
    %c0_i32_1 = arith.constant 0 : i32
    %c0_i32_2 = arith.constant 0 : i32
    return %c0_i32, %c0_i32_0, %c0_i32_1 : i32, i32, i32
  }
  func.func @transform_58(%arg0: i32) -> (i32, i32) {
    %c0_i32 = arith.constant 0 : i32
    %c0_i32_0 = arith.constant 0 : i32
    %c0_i32_1 = arith.constant 0 : i32
    return %c0_i32, %c0_i32_0 : i32, i32
  }
  func.func @transform_59(%arg0: i32) -> (i32, i32) {
    %c0_i32 = arith.constant 0 : i32
    %c0_i32_0 = arith.constant 0 : i32
    %c0_i32_1 = arith.constant 0 : i32
    return %c0_i32, %c0_i32_0 : i32, i32
  }
  func.func @transform_60(%arg0: i32) -> (i32, i32) {
    %c0_i32 = arith.constant 0 : i32
    %c0_i32_0 = arith.constant 0 : i32
    %c0_i32_1 = arith.constant 0 : i32
    return %c0_i32, %c0_i32_0 : i32, i32
  }
  func.func @transform_61(%arg0: i32) -> (i32, i32) {
    %c0_i32 = arith.constant 0 : i32
    %c0_i32_0 = arith.constant 0 : i32
    %c0_i32_1 = arith.constant 0 : i32
    return %c0_i32, %c0_i32_0 : i32, i32
  }
  func.func @transform_62(%arg0: i32) -> (i32, i32) {
    %c0_i32 = arith.constant 0 : i32
    %c0_i32_0 = arith.constant 0 : i32
    %c0_i32_1 = arith.constant 0 : i32
    return %c0_i32, %c0_i32_0 : i32, i32
  }
  func.func @transform_63(%arg0: i32) -> (i32, i32) {
    %c0_i32 = arith.constant 0 : i32
    %c0_i32_0 = arith.constant 0 : i32
    %c0_i32_1 = arith.constant 0 : i32
    return %c0_i32, %c0_i32_0 : i32, i32
  }
  func.func @transform_64(%arg0: i32) -> (i32, i32, i32) {
    %c0_i32 = arith.constant 0 : i32
    %c0_i32_0 = arith.constant 0 : i32
    %c0_i32_1 = arith.constant 0 : i32
    return %arg0, %c0_i32, %c0_i32_0 : i32, i32, i32
  }
}

</mosaic_0001>

<bundles_post_ra>
// kernel: paligemma_forward.1
= control target key start
LH: loop header
LB: loop body
LE: loop exit
PB: predicated region body
PF: predicated region fallthrough
CT: control target
= control target key end

     0   :  { %s11309_s6 = smov 1   ;;  %s11310_s10 = smov 2   ;;  %s13111_s0 = inlined_call_operand.smem [shape: u32[65], index: -1, kind: input, shape index: {}] }
   0x1   :  { %s11395_s5 = sld [smem:[%s13111_s0]]   ;;  %s11311_s14 = smov 3  }
   0x2   :  { %s11400_s9 = sld [smem:[%s13111_s0 + %s11309_s6]]   ;;  %s11312_s18 = smov 4  }
   0x3   :  { %s11405_s13 = sld [smem:[%s13111_s0 + %s11310_s10]]   ;;  %s11313_s22 = smov 5  }
   0x4   :  { %s11410_s17 = sld [smem:[%s13111_s0 + %s11311_s14]]   ;;  %s11314_s26 = smov 6  }
   0x5   :  { %s11415_s21 = sld [smem:[%s13111_s0 + %s11312_s18]]   ;;  %s11315_s30 = smov 7  }
   0x6   :  { %s11420_s25 = sld [smem:[%s13111_s0 + %s11313_s22]]   ;;  %s11316_s4 = smov 8  }
   0x7   :  { %13185 = sst [smem:[#allocation23_spill]] %s11395_s5  ;;  %s11317_s10 = smov 9  }
   0x8   :  { %13186 = sst [smem:[#allocation24_spill]] %s11400_s9  ;;  %s11318_s15 = smov 10  }
   0x9   :  { %13187 = sst [smem:[#allocation25_spill]] %s11405_s13  ;;  %s11319_s20 = smov 11  }
   0xa   :  { %13188 = sst [smem:[#allocation26_spill]] %s11410_s17  ;;  %s11321_s1 = smov 13  }
   0xb   :  { %13189 = sst [smem:[#allocation27_spill]] %s11415_s21  ;;  %s11322_s7 = smov 14  }
   0xc   :  { %s11425_s29 = sld [smem:[%s13111_s0 + %s11314_s26]]   ;;  %s11320_s26 = smov 12  }
   0xd   :  { %s11430_s3 = sld [smem:[%s13111_s0 + %s11315_s30]]   ;;  %s11324_s22 = smov 16  }
   0xe   :  { %s11435_s8 = sld [smem:[%s13111_s0 + %s11316_s4]]   ;;  %s11325_s28 = smov 17  }
   0xf   :  { %s11440_s14 = sld [smem:[%s13111_s0 + %s11317_s10]]  }
  0x10   :  { %s11445_s19 = sld [smem:[%s13111_s0 + %s11318_s15]]   ;;  %s11323_s15 = smov 15  }
  0x11   :  { %s11450_s24 = sld [smem:[%s13111_s0 + %s11319_s20]]  }
  0x12   :  { %s11455_s30 = sld [smem:[%s13111_s0 + %s11320_s26]]  }
  0x13   :  { %13190 = sst [smem:[#allocation28_spill]] %s11430_s3 }
  0x14   :  { %13191 = sst [smem:[#allocation29_spill]] %s11435_s8 }
  0x15   :  { %13192 = sst [smem:[#allocation30_spill]] %s11440_s14 }
  0x16   :  { %s11460_s6 = sld [smem:[%s13111_s0 + %s11321_s1]]  }
  0x17   :  { %13193 = sst [smem:[#allocation31_spill]] %s11450_s24 }
  0x18   :  { %13194 = sst [smem:[#allocation32_spill]] %s11455_s30 }
  0x19   :  { %s11465_s12 = sld [smem:[%s13111_s0 + %s11322_s7]]   ;;  %s11326_s7 = smov 18  }
  0x1a   :  { %s11470_s20 = sld [smem:[%s13111_s0 + %s11323_s15]]   ;;  %s11327_s15 = smov 19  }
  0x1b   :  { %s11475_s27 = sld [smem:[%s13111_s0 + %s11324_s22]]   ;;  %s11328_s22 = smov 20  }
  0x1c   :  { %13195 = sst [smem:[#allocation33_spill]] %s11460_s6 }
  0x1d   :  { %s11480_s4 = sld [smem:[%s13111_s0 + %s11325_s28]]   ;;  %s11329_s28 = smov 21  }
  0x1e   :  { %s11485_s21 = sld [smem:[%s13111_s0 + %s11326_s7]]   ;;  %s11330_s7 = smov 22  }
  0x1f   :  { %s11490_s17 = sld [smem:[%s13111_s0 + %s11327_s15]]   ;;  %s11331_s15 = smov 23  }
  0x20   :  { %13196 = sst [smem:[#allocation34_spill]] %s11470_s20 }
  0x21   :  { %13197 = sst [smem:[#allocation35_spill]] %s11475_s27 }
  0x22   :  { %s11495_s9 = sld [smem:[%s13111_s0 + %s11328_s22]]   ;;  %s11332_s22 = smov 24  }
  0x23   :  { %13198 = sst [smem:[#allocation36_spill]] %s11480_s4 }
  0x24   :  { %13199 = sst [smem:[#allocation37_spill]] %s11485_s21 }
  0x25   :  { %13200 = sst [smem:[#allocation38_spill]] %s11490_s17 }
  0x26   :  { %s11500_s13 = sld [smem:[%s13111_s0 + %s11329_s28]]   ;;  %s11333_s28 = smov 25  }
  0x27   :  { %s11505_s21 = sld [smem:[%s13111_s0 + %s11330_s7]]   ;;  %s11334_s7 = smov 26  }
  0x28   :  { %13201 = sst [smem:[#allocation39_spill]] %s11495_s9 }
  0x29   :  { %s11510_s17 = sld [smem:[%s13111_s0 + %s11331_s15]]   ;;  %s11335_s15 = smov 27  }
  0x2a   :  { %s11515_s9 = sld [smem:[%s13111_s0 + %s11332_s22]]   ;;  %s11336_s22 = smov 28  }
  0x2c   :  { %13202 = sst [smem:[#allocation40_spill]] %s11500_s13 }
  0x2d   :  { %13203 = sst [smem:[#allocation41_spill]] %s11505_s21 }
  0x2e   :  { %s11520_s13 = sld [smem:[%s13111_s0 + %s11333_s28]]   ;;  %s11337_s28 = smov 29  }
  0x2f   :  { %13204 = sst [smem:[#allocation42_spill]] %s11510_s17 }
  0x30   :  { %13205 = sst [smem:[#allocation43_spill]] %s11515_s9 }
  0x31   :  { %s11525_s21 = sld [smem:[%s13111_s0 + %s11334_s7]]   ;;  %s11338_s7 = smov 30  }
  0x32   :  { %s11530_s17 = sld [smem:[%s13111_s0 + %s11335_s15]]   ;;  %s11339_s15 = smov 31  }
  0x33   :  { %s11535_s9 = sld [smem:[%s13111_s0 + %s11336_s22]]   ;;  %s11340_s22 = smov 32  }
  0x34   :  { %13206 = sst [smem:[#allocation44_spill]] %s11520_s13 }
  0x35   :  { %s11540_s13 = sld [smem:[%s13111_s0 + %s11337_s28]]   ;;  %s11341_s28 = smov 33  }
  0x37   :  { %13207 = sst [smem:[#allocation45_spill]] %s11525_s21 }
  0x38   :  { %13208 = sst [smem:[#allocation46_spill]] %s11530_s17 }
  0x39   :  { %13209 = sst [smem:[#allocation47_spill]] %s11535_s9 }
  0x3a   :  { %s11545_s21 = sld [smem:[%s13111_s0 + %s11338_s7]]   ;;  %s11342_s7 = smov 34  }
  0x3b   :  { %13210 = sst [smem:[#allocation48_spill]] %s11540_s13 }
  0x3c   :  { %s11550_s17 = sld [smem:[%s13111_s0 + %s11339_s15]]   ;;  %s11343_s15 = smov 35  }
  0x3d   :  { %s11555_s9 = sld [smem:[%s13111_s0 + %s11340_s22]]   ;;  %s11344_s22 = smov 36  }
  0x3e   :  { %s11560_s13 = sld [smem:[%s13111_s0 + %s11341_s28]]   ;;  %s11345_s28 = smov 37  }
  0x40   :  { %13211 = sst [smem:[#allocation49_spill]] %s11545_s21 }
  0x41   :  { %s11565_s21 = sld [smem:[%s13111_s0 + %s11342_s7]]   ;;  %s11346_s7 = smov 38  }
  0x42   :  { %13212 = sst [smem:[#allocation50_spill]] %s11550_s17 }
  0x43   :  { %13213 = sst [smem:[#allocation51_spill]] %s11555_s9 }
  0x44   :  { %13214 = sst [smem:[#allocation52_spill]] %s11560_s13 }
  0x45   :  { %s11570_s17 = sld [smem:[%s13111_s0 + %s11343_s15]]   ;;  %s11347_s15 = smov 39  }
  0x46   :  { %s11575_s9 = sld [smem:[%s13111_s0 + %s11344_s22]]   ;;  %s11348_s22 = smov 40  }
  0x47   :  { %13215 = sst [smem:[#allocation53_spill]] %s11565_s21 }
  0x48   :  { %s11580_s13 = sld [smem:[%s13111_s0 + %s11345_s28]]   ;;  %s11349_s28 = smov 41  }
  0x49   :  { %s11585_s21 = sld [smem:[%s13111_s0 + %s11346_s7]]   ;;  %s11350_s7 = smov 42  }
  0x4b   :  { %13216 = sst [smem:[#allocation54_spill]] %s11570_s17 }
  0x4c   :  { %13217 = sst [smem:[#allocation55_spill]] %s11575_s9 }
  0x4d   :  { %s11590_s17 = sld [smem:[%s13111_s0 + %s11347_s15]]   ;;  %s11351_s15 = smov 43  }
  0x4e   :  { %13218 = sst [smem:[#allocation56_spill]] %s11580_s13 }
  0x4f   :  { %13219 = sst [smem:[#allocation57_spill]] %s11585_s21 }
  0x50   :  { %s11595_s9 = sld [smem:[%s13111_s0 + %s11348_s22]]   ;;  %s11352_s22 = smov 44  }
  0x51   :  { %s11600_s13 = sld [smem:[%s13111_s0 + %s11349_s28]]   ;;  %s11353_s28 = smov 45  }
  0x52   :  { %s11605_s21 = sld [smem:[%s13111_s0 + %s11350_s7]]   ;;  %s11354_s7 = smov 46  }
  0x53   :  { %13220 = sst [smem:[#allocation58_spill]] %s11590_s17 }
  0x54   :  { %s11610_s17 = sld [smem:[%s13111_s0 + %s11351_s15]]   ;;  %s11355_s15 = smov 47  }
  0x55   :  { %s11615_s4 = sld [smem:[%s13111_s0 + %s11352_s22]]   ;;  %s11356_s22 = smov 48  }
  0x56   :  { %13221 = sst [smem:[#allocation59_spill]] %s11595_s9 }
  0x57   :  { %13222 = sst [smem:[#allocation60_spill]] %s11600_s13 }
  0x58   :  { %13223 = sst [smem:[#allocation61_spill]] %s11605_s21 }
  0x59   :  { %s11620_s27 = sld [smem:[%s13111_s0 + %s11353_s28]]   ;;  %s11357_s28 = smov 49  }
  0x5a   :  { %s11625_s21 = sld [smem:[%s13111_s0 + %s11354_s7]]   ;;  %s11358_s7 = smov 50  }
  0x5b   :  { %13224 = sst [smem:[#allocation62_spill]] %s11615_s4 }
  0x5c   :  { %s11630_s20 = sld [smem:[%s13111_s0 + %s11355_s15]]   ;;  %s11359_s15 = smov 51  }
  0x5d   :  { %s11635_s24 = sld [smem:[%s13111_s0 + %s11356_s22]]   ;;  %s11360_s22 = smov 52  }
  0x5f   :  { %13225 = sst [smem:[#allocation63_spill]] %s11620_s27 }
  0x60   :  { %13226 = sst [smem:[#allocation64_spill]] %s11625_s21 }
  0x61   :  { %s11640_s27 = sld [smem:[%s13111_s0 + %s11357_s28]]   ;;  %s11361_s28 = smov 53  }
  0x62   :  { %13227 = sst [smem:[#allocation65_spill]] %s11630_s20 }
  0x63   :  { %13228 = sst [smem:[#allocation66_spill]] %s11635_s24 }
  0x64   :  { %s11645_s21 = sld [smem:[%s13111_s0 + %s11358_s7]]   ;;  %s11362_s7 = smov 54  }
  0x65   :  { %s11650_s20 = sld [smem:[%s13111_s0 + %s11359_s15]]   ;;  %s11363_s15 = smov 55  }
  0x66   :  { %s11655_s24 = sld [smem:[%s13111_s0 + %s11360_s22]]   ;;  %s11364_s22 = smov 56  }
  0x67   :  { %s11660_s6 = sld [smem:[%s13111_s0 + %s11361_s28]]   ;;  %s11365_s28 = smov 57  }
  0x68   :  { %s11680_s30 = sld [smem:[%s13111_s0 + %s11365_s28]]   ;;  %s11369_s28 = smov 61  }
  0x6a   :  { %13229 = sst [smem:[#allocation67_spill]] %s11645_s21 }
  0x6b   :  { %13230 = sst [smem:[#allocation68_spill]] %s11650_s20 }
  0x6c   :  { %13231 = sst [smem:[#allocation69_spill]] %s11655_s24 }
  0x6d   :  { %13232 = sst [smem:[#allocation70_spill]] %s11660_s6 }
  0x6e   :  { %s11665_s21 = sld [smem:[%s13111_s0 + %s11362_s7]]   ;;  %s11366_s7 = smov 58  }
  0x6f   :  { %s11670_s20 = sld [smem:[%s13111_s0 + %s11363_s15]]   ;;  %s11367_s15 = smov 59  }
  0x70   :  { %s11675_s24 = sld [smem:[%s13111_s0 + %s11364_s22]]   ;;  %s11368_s22 = smov 60  }
  0x71   :  { %13236 = sst [smem:[#allocation74_spill]] %s11680_s30 }
  0x72   :  { %s11700_s30 = sld [smem:[%s13111_s0 + %s11369_s28]]  }
  0x74   :  { %13233 = sst [smem:[#allocation71_spill]] %s11665_s21 }
  0x75   :  { %13234 = sst [smem:[#allocation72_spill]] %s11670_s20 }
  0x76   :  { %13235 = sst [smem:[#allocation73_spill]] %s11675_s24 }
  0x77   :  { %s11685_s21 = sld [smem:[%s13111_s0 + %s11366_s7]]   ;;  %s11370_s7 = smov 62  }
  0x78   :  { %s11690_s20 = sld [smem:[%s13111_s0 + %s11367_s15]]   ;;  %s11371_s15 = smov 63  }
  0x79   :  { %s11695_s24 = sld [smem:[%s13111_s0 + %s11368_s22]]   ;;  %s11372_s22 = smov 64  }
  0x7a   :  { %s11705_s14 = sld [smem:[%s13111_s0 + %s11370_s7]]  }
  0x7e   :  { %13237 = sst [smem:[#allocation75_spill]] %s11690_s20 }
  0x7f   :  { %13238 = sst [smem:[#allocation76_spill]] %s11695_s24 }
  0x80   :  { %s11710_s20 = sld [smem:[%s13111_s0 + %s11371_s15]]  }
  0x81   :  { %s11715_s24 = sld [smem:[%s13111_s0 + %s11372_s22]]  }
  0x82   :  { %134 = vsyncpa [#allocation3], 0 }
  0x83   :  { %135 = vsyncpa [#allocation6], 0 }
  0x84   :  { %136 = vsyncpa [#allocation9], 0 }
  0x85   :  { %137 = vsyncpa [#allocation12], 0 }
  0x86   :  { %138 = vsyncpa [#allocation15], 0 }
  0x87   :  { %139 = vsyncpa [#allocation4], 0 }
  0x88   :  { %141 = vsyncpa [#allocation4 + $0x1], 0  ;;  %s11717_s28 = smov 0   ;;  %s11719_s1 = smov 0  }
  0x89   :  { %s11721_s2 = smov 0   ;;  %s11723_s7 = smov 0  }
  0x8a   :  { %13239 = sst [smem:[#allocation77_spill]] %s11721_s2 }
  0x8b LB: > { %s13241_s9 = sld [smem:[#allocation59_spill]]  ;;  %s13242_s6 = sld [smem:[#allocation70_spill]]  ;;  %s11307_s7 = sphi %s11723_s7, %s13339_s7   ;;  %s11299_s1 = sphi %s11719_s1, %s13343_s1   ;;  %s11295_s28 = sphi %s11717_s28, %s13342_s28  }
  0x8c   : > { %s13243_s13 = sld [smem:[#allocation60_spill]]  ;;  %s13244_s4 = sld [smem:[#allocation62_spill]] }
  0x8d   : > { %s13245_s2 = sld [smem:[#allocation77_spill]]  ;;  %s11738_s0 = sadd.s32 4294967295, %s11307_s7  }
  0x8e   : > { %13246 = sst [smem:[#allocation77_spill]] %s11295_s28  ;;  %s9173_s10 = sadd.s32 4294967294, %s11307_s7  }
  0x8f   : > { %s11742_s11 = sadd.s32 1, %s11307_s7   ;;  %p1524_p2 = scmp.eq.s32.totalorder %s11738_s0, 1 }
  0x90   : > { %13248 = sst [smem:[#allocation79_spill]] %s11742_s11  ;;  %s1510_s16 = ssub.s32 %s11307_s7, %s11742_s11 }
  0x91   : > { %p1511_p1 = scmp.eq.s32.totalorder %s1510_s16, 0  ;;  %p1529_p3 = scmp.ne.s32.totalorder %s11299_s1, %s11295_s28 }
  0x92   : > { %p1530_p4 = scmp.eq.s32.totalorder %s9173_s10, 1  ;;  %p9174_p7 = scmp.ge.s32.totalorder %s11307_s7, 1 }
  0x93   : > { %13247 = sst [smem:[#allocation78_spill]] %s13245_s2  ;;  %s1513_s15 = sadd.s32 1, %s13245_s2 }
  0x94   : > { %p1523_p0 = scmp.ne.s32.totalorder %s13245_s2, %s11299_s1  ;;  %p11759_p6 = por %p1530_p4, %p1529_p3 }
  0x95   : > { %s11753_s18 = scalar_select %p1511_p1, %s13245_s2, %s1513_s15  }
  0x96   : > { %p11755_p5 = por %p1524_p2, %p1523_p0  ;;  %p1537_p8 = scmp.lt.s32.totalorder %s11307_s7, 3 }
  0x97   : > { %13249 = sst [smem:[#allocation80_spill]] %s11753_s18  ;;  %p13149_p9 = scmp.eq.s32.totalorder %s11738_s0, 0 }
  0x98   : > { %s13250_s22 = scalar_select %p11755_p5, 1, 0 }
  0x99   : > { %s13251_s23 = scalar_select %p11759_p6, 1, 0 }
  0x9a   : > { %p11766_p10 = pnand %p9174_p7, %p1537_p8  ;;  %s11373_s10 = smov [#allocation5]  }
  0x9b   : > { %13252 = sst [smem:[#allocation81_spill]] %s13251_s23  ;;  %s1672_s15 = sshll.u32 %s11373_s10, 4  ;;  %s1673_s15 = int_to_ptr.vmem [resolvable:$true] %s1672_s15 }
  0x9c   : > { %s13253_s26 = scalar_select %p11766_p10, 1, 0 }
  0x9d   : > { %p10612_p11 = pneg %p11766_p10  ;;  %s11374_s16 = smov [#allocation8]  }
  0x9e   : > { %s1697_s18 = sshll.u32 %s11374_s16, 4  ;;  %s11375_s11 = smov [#allocation11]   ;;  %s11778_s18 = int_to_ptr.vmem [resolvable:$true] %s1697_s18 }
  0x9f   : > { %p11774_p12 = pnand %p13149_p9, %p10612_p11  ;;  %s1740_s23 = sshll.u32 %s11375_s11, 4  ;;  %s11780_s23 = int_to_ptr.vmem [resolvable:$true] %s1740_s23 }
  0xa0   : > { %s11001_s28 = scalar_lea.hbm %s13243_s13, 16 }
  0xa1   : > { %p11002_p13 = scmp.ne.s32.totalorder %s13243_s13, %s11001_s28  ;;  %p11786_p0 = pneg %p11774_p12 }
  0xa2   : > { %p11008_p3 = scmp.lt.u32.totalorder %s11001_s28, %s13243_s13 }
  0xa3   : > { %p11004_p1 = pnand %p11786_p0, %p11002_p13 }
  0xa5   : > { %p11005_p2 = pneg %p11004_p1 }
  0xa7   : > { %p11010_p4 = pnand %p11008_p3, %p11005_p2 }
  0xa9   : > { %11013 = shalt.err (!%p11010_p4)
}
  0xaa   : > { %s11014_s16 = scalar_lea.vmem %s1673_s15, 16  ;;  %s11021_s11 = scalar_lea.vmem %s1673_s15, 32 }
  0xab   : > { %p11015_p7 = scmp.ne.s32.totalorder %s1673_s15, %s11014_s16  ;;  %p11022_p9 = scmp.lt.s32.totalorder %s1673_s15, %s1673_s15 }
  0xac   : > { %p11023_p6 = scmp.lt.s32.totalorder %s11021_s11, %s11014_s16 }
  0xad   : > { %p11017_p8 = pnand %p11015_p7, %p11786_p0 }
  0xae   : > { %p11024_p5 = por %p11023_p6, %p11022_p9 }
  0xaf   : > { %p11018_p11 = pneg %p11017_p8 }
  0xb1   : > { %p11025_p10 = pnand %p11024_p5, %p11018_p11 }
  0xb3   : > { %11028 = shalt.err (!%p11025_p10)
}
  0xb4   : > { %10618 = dma.hbm_to_vmem [thread:$0]  (!%p11774_p12), %s13243_s13, 16, %s1673_s15, [#allocation6]  }
  0xb5   : > { %s11029_s28 = scalar_lea.hbm %s13244_s4, 16 }
  0xb6   : > { %p11030_p13 = scmp.ne.s32.totalorder %s13244_s4, %s11029_s28  ;;  %p11036_p3 = scmp.lt.u32.totalorder %s11029_s28, %s13244_s4 }
  0xb8   : > { %p11032_p1 = pnand %p11030_p13, %p11786_p0 }
  0xba   : > { %p11033_p2 = pneg %p11032_p1 }
  0xbc   : > { %p11038_p4 = pnand %p11036_p3, %p11033_p2 }
  0xbe   : > { %11041 = shalt.err (!%p11038_p4)
}
  0xbf   : > { %s11042_s16 = scalar_lea.vmem %s11778_s18, 16  ;;  %s11049_s11 = scalar_lea.vmem %s11778_s18, 32 }
  0xc0   : > { %p11043_p5 = scmp.ne.s32.totalorder %s11778_s18, %s11042_s16  ;;  %p11050_p10 = scmp.lt.s32.totalorder %s11778_s18, %s11778_s18 }
  0xc1   : > { %p11051_p7 = scmp.lt.s32.totalorder %s11049_s11, %s11042_s16 }
  0xc2   : > { %p11045_p6 = pnand %p11043_p5, %p11786_p0 }
  0xc3   : > { %p11052_p8 = por %p11051_p7, %p11050_p10 }
  0xc4   : > { %p11046_p9 = pneg %p11045_p6 }
  0xc6   : > { %p11053_p11 = pnand %p11052_p8, %p11046_p9 }
  0xc8   : > { %11056 = shalt.err (!%p11053_p11)
}
  0xc9   : > { %10624 = dma.hbm_to_vmem [thread:$0]  (!%p11774_p12), %s13244_s4, 16, %s11778_s18, [#allocation9]  }
  0xca   : > { %s11057_s15 = scalar_lea.hbm %s13242_s6, 16 }
  0xcb   : > { %p11058_p13 = scmp.ne.s32.totalorder %s13242_s6, %s11057_s15  ;;  %p11064_p3 = scmp.lt.u32.totalorder %s11057_s15, %s13242_s6 }
  0xcd   : > { %p11060_p1 = pnand %p11058_p13, %p11786_p0 }
  0xcf   : > { %p11061_p2 = pneg %p11060_p1 }
  0xd1   : > { %p11066_p4 = pnand %p11064_p3, %p11061_p2 }
  0xd3   : > { %11069 = shalt.err (!%p11066_p4)
}
  0xd4   : > { %s11070_s28 = scalar_lea.vmem %s11780_s23, 16  ;;  %s11077_s16 = scalar_lea.vmem %s11780_s23, 32 }
  0xd5   : > { %p11071_p5 = scmp.ne.s32.totalorder %s11780_s23, %s11070_s28  ;;  %p11078_p10 = scmp.lt.s32.totalorder %s11780_s23, %s11780_s23 }
  0xd6   : > { %p11079_p7 = scmp.lt.s32.totalorder %s11077_s16, %s11070_s28 }
  0xd7   : > { %p11073_p6 = pnand %p11071_p5, %p11786_p0 }
  0xd8   : > { %p11080_p8 = por %p11079_p7, %p11078_p10 }
  0xd9   : > { %p11074_p9 = pneg %p11073_p6 }
  0xdb   : > { %p11081_p11 = pnand %p11080_p8, %p11074_p9 }
  0xdd   : > { %11084 = shalt.err (!%p11081_p11)
}
  0xde   : > { %10630 = dma.hbm_to_vmem [thread:$0]  (!%p11774_p12), %s13242_s6, 16, %s11780_s23, [#allocation12]  }
  0xdf   : > { %s11376_s18 = smov [#allocation2]   ;;  %s11377_s15 = smov [#allocation7]  }
  0xe0   : > { %s1661_s11 = sshll.u32 %s11376_s18, 4  ;;  %s1686_s4 = sshll.u32 %s11377_s15, 4  ;;  %s1662_s11 = int_to_ptr.vmem [resolvable:$true] %s1661_s11  ;;  %s1687_s4 = int_to_ptr.vmem [resolvable:$true] %s1686_s4 }
  0xe1   : > { %s11085_s13 = scalar_lea.hbm %s13241_s9, 16 }
  0xe2   : > { %p11086_p13 = scmp.ne.s32.totalorder %s13241_s9, %s11085_s13  ;;  %p11092_p3 = scmp.lt.u32.totalorder %s11085_s13, %s13241_s9 }
  0xe4   : > { %p11088_p1 = pnand %p11086_p13, %p11786_p0 }
  0xe6   : > { %p11089_p2 = pneg %p11088_p1 }
  0xe8   : > { %p11094_p4 = pnand %p11092_p3, %p11089_p2 }
  0xea   : > { %11097 = shalt.err (!%p11094_p4)
}
  0xeb   : > { %s11098_s28 = scalar_lea.vmem %s1662_s11, 16  ;;  %s11105_s23 = scalar_lea.vmem %s1662_s11, 32 }
  0xec   : > { %p11099_p5 = scmp.ne.s32.totalorder %s1662_s11, %s11098_s28  ;;  %p11106_p10 = scmp.lt.s32.totalorder %s1662_s11, %s1662_s11 }
  0xed   : > { %p11107_p7 = scmp.lt.s32.totalorder %s11105_s23, %s11098_s28 }
  0xee   : > { %p11101_p6 = pnand %p11099_p5, %p11786_p0 }
  0xef   : > { %p11108_p8 = por %p11107_p7, %p11106_p10 }
  0xf0   : > { %p11102_p9 = pneg %p11101_p6 }
  0xf2   : > { %p11109_p11 = pnand %p11108_p8, %p11102_p9 }
  0xf4   : > { %11112 = shalt.err (!%p11109_p11)
}
  0xf5   : > { %10615 = dma.hbm_to_vmem [thread:$0]  (!%p11774_p12), %s13241_s9, 16, %s1662_s11, [#allocation3]  }
  0xf6   : > { %s11113_s13 = scalar_lea.hbm %s11610_s17, 16 }
  0xf7   : > { %p11114_p13 = scmp.ne.s32.totalorder %s11610_s17, %s11113_s13  ;;  %p11120_p3 = scmp.lt.u32.totalorder %s11113_s13, %s11610_s17 }
  0xf9   : > { %p11116_p1 = pnand %p11114_p13, %p11786_p0 }
  0xfb   : > { %p11117_p2 = pneg %p11116_p1 }
  0xfd   : > { %p11122_p4 = pnand %p11120_p3, %p11117_p2 }
  0xff   : > { %11125 = shalt.err (!%p11122_p4)
}
 0x100   : > { %s11126_s16 = scalar_lea.vmem %s1687_s4, 16  ;;  %s11133_s18 = scalar_lea.vmem %s1687_s4, 32 }
 0x101   : > { %p11127_p5 = scmp.ne.s32.totalorder %s1687_s4, %s11126_s16  ;;  %p11134_p10 = scmp.lt.s32.totalorder %s1687_s4, %s1687_s4 }
 0x102   : > { %p11135_p7 = scmp.lt.s32.totalorder %s11133_s18, %s11126_s16 }
 0x103   : > { %p11129_p6 = pnand %p11127_p5, %p11786_p0 }
 0x104   : > { %p11136_p8 = por %p11135_p7, %p11134_p10 }
 0x105   : > { %p11130_p9 = pneg %p11129_p6 }
 0x107   : > { %p11137_p11 = pnand %p11136_p8, %p11130_p9 }
 0x109   : > { %11140 = shalt.err (!%p11137_p11)
}
 0x10a   : > { %10621 = dma.hbm_to_vmem [thread:$0]  (!%p11774_p12), %s11610_s17, 16, %s1687_s4, [#allocation6]  }
 0x10b   : > { %s11378_s11 = smov [#allocation10]   ;;  %s11379_s28 = smov [#allocation13]  }
 0x10c   : > { %s1720_s15 = sshll.u32 %s11378_s11, 4  ;;  %s1763_s23 = sshll.u32 %s11379_s28, 4  ;;  %s1721_s15 = int_to_ptr.vmem [resolvable:$true] %s1720_s15  ;;  %s1764_s23 = int_to_ptr.vmem [resolvable:$true] %s1763_s23 }
 0x10d   : > { %s11141_s13 = scalar_lea.hbm %s11640_s27, 16 }
 0x10e   : > { %p11142_p13 = scmp.ne.s32.totalorder %s11640_s27, %s11141_s13  ;;  %p11148_p3 = scmp.lt.u32.totalorder %s11141_s13, %s11640_s27 }
 0x110   : > { %p11144_p1 = pnand %p11142_p13, %p11786_p0 }
 0x112   : > { %p11145_p2 = pneg %p11144_p1 }
 0x114   : > { %p11150_p4 = pnand %p11148_p3, %p11145_p2 }
 0x116   : > { %11153 = shalt.err (!%p11150_p4)
}
 0x117   : > { %s11154_s16 = scalar_lea.vmem %s1721_s15, 16  ;;  %s11161_s4 = scalar_lea.vmem %s1721_s15, 32 }
 0x118   : > { %p11155_p5 = scmp.ne.s32.totalorder %s1721_s15, %s11154_s16  ;;  %p11162_p10 = scmp.lt.s32.totalorder %s1721_s15, %s1721_s15 }
 0x119   : > { %p11163_p7 = scmp.lt.s32.totalorder %s11161_s4, %s11154_s16 }
 0x11a   : > { %p11157_p6 = pnand %p11155_p5, %p11786_p0 }
 0x11b   : > { %p11164_p8 = por %p11163_p7, %p11162_p10 }
 0x11c   : > { %p11158_p9 = pneg %p11157_p6 }
 0x11e   : > { %p11165_p11 = pnand %p11164_p8, %p11158_p9 }
 0x120   : > { %11168 = shalt.err (!%p11165_p11)
}
 0x121   : > { %10627 = dma.hbm_to_vmem [thread:$0]  (!%p11774_p12), %s11640_s27, 16, %s1721_s15, [#allocation9]  }
 0x122   : > { %s11169_s18 = scalar_lea.hbm %s11685_s21, 16 }
 0x123   : > { %p11170_p13 = scmp.ne.s32.totalorder %s11685_s21, %s11169_s18  ;;  %p11176_p3 = scmp.lt.u32.totalorder %s11169_s18, %s11685_s21 }
 0x125   : > { %p11172_p1 = pnand %p11170_p13, %p11786_p0 }
 0x127   : > { %p11173_p2 = pneg %p11172_p1 }
 0x129   : > { %p11178_p4 = pnand %p11176_p3, %p11173_p2 }
 0x12b   : > { %11181 = shalt.err (!%p11178_p4)
}
 0x12c   : > { %s11182_s11 = scalar_lea.vmem %s1764_s23, 16  ;;  %s11189_s28 = scalar_lea.vmem %s1764_s23, 32 }
 0x12d   : > { %p11183_p5 = scmp.ne.s32.totalorder %s1764_s23, %s11182_s11  ;;  %p11190_p10 = scmp.lt.s32.totalorder %s1764_s23, %s1764_s23 }
 0x12e   : > { %p11191_p7 = scmp.lt.s32.totalorder %s11189_s28, %s11182_s11 }
 0x12f   : > { %p11185_p6 = pnand %p11183_p5, %p11786_p0 }
 0x130   : > { %p11192_p8 = por %p11191_p7, %p11190_p10 }
 0x131   : > { %p11186_p9 = pneg %p11185_p6 }
 0x133   : > { %p11193_p11 = pnand %p11192_p8, %p11186_p9 }
 0x135   : > { %11196 = shalt.err (!%p11193_p11)
}
 0x136   : > { %10633 = dma.hbm_to_vmem [thread:$0]  (!%p11774_p12), %s11685_s21, 16, %s1764_s23, [#allocation12]  }
 0x137   : > { %s11380_s15 = smov [#allocation14]   ;;  %s11197_s16 = scalar_lea.hbm %s11705_s14, 16 }
 0x138   : > { %s1783_s13 = sshll.u32 %s11380_s15, 4  ;;  %p11198_p13 = scmp.ne.s32.totalorder %s11705_s14, %s11197_s16  ;;  %s1784_s13 = int_to_ptr.vmem [resolvable:$true] %s1783_s13 }
 0x139   : > { %p11204_p3 = scmp.lt.u32.totalorder %s11197_s16, %s11705_s14 }
 0x13a   : > { %p11200_p1 = pnand %p11198_p13, %p11786_p0 }
 0x13c   : > { %p11201_p2 = pneg %p11200_p1 }
 0x13e   : > { %p11206_p4 = pnand %p11204_p3, %p11201_p2 }
 0x140   : > { %11209 = shalt.err (!%p11206_p4)
}
 0x141   : > { %s11210_s4 = scalar_lea.vmem %s1784_s13, 16  ;;  %s11217_s18 = scalar_lea.vmem %s1784_s13, 32 }
 0x142   : > { %p11211_p5 = scmp.ne.s32.totalorder %s1784_s13, %s11210_s4  ;;  %p11218_p10 = scmp.lt.s32.totalorder %s1784_s13, %s1784_s13 }
 0x143   : > { %p11219_p7 = scmp.lt.s32.totalorder %s11217_s18, %s11210_s4 }
 0x144   : > { %p11213_p6 = pnand %p11211_p5, %p11786_p0 }
 0x145   : > { %p11220_p8 = por %p11219_p7, %p11218_p10 }
 0x146   : > { %p11214_p9 = pneg %p11213_p6 }
 0x148   : > { %p11221_p11 = pnand %p11220_p8, %p11214_p9 }
 0x14a   : > { %11224 = shalt.err (!%p11221_p11)
}
 0x14b   : > { %10636 = dma.hbm_to_vmem [thread:$0]  (!%p11774_p12), %s11705_s14, 16, %s1784_s13, [#allocation15]  }
 0x14c   : > { %p13256_p13 = scmp.ne.s32.totalorder %s13253_s26, 0 }
 0x14d   : > { %p13257_p1 = scmp.eq.s32.totalorder (!%p13256_p13), %s11738_s0, 0 }
 0x14e   : > { %1821 = sbr.rel (%p13256_p13) target bundleno = 10429 (0x28bd), region = 276 }
 0x155   : > { %11270 = dma.done.wait (%p13257_p1), [#allocation3], 16   ;;  %p13258_p2 = pmov %p13257_p1 }
 0x156   : > { %p13259_p0 = pmov %p13257_p1 }
 0x157   : > { %11272 = vsyncadd (%p13258_p2), [#allocation3], 4294967280 }
 0x158   : > { %11274 = dma.done.wait (%p13259_p0), [#allocation6], 32   ;;  %p13260_p3 = pmov %p13259_p0 }
 0x159   : > { %p13261_p4 = pmov %p13259_p0 }
 0x15a   : > { %11276 = vsyncadd (%p13260_p3), [#allocation6], 4294967264 }
 0x15b   : > { %11278 = dma.done.wait (%p13261_p4), [#allocation9], 32   ;;  %p13262_p12 = pmov %p13259_p0 }
 0x15c   : > { %p13263_p5 = pmov %p13259_p0 }
 0x15d   : > { %11280 = vsyncadd (%p13262_p12), [#allocation9], 4294967264 }
 0x15e   : > { %11282 = dma.done.wait (%p13263_p5), [#allocation12], 32   ;;  %p13264_p6 = pmov %p13259_p0 }
 0x15f   : > { %p13265_p9 = pmov %p13259_p0 }
 0x160   : > { %11284 = vsyncadd (%p13264_p6), [#allocation12], 4294967264 }
 0x161   : > { %11286 = dma.done.wait (%p13265_p9), [#allocation15], 16   ;;  %p13266_p10 = pmov %p13259_p0 }
 0x162   : > { %s13267_s5 = sld [smem:[#allocation23_spill]]  ;;  %v11381_v0 = vmov 0   ;;  %p2003_p7 = scmp.lt.s32.totalorder %s11738_s0, 1  ;;  %v10768_v1 = vld [vmem:[%s11420_s25] sm:$0xff]   ;;  %v10769_v2 = vld [vmem:[%s11420_s25 + $0x8] sm:$0xff]   ;;  %v10770_v3 = vld [vmem:[%s11420_s25 + $0x10] sm:$0xff]  }
 0x163   : > { %11288 = vsyncadd (%p13266_p10), [#allocation15], 4294967280  ;;  %2130 = vmatprep.subr.bf16.mxu0 %v11381_v0  ;;  %10767 = vset.pattern.permute.xlu0 %v11381_v0  ;;  %v10771_v4 = vld [vmem:[%s11420_s25 + $0x18] sm:$0xff]   ;;  %v10772_v5 = vld [vmem:[%s11420_s25 + $0x20] sm:$0xff]   ;;  %vm2126_vm0 = vcmask 523264   ;;  %s13268_s3 = sld [smem:[#allocation28_spill]] }
 0x164   : > { %2131 = vmatpush1.bf16.msra.mxu0 %v10768_v1  ;;  %s2004_s2 = scalar_select %p2003_p7, %s11738_s0, 1  ;;  %v10773_v9 = vld [vmem:[%s11420_s25 + $0x28] sm:$0xff]   ;;  %v10774_v10 = vld [vmem:[%s11420_s25 + $0x30] sm:$0xff]   ;;  %v10775_v11 = vld [vmem:[%s11420_s25 + $0x38] sm:$0xff]   ;;  %vm2174_vm1 = vcmask 257024   ;;  %v11382_v33 = vmov 0.0  }
 0x165   : > { %2132 = vmatprep.subr.bf16.mxu0 %v11381_v0  ;;  %v10776_v12 = vld [vmem:[%s11420_s25 + $0x40] sm:$0xff]   ;;  %v10777_v13 = vld [vmem:[%s11420_s25 + $0x48] sm:$0xff]   ;;  %v10778_v14 = vld [vmem:[%s11420_s25 + $0x50] sm:$0xff]   ;;  %9782 = vmatprep.subr.bf16.mxu1 %v11382_v33  ;;  %s13269_s8 = sld [smem:[#allocation29_spill]]  ;;  %s13270_s23 = sld [smem:[#allocation30_spill]]  ;;  %vm11383_vm2 = vmmov 0  }
 0x166   : > { %s11910_s26 = sshll.u32 %s2004_s2, 3  ;;  %v10779_v15 = vld [vmem:[%s11420_s25 + $0x58] sm:$0xff]   ;;  %v9198_v17 = vld [vmem:[%s11425_s29] ss:$0 sm:$0xff]  ;;  %v10783_v34 = vld [vmem:[%s11445_s19 + $0x8] sm:$0xff]   ;;  %9786 = vmatprep.mubr.msk.bf16.mxu1 %vm11383_vm2, %v11382_v33  ;;  %vm2304_vm3 = vcmask 261120  }
 0x167   : > { %v10781_v31 = vld [vmem:[%s11445_s19] sm:$0xff]   ;;  %v10784_v35 = vld [vmem:[%s11465_s12 + $0x8] sm:$0xff]   ;;  %v10785_v45 = vld [vmem:[%s11445_s19 + $0x10] sm:$0xff]   ;;  %s13271_s11 = sld [smem:[#allocation32_spill]]  ;;  %s13272_s28 = sld [smem:[#allocation33_spill]]  ;;  %vm2976_vm4 = vcmask 64512  }
 0x168   : > { %2133 = vmatpush1.bf16.msra.mxu0 %v10769_v2  ;;  %s2007_s10 = scalar_lea.vmem %s13267_s5, %s11910_s26  ;;  %v10782_v32 = vld [vmem:[%s11465_s12] sm:$0xff]   ;;  %9783 = vmatpush3.bf16.msra.mxu1 %v10781_v31  ;;  %v10787_v48 = vld [vmem:[%s11445_s19 + $0x18] sm:$0xff]   ;;  %v10788_v49 = vld [vmem:[%s11465_s12 + $0x28] sm:$0xff]   ;;  %s13274_s13 = sld [smem:[#allocation31_spill]]  ;;  %vm3222_vm5 = vcmask 1041408   ;;  %vm3165_vm6 = vcmask 27648  }
 0x169   : > { %2134 = vmatprep.subr.bf16.mxu0 %v11381_v0  ;;  %v2017_v6 = vld [vmem:[%s2007_s10] sm:$0xff]  ;;  %9784 = vmatprep.subr.bf16.mxu1 %v11382_v33  ;;  %v10790_v51 = vld [vmem:[%s11445_s19 + $0x28] sm:$0xff]   ;;  %v10791_v52 = vld [vmem:[%s11445_s19 + $0x30] sm:$0xff]   ;;  %s13275_s16 = sld [smem:[#allocation34_spill]]  ;;  %vm3218_vm7 = vcmask 31744   ;;  %s13276_s4 = sld [smem:[#allocation35_spill]] }
 0x16a   : > { %v2019_v7 = vcombine.high %v2017_v6, %v2017_v6  ;;  %v2021_v16 = vpack.c.bf16 %v2017_v6, %v2017_v6  ;;  %v2170_v19 = vld [vmem:[%s13268_s3] sm:$0xf]  ;;  %v10792_v53 = vld [vmem:[%s11445_s19 + $0x38] sm:$0xff]   ;;  %v10801_v62 = vld [vmem:[%s11465_s12 + $0x10] sm:$0xff]   ;;  %vm3411_vm8 = vcmask 1043456   ;;  %s13277_s18 = sld [smem:[#allocation36_spill]] }
 0x16b   : > { %v9212_v40 = vld [vmem:[%s13269_s8] ss:$0 sm:$0xff]  ;;  %v10802_v63 = vld [vmem:[%s11465_s12 + $0x18] sm:$0xff]   ;;  %v10803_v1 = vld [vmem:[%s11465_s12 + $0x30] sm:$0xff]   ;;  %s13278_s2 = sld [smem:[#allocation39_spill]]  ;;  %p13335_p11 = scmp.ne.s32.totalorder %s13250_s22, 0 }
 0x16c   : > { %2135 = vmatpush1.bf16.msra.mxu0 %v10770_v3  ;;  %v2022_v8 = vpack.c.bf16 %v2019_v7, %v2019_v7  ;;  %9785 = vmatpush3.bf16.msra.mxu1 %v10783_v34  ;;  %v9213_v42 = vld [vmem:[%s13270_s23] ss:$0 sm:$0xff]  ;;  %v10804_v2 = vld [vmem:[%s11465_s12 + $0x38] sm:$0xff]   ;;  %s13280_s23 = sld [smem:[#allocation37_spill]] }
 0x16d   : > { %2136 = vmatprep.subr.bf16.mxu0 %v11381_v0  ;;  %9790 = vmatprep.subr.bf16.mxu1 %v11382_v33  ;;  %v10786_v46 = vld [vmem:[%s11465_s12 + $0x20] sm:$0xff]   ;;  %v10794_v55 = vld [vmem:[%s13271_s11 + $0x8] sm:$0xff]   ;;  %v10795_v56 = vld [vmem:[%s13271_s11 + $0x10] sm:$0xff]   ;;  %s13273_s15 = smov %s13272_s28 }
 0x16e   : > { %9211 = vmatprep.mubr.msk.bf16.mxu0 %vm2126_vm0, %v2022_v8  ;;  %v10789_v50 = vld [vmem:[%s11445_s19 + $0x20] sm:$0xff]   ;;  %v10796_v57 = vld [vmem:[%s13271_s11 + $0x18] sm:$0xff]   ;;  %v10798_v59 = vld [vmem:[%s13271_s11 + $0x28] sm:$0xff]  }
 0x16f   : > { %v10793_v54 = vld [vmem:[%s13271_s11] sm:$0xff]   ;;  %v10799_v60 = vld [vmem:[%s13271_s11 + $0x30] sm:$0xff]   ;;  %v10800_v61 = vld [vmem:[%s13271_s11 + $0x38] sm:$0xff]  }
 0x170   : > { %2137 = vmatpush1.bf16.msra.mxu0 %v10771_v4  ;;  %v10797_v58 = vld [vmem:[%s13271_s11 + $0x20] sm:$0xff]  }
 0x171   : > { %2138 = vmatprep.subr.bf16.mxu0 %v11381_v0  ;;  %s13279_s10 = smov %s13278_s2 }
 0x174   : > { %2139 = vmatpush1.bf16.msra.mxu0 %v10772_v5 }
 0x175   : > { %2140 = vmatprep.subr.bf16.mxu0 %v11381_v0 }
 0x178   : > { %2141 = vmatpush1.bf16.msra.mxu0 %v10773_v9 }
 0x179   : > { %2142 = vmatprep.subr.bf16.mxu0 %v11381_v0 }
 0x17c   : > { %2143 = vmatpush1.bf16.msra.mxu0 %v10774_v10 }
 0x17d   : > { %2144 = vmatprep.subr.bf16.mxu0 %v11381_v0 }
 0x180   : > { %2145 = vmatpush1.bf16.msra.mxu0 %v10775_v11 }
 0x181   : > { %2146 = vmatprep.subr.bf16.mxu0 %v11381_v0 }
 0x184   : > { %2147 = vmatpush1.bf16.msra.mxu0 %v10776_v12 }
 0x185   : > { %2148 = vmatprep.subr.bf16.mxu0 %v11381_v0 }
 0x188   : > { %2149 = vmatpush1.bf16.msra.mxu0 %v10777_v13 }
 0x189   : > { %2150 = vmatprep.subr.bf16.mxu0 %v11381_v0 }
 0x18c   : > { %2151 = vmatpush1.bf16.msra.mxu0 %v10778_v14 }
 0x18d   : > { %2152 = vmatprep.subr.bf16.mxu0 %v11381_v0 }
 0x190   : > { %2153 = vmatpush1.bf16.msra.mxu0 %v10779_v15 }
 0x191   : > { %9846 = vmatprep.subr.bf16.mxu0 %v11382_v33 }
 0x193   : > { %2163 = vmatmul.mubr.bf16.vlgmr.msra.gmra.mrb[0].mxu0 %v2021_v16 }
 0x194   : > { %9847 = vmatpush3.bf16.msra.mxu0 %v10782_v32  ;;  %9850 = vmatprep.mubr.msk.bf16.mxu0 %vm11383_vm2, %v11382_v33 }
 0x195   : > { %9848 = vmatprep.subr.bf16.mxu0 %v11382_v33 }
 0x198   : > { %9849 = vmatpush3.bf16.msra.mxu0 %v10784_v35 }
 0x199   : > { %9862 = vmatprep.subr.bf16.mxu0 %v11382_v33 }
 0x266   : > { %v2164_v18 = vpop.f32.mrb[0].mxu0 }
 0x267   : > { %v2165_v20 = vadd.f32 %v9198_v17, %v2164_v18  ;;  %v2166_v21 = vpop.f32.mrb[1].mxu0 }
 0x268   : > { %v2167_v22 = vpop.f32.mrb[2].mxu0 }
 0x269   : > { %v11936_v23 = vadd.f32 %v2170_v19, %v2165_v20  ;;  %v2168_v24 = vpop.f32.mrb[3].mxu0 }
 0x26b   : > { %v2175_v25 = vsel %vm2174_vm1, %v11936_v23, 0.0 }
 0x26c   : > { %2176 = vadd.xlane.f32.xlu0 %v2175_v25 }
 0x2f9   : > { %v2177_v26 = vpop.xlane.xlu0 %2176 }
 0x2fa   : > { %v2179_v27 = vmul.f32 0.03125, %v2177_v26 }
 0x2fc   : > { %v2180_v28 = vsub.f32 %v11936_v23, %v2179_v27 }
 0x2fe   : > { %v2181_v29 = vmul.f32 %v2180_v28, %v2180_v28 }
 0x300   : > { %v2182_v30 = vsel %vm2174_vm1, %v2181_v29, 0.0 }
 0x301   : > { %2183 = vadd.xlane.f32.xlu0 %v2182_v30 }
 0x38e   : > { %v2184_v36 = vpop.xlane.xlu0 %2183 }
 0x38f   : > { %v2185_v37 = vmul.f32 0.03125, %v2184_v36  ;;  %v9214_v36 = vld [vmem:[%s13274_s13] ss:$0 sm:$0xff] }
 0x391   : > { %v2186_v38 = vadd.f32 1e-06, %v2185_v37 }
 0x393   : > { %10907 = vrsqrt.f32 %v2186_v38  ;;  %v9231_v38 = vld [vmem:[%s13273_s15 + $0x1] ss:$0 sm:$0xff] }
 0x39d   : > { %v10908_v39 = vpop.eup %10907 }
 0x39e   : > { %v2188_v41 = vmul.f32 %v10908_v39, %v2180_v28  ;;  %v9230_v28 = vld [vmem:[%s13272_s28] ss:$0 sm:$0xff]  ;;  %s13281_s28 = sld [smem:[#allocation38_spill]] }
 0x3a0   : > { %v2195_v43 = vmul.f32 %v9212_v40, %v2188_v41 }
 0x3a2   : > { %v2202_v44 = vadd.f32 %v9213_v42, %v2195_v43 }
 0x3a4   : > { %v11960_v47 = vpack.c.bf16 %v2202_v44, %v2202_v44 }
 0x3a6   : > { %9787 = vmatmul.mubr.msk.bf16.vlgmr.msra.gmra.mrb[0].mxu1 %vm2304_vm3, %v11960_v47  ;;  %9851 = vmatmul.mubr.msk.bf16.vlgmr.msra.gmra.mrb[4].mxu0 %vm2304_vm3, %v11960_v47 }
 0x3a7   : > { %9791 = vmatpush3.bf16.msra.mxu1 %v10785_v45  ;;  %9863 = vmatpush3.bf16.msra.mxu0 %v10786_v46 }
 0x3a8   : > { %9792 = vmatprep.subr.bf16.mxu1 %v11382_v33  ;;  %9864 = vmatprep.subr.bf16.mxu0 %v11382_v33 }
 0x3a9   : > { %9794 = vmatprep.mubr.msk.bf16.mxu1 %vm11383_vm2, %v11382_v33  ;;  %9866 = vmatprep.mubr.msk.bf16.mxu0 %vm11383_vm2, %v11382_v33 }
 0x3ab   : > { %9793 = vmatpush3.bf16.msra.mxu1 %v10787_v48  ;;  %9865 = vmatpush3.bf16.msra.mxu0 %v10788_v49  ;;  %v9232_v49 = vld [vmem:[%s13273_s15 + $0x2] ss:$0 sm:$0xff] }
 0x3ac   : > { %9798 = vmatprep.subr.bf16.mxu1 %v11382_v33  ;;  %9878 = vmatprep.subr.bf16.mxu0 %v11382_v33 }
 0x3ae   : > { %9795 = vmatmul.mubr.msk.bf16.vlgmr.msra.gmra.mrb[4].mxu1 %vm2304_vm3, %v11960_v47  ;;  %9867 = vmatmul.mubr.msk.bf16.vlgmr.msra.gmra.mrb[8].mxu0 %vm2304_vm3, %v11960_v47 }
 0x3af   : > { %9799 = vmatpush3.bf16.msra.mxu1 %v10789_v50  ;;  %9802 = vmatprep.mubr.msk.bf16.mxu1 %vm11383_vm2, %v11382_v33 }
 0x3b0   : > { %9800 = vmatprep.subr.bf16.mxu1 %v11382_v33  ;;  %9880 = vmatprep.mubr.msk.bf16.mxu0 %vm11383_vm2, %v11382_v33 }
 0x3b3   : > { %9801 = vmatpush3.bf16.msra.mxu1 %v10790_v51 }
 0x3b4   : > { %9806 = vmatprep.subr.bf16.mxu1 %v11382_v33 }
 0x3b6   : > { %9803 = vmatmul.mubr.msk.bf16.vlgmr.msra.gmra.mrb[8].mxu1 %vm2304_vm3, %v11960_v47 }
 0x3b7   : > { %9807 = vmatpush3.bf16.msra.mxu1 %v10791_v52  ;;  %9810 = vmatprep.mubr.msk.bf16.mxu1 %vm11383_vm2, %v11382_v33 }
 0x3b8   : > { %9808 = vmatprep.subr.bf16.mxu1 %v11382_v33 }
 0x3bb   : > { %9809 = vmatpush3.bf16.msra.mxu1 %v10792_v53 }
 0x3bc   : > { %9814 = vmatprep.subr.bf16.mxu1 %v11382_v33 }
 0x3be   : > { %9811 = vmatmul.mubr.msk.bf16.vlgmr.msra.gmra.mrb[12].mxu1 %vm2304_vm3, %v11960_v47 }
 0x3bf   : > { %9815 = vmatpush3.bf16.msra.mxu1 %v10793_v54  ;;  %9818 = vmatprep.mubr.msk.bf16.mxu1 %vm11383_vm2, %v11382_v33  ;;  %v9246_v54 = vld [vmem:[%s13275_s16] ss:$0 sm:$0xff] }
 0x3c0   : > { %9816 = vmatprep.subr.bf16.mxu1 %v11382_v33 }
 0x3c3   : > { %9817 = vmatpush3.bf16.msra.mxu1 %v10794_v55 }
 0x3c4   : > { %9822 = vmatprep.subr.bf16.mxu1 %v11382_v33 }
 0x3c6   : > { %9819 = vmatmul.mubr.msk.bf16.vlgmr.msra.gmra.mrb[16].mxu1 %vm2304_vm3, %v11960_v47 }
 0x3c7   : > { %9823 = vmatpush3.bf16.msra.mxu1 %v10795_v56  ;;  %9826 = vmatprep.mubr.msk.bf16.mxu1 %vm11383_vm2, %v11382_v33 }
 0x3c8   : > { %9824 = vmatprep.subr.bf16.mxu1 %v11382_v33 }
 0x3cb   : > { %9825 = vmatpush3.bf16.msra.mxu1 %v10796_v57 }
 0x3cc   : > { %9830 = vmatprep.subr.bf16.mxu1 %v11382_v33 }
 0x3ce   : > { %9827 = vmatmul.mubr.msk.bf16.vlgmr.msra.gmra.mrb[20].mxu1 %vm2304_vm3, %v11960_v47 }
 0x3cf   : > { %9831 = vmatpush3.bf16.msra.mxu1 %v10797_v58  ;;  %9834 = vmatprep.mubr.msk.bf16.mxu1 %vm11383_vm2, %v11382_v33 }
 0x3d0   : > { %9832 = vmatprep.subr.bf16.mxu1 %v11382_v33 }
 0x3d3   : > { %9833 = vmatpush3.bf16.msra.mxu1 %v10798_v59  ;;  %v9216_v59 = vld [vmem:[%s13274_s13 + $0x2] ss:$0 sm:$0xff] }
 0x3d4   : > { %9838 = vmatprep.subr.bf16.mxu1 %v11382_v33 }
 0x3d6   : > { %9835 = vmatmul.mubr.msk.bf16.vlgmr.msra.gmra.mrb[24].mxu1 %vm2304_vm3, %v11960_v47 }
 0x3d7   : > { %9839 = vmatpush3.bf16.msra.mxu1 %v10799_v60  ;;  %9842 = vmatprep.mubr.msk.bf16.mxu1 %vm11383_vm2, %v11382_v33 }
 0x3d8   : > { %9840 = vmatprep.subr.bf16.mxu1 %v11382_v33 }
 0x3db   : > { %9841 = vmatpush3.bf16.msra.mxu1 %v10800_v61 }
 0x3dc   : > { %9854 = vmatprep.subr.bf16.mxu1 %v11382_v33 }
 0x3de   : > { %9843 = vmatmul.mubr.msk.bf16.vlgmr.msra.gmra.mrb[28].mxu1 %vm2304_vm3, %v11960_v47 }
 0x3df   : > { %9855 = vmatpush3.bf16.msra.mxu1 %v10801_v62  ;;  %9858 = vmatprep.mubr.msk.bf16.mxu1 %vm11383_vm2, %v11382_v33  ;;  %v9233_v62 = vld [vmem:[%s13273_s15 + $0x3] ss:$0 sm:$0xff] }
 0x3e0   : > { %9856 = vmatprep.subr.bf16.mxu1 %v11382_v33 }
 0x3e3   : > { %9857 = vmatpush3.bf16.msra.mxu1 %v10802_v63 }
 0x3e4   : > { %9870 = vmatprep.subr.bf16.mxu1 %v11382_v33 }
 0x3e6   : > { %9859 = vmatmul.mubr.msk.bf16.vlgmr.msra.gmra.mrb[32].mxu1 %vm2304_vm3, %v11960_v47 }
 0x3e7   : > { %9871 = vmatpush3.bf16.msra.mxu1 %v10803_v1  ;;  %9874 = vmatprep.mubr.msk.bf16.mxu1 %vm11383_vm2, %v11382_v33 }
 0x3e8   : > { %9872 = vmatprep.subr.bf16.mxu1 %v11382_v33 }
 0x3eb   : > { %9873 = vmatpush3.bf16.msra.mxu1 %v10804_v2 }
 0x3ec   : > { %9884 = vmatprep.subr.bf16.mxu1 %v11382_v33 }
 0x3ee   : > { %9875 = vmatmul.mubr.msk.bf16.vlgmr.msra.gmra.mrb[36].mxu1 %vm2304_vm3, %v11960_v47  ;;  %v9215_v47 = vld [vmem:[%s13274_s13 + $0x1] ss:$0 sm:$0xff] }
 0x3ef   : > { %9886 = vmatprep.mubr.msk.bf16.mxu1 %vm11383_vm2, %v11382_v33 }
 0x479   : > { %v2342_v3 = vpop.f32.mrb[0].mxu1  ;;  %v2806_v4 = vpop.f32.mrb[4].mxu0 }
 0x47a   : > { %v9788_v5 = vpop.f32.mrb[1].mxu1  ;;  %v9852_v6 = vpop.f32.mrb[5].mxu0  ;;  %v2343_v39 = vadd.f32 %v9214_v36, %v2342_v3  ;;  %v2807_v60 = vadd.f32 %v9246_v54, %v2806_v4 }
 0x47b   : > { %v2345_v7 = vpop.f32.mrb[2].mxu1  ;;  %v2809_v8 = vpop.f32.mrb[6].mxu0 }
 0x47c   : > { %v9789_v9 = vpop.f32.mrb[3].mxu1  ;;  %v9853_v10 = vpop.f32.mrb[7].mxu0  ;;  %v2968_v44 = vpack.c.bf16 %v2343_v39, %v2343_v39  ;;  %v3214_v2 = vpack.c.bf16 %v2807_v60, %v2807_v60 }
 0x47d   : > { %v9217_v9 = vld [vmem:[%s13274_s13 + $0x3] ss:$0 sm:$0xff] }
 0x47e   : > { %v3224_v10 = vsel %vm3222_vm5, %v3214_v2, 0 }
 0x481   : > { %v2394_v11 = vpop.f32.mrb[4].mxu1  ;;  %v12048_v12 = vpop.f32.mrb[8].mxu0 }
 0x482   : > { %v9796_v13 = vpop.f32.mrb[5].mxu1  ;;  %v9868_v14 = vpop.f32.mrb[9].mxu0  ;;  %v2395_v50 = vadd.f32 %v9215_v47, %v2394_v11 }
 0x483   : > { %v2397_v15 = vpop.f32.mrb[6].mxu1  ;;  %v2913_v16 = vpop.f32.mrb[10].mxu0  ;;  %v9247_v13 = vld [vmem:[%s13275_s16 + $0x1] ss:$0 sm:$0xff] }
 0x484   : > { %v9797_v17 = vpop.f32.mrb[7].mxu1  ;;  %v9869_v18 = vpop.f32.mrb[11].mxu0  ;;  %v2969_v56 = vpack.c.bf16 %v2395_v50, %v2395_v50 }
 0x489   : > { %v2446_v19 = vpop.f32.mrb[8].mxu1 }
 0x48a   : > { %v9804_v20 = vpop.f32.mrb[9].mxu1  ;;  %v2447_v63 = vadd.f32 %v9216_v59, %v2446_v19 }
 0x48b   : > { %v2449_v21 = vpop.f32.mrb[10].mxu1 }
 0x48c   : > { %v9805_v22 = vpop.f32.mrb[11].mxu1  ;;  %v2970_v6 = vpack.c.bf16 %v2447_v63, %v2447_v63 }
 0x491   : > { %v12050_v24 = vpop.f32.mrb[12].mxu1 }
 0x492   : > { %v9812_v25 = vpop.f32.mrb[13].mxu1  ;;  %v2499_v14 = vadd.f32 %v9217_v9, %v12050_v24 }
 0x493   : > { %v2501_v26 = vpop.f32.mrb[14].mxu1 }
 0x494   : > { %v9813_v27 = vpop.f32.mrb[15].mxu1  ;;  %v2971_v19 = vpack.c.bf16 %v2499_v14, %v2499_v14 }
 0x499   : > { %v2574_v29 = vpop.f32.mrb[16].mxu1 }
 0x49a   : > { %v2575_v30 = vadd.f32 %v9230_v28, %v2574_v29  ;;  %v9820_v31 = vpop.f32.mrb[17].mxu1 }
 0x49b   : > { %v2577_v32 = vpop.f32.mrb[18].mxu1 }
 0x49c   : > { %v2972_v34 = vpack.c.bf16 %v2575_v30, %v2575_v30  ;;  %v9821_v35 = vpop.f32.mrb[19].mxu1 }
 0x49e   : > { %v2981_v37 = vsel %vm2976_vm4, %v2972_v34, 0 }
 0x49f   : > { %9879 = vmatpush3.bf16.xpose.msra.mxu0 %v2981_v37 }
 0x4a0   : > { %9890 = vmatprep.subr.bf16.mxu0 %v11382_v33 }
 0x4a1   : > { %v2626_v40 = vpop.f32.mrb[20].mxu1 }
 0x4a2   : > { %v2627_v41 = vadd.f32 %v9231_v38, %v2626_v40  ;;  %v9828_v42 = vpop.f32.mrb[21].mxu1 }
 0x4a3   : > { %v2629_v43 = vpop.f32.mrb[22].mxu1 }
 0x4a4   : > { %v2973_v45 = vpack.c.bf16 %v2627_v41, %v2627_v41  ;;  %v9829_v46 = vpop.f32.mrb[23].mxu1 }
 0x4a6   : > { %v3027_v48 = vsel %vm2976_vm4, %v2973_v45, 0  ;;  %9881 = vmatmul.mubr.msk.bf16.vlgmr.msra.gmra.mrb[12].mxu0 %vm2976_vm4, %v2968_v44 }
 0x4a7   : > { %9885 = vmatpush3.bf16.xpose.msra.mxu1 %v3027_v48  ;;  %9892 = vmatprep.mubr.msk.bf16.mxu0 %vm11383_vm2, %v11382_v33 }
 0x4a8   : > { %9896 = vmatprep.subr.bf16.mxu1 %v11382_v33 }
 0x4a9   : > { %v2678_v51 = vpop.f32.mrb[24].mxu1 }
 0x4aa   : > { %v2679_v52 = vadd.f32 %v9232_v49, %v2678_v51  ;;  %v9836_v53 = vpop.f32.mrb[25].mxu1 }
 0x4ab   : > { %v2681_v55 = vpop.f32.mrb[26].mxu1 }
 0x4ac   : > { %v2974_v57 = vpack.c.bf16 %v2679_v52, %v2679_v52  ;;  %v9837_v58 = vpop.f32.mrb[27].mxu1 }
 0x4ae   : > { %v3073_v61 = vsel %vm2976_vm4, %v2974_v57, 0  ;;  %9887 = vmatmul.mubr.msk.bf16.vlgmr.msra.gmra.mrb[40].mxu1 %vm2976_vm4, %v2969_v56 }
 0x4af   : > { %9891 = vmatpush3.bf16.xpose.msra.mxu0 %v3073_v61  ;;  %9898 = vmatprep.mubr.msk.bf16.mxu1 %vm11383_vm2, %v11382_v33 }
 0x4b0   : > { %9902 = vmatprep.subr.bf16.mxu0 %v11382_v33 }
 0x4b1   : > { %v2730_v1 = vpop.f32.mrb[28].mxu1 }
 0x4b2   : > { %v2731_v3 = vadd.f32 %v9233_v62, %v2730_v1  ;;  %v9844_v5 = vpop.f32.mrb[29].mxu1 }
 0x4b3   : > { %v2733_v4 = vpop.f32.mrb[30].mxu1 }
 0x4b4   : > { %v2975_v7 = vpack.c.bf16 %v2731_v3, %v2731_v3  ;;  %v9845_v8 = vpop.f32.mrb[31].mxu1 }
 0x4b6   : > { %v3119_v11 = vsel %vm2976_vm4, %v2975_v7, 0  ;;  %9893 = vmatmul.mubr.msk.bf16.vlgmr.msra.gmra.mrb[16].mxu0 %vm2976_vm4, %v2970_v6 }
 0x4b7   : > { %9897 = vmatpush3.bf16.xpose.msra.mxu1 %v3119_v11  ;;  %9903 = vmatpush3.bf16.msra.mxu0 %v3224_v10  ;;  %v9248_v11 = vld [vmem:[%s13275_s16 + $0x2] ss:$0 sm:$0xff] }
 0x4b8   : > { %9908 = vmatprep.subr.bf16.mxu1 %v11382_v33  ;;  %9904 = vmatprep.mubr.msk.bf16.mxu0 %vm11383_vm2, %v11382_v33 }
 0x4b9   : > { %v2858_v15 = vpop.f32.mrb[32].mxu1  ;;  %9914 = vmatprep.subr.bf16.mxu0 %v11382_v33 }
 0x4ba   : > { %v2859_v16 = vadd.f32 %v9247_v13, %v2858_v15  ;;  %v9860_v17 = vpop.f32.mrb[33].mxu1  ;;  %v2911_v13 = vadd.f32 %v9248_v11, %v12048_v12 }
 0x4bb   : > { %v2861_v18 = vpop.f32.mrb[34].mxu1 }
 0x4bc   : > { %v3215_v20 = vpack.c.bf16 %v2859_v16, %v2859_v16  ;;  %v9861_v21 = vpop.f32.mrb[35].mxu1  ;;  %v3216_v16 = vpack.c.bf16 %v2911_v13, %v2911_v13  ;;  %v9249_v18 = vld [vmem:[%s13275_s16 + $0x3] ss:$0 sm:$0xff] }
 0x4be   : > { %v3270_v22 = vsel %vm3222_vm5, %v3215_v20, 0  ;;  %9899 = vmatmul.mubr.msk.bf16.vlgmr.msra.gmra.mrb[44].mxu1 %vm2976_vm4, %v2971_v19  ;;  %v3316_v20 = vsel %vm3222_vm5, %v3216_v16, 0 }
 0x4bf   : > { %9909 = vmatpush3.bf16.msra.mxu1 %v3270_v22  ;;  %9910 = vmatprep.mubr.msk.bf16.mxu1 %vm11383_vm2, %v11382_v33 }
 0x4c0   : > { %9920 = vmatprep.subr.bf16.mxu1 %v11382_v33 }
 0x4c1   : > { %v12087_v24 = vpop.f32.mrb[36].mxu1 }
 0x4c2   : > { %v9876_v25 = vpop.f32.mrb[37].mxu1  ;;  %v2963_v21 = vadd.f32 %v9249_v18, %v12087_v24 }
 0x4c3   : > { %v2965_v26 = vpop.f32.mrb[38].mxu1 }
 0x4c4   : > { %v9877_v27 = vpop.f32.mrb[39].mxu1  ;;  %v3217_v25 = vpack.c.bf16 %v2963_v21, %v2963_v21 }
 0x579   : > { %v3017_v28 = vpop.f32.mrb[12].mxu0 }
 0x57a   : > { %v3161_v29 = vmul.f32 0.35355338, %v3017_v28  ;;  %v9882_v30 = vpop.f32.mrb[13].mxu0  ;;  %v3362_v28 = vsel %vm3222_vm5, %v3217_v25, 0 }
 0x57b   : > { %v3020_v31 = vpop.f32.mrb[14].mxu0 }
 0x57c   : > { %v9883_v32 = vpop.f32.mrb[15].mxu0  ;;  %v3166_v34 = vsel %vm3165_vm6, %v3161_v29, -inf }
 0x57d   : > { %3167 = vmax.xlane.f32.xlu1 %v3166_v34 }
 0x581   : > { %v3063_v35 = vpop.f32.mrb[40].mxu1 }
 0x582   : > { %v3162_v36 = vmul.f32 0.35355338, %v3063_v35  ;;  %v9888_v37 = vpop.f32.mrb[41].mxu1 }
 0x583   : > { %v3066_v38 = vpop.f32.mrb[42].mxu1 }
 0x584   : > { %v9889_v39 = vpop.f32.mrb[43].mxu1  ;;  %v3169_v40 = vsel %vm3165_vm6, %v3162_v36, -inf  ;;  %v2252_v38 = vld [vmem:[%s13276_s4 + $0x4] sm:$0xf] }
 0x585   : > { %3170 = vmax.xlane.f32.xlu1 %v3169_v40  ;;  %v3459_v39 = vsel %vm3411_vm8, %v2252_v38, 0  ;;  %v2253_v40 = vld [vmem:[%s13276_s4 + $0x8] sm:$0xf] }
 0x589   : > { %v3109_v41 = vpop.f32.mrb[16].mxu0 }
 0x58a   : > { %v3163_v42 = vmul.f32 0.35355338, %v3109_v41  ;;  %v9894_v43 = vpop.f32.mrb[17].mxu0 }
 0x58b   : > { %v3112_v44 = vpop.f32.mrb[18].mxu0 }
 0x58c   : > { %v9895_v45 = vpop.f32.mrb[19].mxu0  ;;  %v3172_v46 = vsel %vm3165_vm6, %v3163_v42, -inf  ;;  %v3505_v44 = vsel %vm3411_vm8, %v2253_v40, 0  ;;  %v9275_v40 = vld [vmem:[%s13280_s23] ss:$0 sm:$0xff]  ;;  %s13284_s23 = sld [smem:[#allocation42_spill]] }
 0x58d   : > { %3173 = vmax.xlane.f32.xlu0 %v3172_v46 }
 0x591   : > { %v3155_v47 = vpop.f32.mrb[44].mxu1 }
 0x592   : > { %v3164_v48 = vmul.f32 0.35355338, %v3155_v47  ;;  %v9900_v49 = vpop.f32.mrb[45].mxu1  ;;  %v2254_v47 = vld [vmem:[%s13276_s4 + $0xc] sm:$0xf] }
 0x593   : > { %v3158_v50 = vpop.f32.mrb[46].mxu1 }
 0x594   : > { %v9901_v51 = vpop.f32.mrb[47].mxu1  ;;  %v3175_v52 = vsel %vm3165_vm6, %v3164_v48, -inf }
 0x595   : > { %3176 = vmax.xlane.f32.xlu1 %v3175_v52  ;;  %v3551_v51 = vsel %vm3411_vm8, %v2254_v47, 0 }
 0x60a   : > { %v3168_v53 = vpop.xlane.xlu1 %3167 }
 0x60b   : > { %v3178_v54 = vsub.f32 %v3161_v29, %v3168_v53 }
 0x60d   : > { %v3182_v55 = vmul.f32 1.442695, %v3178_v54 }
 0x60f   : > { %10909 = vpow2.f32 %v3182_v55 }
 0x612   : > { %v3171_v56 = vpop.xlane.xlu1 %3170 }
 0x613   : > { %v3179_v57 = vsub.f32 %v3162_v36, %v3171_v56  ;;  %v2251_v36 = vld [vmem:[%s13276_s4] sm:$0xf]  ;;  %s13289_s4 = sld [smem:[#allocation47_spill]] }
 0x614   : > { %v3413_v37 = vsel %vm3411_vm8, %v2251_v36, 0  ;;  %v10806_v36 = vld [vmem:[%s13279_s10 + $0x8] sm:$0xff]  }
 0x615   : > { %v3184_v58 = vmul.f32 1.442695, %v3179_v57 }
 0x617   : > { %10911 = vpow2.f32 %v3184_v58 }
 0x619   : > { %v10910_v59 = vpop.eup %10909 }
 0x61a   : > { %v3174_v60 = vpop.xlane.xlu0 %3173  ;;  %v3190_v61 = vsel %vm3165_vm6, %v10910_v59, 0.0 }
 0x61b   : > { %v3180_v62 = vsub.f32 %v3163_v42, %v3174_v60  ;;  %3191 = vadd.xlane.f32.xlu0 %v3190_v61 }
 0x61d   : > { %v3186_v63 = vmul.f32 1.442695, %v3180_v62 }
 0x61f   : > { %10913 = vpow2.f32 %v3186_v63 }
 0x621   : > { %v10912_v1 = vpop.eup %10911 }
 0x622   : > { %v3177_v2 = vpop.xlane.xlu1 %3176  ;;  %v3193_v3 = vsel %vm3165_vm6, %v10912_v1, 0.0 }
 0x623   : > { %v3181_v5 = vsub.f32 %v3164_v48, %v3177_v2  ;;  %3194 = vadd.xlane.f32.xlu1 %v3193_v3 }
 0x625   : > { %v3188_v4 = vmul.f32 1.442695, %v3181_v5 }
 0x627   : > { %10915 = vpow2.f32 %v3188_v4 }
 0x629   : > { %v10914_v6 = vpop.eup %10913 }
 0x62a   : > { %v3196_v7 = vsel %vm3165_vm6, %v10914_v6, 0.0 }
 0x62b   : > { %3197 = vadd.xlane.f32.xlu0 %v3196_v7 }
 0x631   : > { %v10916_v8 = vpop.eup %10915 }
 0x632   : > { %v3199_v9 = vsel %vm3165_vm6, %v10916_v8, 0.0 }
 0x633   : > { %3200 = vadd.xlane.f32.xlu1 %v3199_v9 }
 0x6a8   : > { %v3192_v10 = vpop.xlane.xlu0 %3191 }
 0x6a9   : > { %10917 = vrcp.f32 %v3192_v10 }
 0x6b0   : > { %v3195_v14 = vpop.xlane.xlu1 %3194 }
 0x6b1   : > { %10919 = vrcp.f32 %v3195_v14 }
 0x6b3   : > { %v10918_v15 = vpop.eup %10917 }
 0x6b4   : > { %v3206_v17 = vmul.f32 %v10918_v15, %v10910_v59 }
 0x6b6   : > { %v3210_v19 = vpack.c.bf16 %v3206_v17, %v3206_v17 }
 0x6b8   : > { %9905 = vmatmul.mubr.msk.bf16.vlgmr.msra.gmra.mrb[20].mxu0 %vm3218_vm7, %v3210_v19  ;;  %v3198_v22 = vpop.xlane.xlu0 %3197 }
 0x6b9   : > { %9915 = vmatpush3.bf16.msra.mxu0 %v3316_v20  ;;  %10921 = vrcp.f32 %v3198_v22  ;;  %9916 = vmatprep.mubr.msk.bf16.mxu0 %vm11383_vm2, %v11382_v33 }
 0x6ba   : > { %9926 = vmatprep.subr.bf16.mxu0 %v11382_v33 }
 0x6bb   : > { %v10920_v12 = vpop.eup %10919 }
 0x6bc   : > { %v3207_v26 = vmul.f32 %v10920_v12, %v10912_v1 }
 0x6be   : > { %v3211_v27 = vpack.c.bf16 %v3207_v26, %v3207_v26  ;;  %v9274_v26 = vld [vmem:[%s13277_s18] ss:$0 sm:$0xff]  ;;  %s13282_s18 = sld [smem:[#allocation41_spill]] }
 0x6c0   : > { %9911 = vmatmul.mubr.msk.bf16.vlgmr.msra.gmra.mrb[48].mxu1 %vm3218_vm7, %v3211_v27  ;;  %v3201_v24 = vpop.xlane.xlu1 %3200 }
 0x6c1   : > { %9921 = vmatpush3.bf16.msra.mxu1 %v3362_v28  ;;  %10923 = vrcp.f32 %v3201_v24  ;;  %9922 = vmatprep.mubr.msk.bf16.mxu1 %vm11383_vm2, %v11382_v33 }
 0x6c2   : > { %9932 = vmatprep.subr.bf16.mxu1 %v11382_v33 }
 0x6c3   : > { %v10922_v29 = vpop.eup %10921 }
 0x6c4   : > { %v3208_v30 = vmul.f32 %v10922_v29, %v10914_v6  ;;  %v10808_v47 = vld [vmem:[%s13282_s18 + $0x8] sm:$0xff]  }
 0x6c6   : > { %v3212_v31 = vpack.c.bf16 %v3208_v30, %v3208_v30 }
 0x6c8   : > { %9917 = vmatmul.mubr.msk.bf16.vlgmr.msra.gmra.mrb[24].mxu0 %vm3218_vm7, %v3212_v31 }
 0x6c9   : > { %9928 = vmatprep.mubr.msk.bf16.mxu0 %vm11383_vm2, %v11382_v33  ;;  %9927 = vmatpush3.bf16.msra.mxu0 %v3413_v37 }
 0x6ca   : > { %9938 = vmatprep.subr.bf16.mxu0 %v11382_v33 }
 0x6cb   : > { %v10924_v32 = vpop.eup %10923 }
 0x6cc   : > { %v3209_v34 = vmul.f32 %v10924_v32, %v10916_v8 }
 0x6ce   : > { %v3213_v35 = vpack.c.bf16 %v3209_v34, %v3209_v34 }
 0x6d0   : > { %9923 = vmatmul.mubr.msk.bf16.vlgmr.msra.gmra.mrb[52].mxu1 %vm3218_vm7, %v3213_v35  ;;  %v10805_v35 = vld [vmem:[%s13278_s2] sm:$0xff]   ;;  %s13283_s2 = sld [smem:[#allocation40_spill]] }
 0x6d1   : > { %9934 = vmatprep.mubr.msk.bf16.mxu1 %vm11383_vm2, %v11382_v33  ;;  %9933 = vmatpush3.bf16.msra.mxu1 %v3459_v39 }
 0x6d2   : > { %9944 = vmatprep.subr.bf16.mxu1 %v11382_v33 }
 0x78b   : > { %v3260_v41 = vpop.f32.mrb[20].mxu0 }
 0x78c   : > { %v3404_v42 = vpack.c.bf16 %v3260_v41, %v3260_v41  ;;  %v9906_v43 = vpop.f32.mrb[21].mxu0 }
 0x78d   : > { %v3263_v45 = vpop.f32.mrb[22].mxu0 }
 0x78e   : > { %v9907_v46 = vpop.f32.mrb[23].mxu0  ;;  %9929 = vmatmul.mubr.msk.bf16.vlgmr.msra.gmra.mrb[28].mxu0 %vm2976_vm4, %v3404_v42  ;;  %v9276_v42 = vld [vmem:[%s13281_s28] ss:$0 sm:$0xff]  ;;  %s13285_s28 = sld [smem:[#allocation45_spill]] }
 0x78f   : > { %9939 = vmatpush3.bf16.msra.mxu0 %v3505_v44  ;;  %9940 = vmatprep.mubr.msk.bf16.mxu0 %vm11383_vm2, %v11382_v33  ;;  %v10807_v46 = vld [vmem:[%s13282_s18] sm:$0xff]  }
 0x790   : > { %9950 = vmatprep.subr.bf16.mxu0 %v11382_v33 }
 0x793   : > { %v3306_v48 = vpop.f32.mrb[48].mxu1 }
 0x794   : > { %v3405_v49 = vpack.c.bf16 %v3306_v48, %v3306_v48  ;;  %v9912_v50 = vpop.f32.mrb[49].mxu1  ;;  %v10809_v48 = vld [vmem:[%s13282_s18 + $0x10] sm:$0xff]   ;;  %s13286_s3 = smov %s13285_s28 }
 0x795   : > { %v3309_v52 = vpop.f32.mrb[50].mxu1  ;;  %v9277_v50 = vld [vmem:[%s13283_s2] ss:$0 sm:$0xff]  ;;  %s13287_s2 = sld [smem:[#allocation43_spill]] }
 0x796   : > { %v9913_v53 = vpop.f32.mrb[51].mxu1  ;;  %9935 = vmatmul.mubr.msk.bf16.vlgmr.msra.gmra.mrb[56].mxu1 %vm2976_vm4, %v3405_v49  ;;  %v10810_v49 = vld [vmem:[%s13282_s18 + $0x18] sm:$0xff]  }
 0x797   : > { %9945 = vmatpush3.bf16.msra.mxu1 %v3551_v51  ;;  %9946 = vmatprep.mubr.msk.bf16.mxu1 %vm11383_vm2, %v11382_v33 }
 0x798   : > { %9958 = vmatprep.subr.bf16.mxu1 %v11382_v33 }
 0x79b   : > { %v3352_v54 = vpop.f32.mrb[24].mxu0 }
 0x79c   : > { %v3406_v55 = vpack.c.bf16 %v3352_v54, %v3352_v54  ;;  %v9918_v56 = vpop.f32.mrb[25].mxu0 }
 0x79d   : > { %v3355_v57 = vpop.f32.mrb[26].mxu0 }
 0x79e   : > { %v9919_v58 = vpop.f32.mrb[27].mxu0  ;;  %9941 = vmatmul.mubr.msk.bf16.vlgmr.msra.gmra.mrb[32].mxu0 %vm2976_vm4, %v3406_v55 }
 0x79f   : > { %9954 = vmatprep.mubr.msk.bf16.mxu0 %vm11383_vm2, %v11382_v33  ;;  %9951 = vmatpush3.bf16.msra.mxu0 %v10805_v35  ;;  %v10818_v35 = vld [vmem:[%s13289_s4 + $0x8] sm:$0xff]  }
 0x7a0   : > { %9952 = vmatprep.subr.bf16.mxu0 %v11382_v33 }
 0x7a3   : > { %v3398_v59 = vpop.f32.mrb[52].mxu1  ;;  %9953 = vmatpush3.bf16.msra.mxu0 %v10806_v36  ;;  %v10819_v36 = vld [vmem:[%s13286_s3 + $0x30] sm:$0xff]  }
 0x7a4   : > { %v3407_v60 = vpack.c.bf16 %v3398_v59, %v3398_v59  ;;  %v9924_v61 = vpop.f32.mrb[53].mxu1  ;;  %9970 = vmatprep.subr.bf16.mxu0 %v11382_v33 }
 0x7a5   : > { %v3401_v62 = vpop.f32.mrb[54].mxu1 }
 0x7a6   : > { %v9925_v63 = vpop.f32.mrb[55].mxu1  ;;  %9947 = vmatmul.mubr.msk.bf16.vlgmr.msra.gmra.mrb[60].mxu1 %vm2976_vm4, %v3407_v60 }
 0x7a7   : > { %9966 = vmatprep.mubr.msk.bf16.mxu1 %vm11383_vm2, %v11382_v33  ;;  %9959 = vmatpush3.bf16.msra.mxu1 %v10807_v46 }
 0x7a8   : > { %9960 = vmatprep.subr.bf16.mxu1 %v11382_v33 }
 0x7ab   : > { %9961 = vmatpush3.bf16.msra.mxu1 %v10808_v47 }
 0x7ac   : > { %9962 = vmatprep.subr.bf16.mxu1 %v11382_v33 }
 0x7af   : > { %9963 = vmatpush3.bf16.msra.mxu1 %v10809_v48 }
 0x7b0   : > { %9964 = vmatprep.subr.bf16.mxu1 %v11382_v33 }
 0x7b3   : > { %9965 = vmatpush3.bf16.msra.mxu1 %v10810_v49 }
 0x7b4   : > { %9986 = vmatprep.subr.bf16.mxu1 %v11382_v33 }
 0x861   : > { %v3449_v1 = vpop.f32.mrb[28].mxu0 }
 0x862   : > { %v9930_v2 = vpop.f32.mrb[29].mxu0  ;;  %v3593_v6 = vsel %vm2174_vm1, %v3449_v1, 0.0 }
 0x863   : > { %v3452_v3 = vpop.f32.mrb[30].mxu0 }
 0x864   : > { %v9931_v5 = vpop.f32.mrb[31].mxu0  ;;  %v9281_v3 = vld [vmem:[%s13284_s23] ss:$0 sm:$0xff]  ;;  %s13288_s23 = sld [smem:[#allocation44_spill]] }
 0x869   : > { %v3495_v4 = vpop.f32.mrb[56].mxu1 }
 0x86a   : > { %v3594_v7 = vsel %vm2174_vm1, %v3495_v4, 0.0  ;;  %v9936_v8 = vpop.f32.mrb[57].mxu1 }
 0x86b   : > { %v3595_v9 = vadd.f32 %v3594_v7, %v3593_v6  ;;  %v3498_v10 = vpop.f32.mrb[58].mxu1 }
 0x86c   : > { %v9937_v11 = vpop.f32.mrb[59].mxu1 }
 0x871   : > { %v3541_v13 = vpop.f32.mrb[32].mxu0 }
 0x872   : > { %v3596_v14 = vsel %vm2174_vm1, %v3541_v13, 0.0  ;;  %v9942_v15 = vpop.f32.mrb[33].mxu0 }
 0x873   : > { %v3597_v16 = vadd.f32 %v3596_v14, %v3595_v9  ;;  %v3544_v17 = vpop.f32.mrb[34].mxu0 }
 0x874   : > { %v9943_v18 = vpop.f32.mrb[35].mxu0  ;;  %v10811_v17 = vld [vmem:[%s13285_s28] sm:$0xff]   ;;  %s13290_s28 = sld [smem:[#allocation49_spill]] }
 0x875   : > { %v10812_v18 = vld [vmem:[%s13286_s3 + $0x20] sm:$0xff]  }
 0x879   : > { %v3587_v19 = vpop.f32.mrb[60].mxu1 }
 0x87a   : > { %v3598_v20 = vsel %vm2174_vm1, %v3587_v19, 0.0  ;;  %v9948_v21 = vpop.f32.mrb[61].mxu1  ;;  %v10813_v19 = vld [vmem:[%s13286_s3 + $0x8] sm:$0xff]  }
 0x87b   : > { %v3599_v22 = vadd.f32 %v3598_v20, %v3597_v16  ;;  %v3590_v12 = vpop.f32.mrb[62].mxu1  ;;  %v10814_v20 = vld [vmem:[%s13286_s3 + $0x28] sm:$0xff]  }
 0x87c   : > { %v9949_v25 = vpop.f32.mrb[63].mxu1 }
 0x87d   : > { %v3600_v27 = vadd.f32 %v3599_v22, %v11936_v23 }
 0x87f   : > { %v12147_v28 = vadd.f32 %v9274_v26, %v3600_v27  ;;  %v9287_v26 = vld [vmem:[%s13287_s2] ss:$0 sm:$0xff]  ;;  %s13292_s2 = sld [smem:[#allocation48_spill]] }
 0x881   : > { %v3611_v24 = vsel %vm2174_vm1, %v12147_v28, 0.0 }
 0x882   : > { %3612 = vadd.xlane.f32.xlu0 %v3611_v24 }
 0x90f   : > { %v3613_v29 = vpop.xlane.xlu0 %3612 }
 0x910   : > { %v3614_v30 = vmul.f32 0.03125, %v3613_v29 }
 0x912   : > { %v3615_v31 = vsub.f32 %v12147_v28, %v3614_v30  ;;  %v10815_v30 = vld [vmem:[%s13286_s3 + $0x10] sm:$0xff]  }
 0x914   : > { %v3616_v32 = vmul.f32 %v3615_v31, %v3615_v31 }
 0x916   : > { %v3617_v34 = vsel %vm2174_vm1, %v3616_v32, 0.0 }
 0x917   : > { %3618 = vadd.xlane.f32.xlu1 %v3617_v34  ;;  %v10817_v34 = vld [vmem:[%s13286_s3 + $0x18] sm:$0xff]  }
 0x9a4   : > { %v3619_v23 = vpop.xlane.xlu1 %3618 }
 0x9a5   : > { %v3620_v37 = vmul.f32 0.03125, %v3619_v23  ;;  %v10820_v23 = vld [vmem:[%s13289_s4 + $0x20] sm:$0xff]  }
 0x9a7   : > { %v3621_v38 = vadd.f32 1e-06, %v3620_v37  ;;  %v10821_v37 = vld [vmem:[%s13286_s3 + $0x38] sm:$0xff]   ;;  %s13293_s3 = smov %s13292_s2 }
 0x9a9   : > { %10925 = vrsqrt.f32 %v3621_v38  ;;  %v10822_v38 = vld [vmem:[%s13289_s4 + $0x28] sm:$0xff]  }
 0x9b3   : > { %v10926_v39 = vpop.eup %10925 }
 0x9b4   : > { %v3623_v41 = vmul.f32 %v10926_v39, %v3615_v31  ;;  %v10816_v31 = vld [vmem:[%s13289_s4] sm:$0xff]   ;;  %v10823_v39 = vld [vmem:[%s13289_s4 + $0x10] sm:$0xff]  }
 0x9b6   : > { %v3630_v43 = vmul.f32 %v9275_v40, %v3623_v41  ;;  %v10824_v40 = vld [vmem:[%s13290_s28] sm:$0xff]   ;;  %v10825_v41 = vld [vmem:[%s13289_s4 + $0x18] sm:$0xff]  }
 0x9b8   : > { %v3637_v44 = vadd.f32 %v9276_v42, %v3630_v43  ;;  %v10827_v43 = vld [vmem:[%s13289_s4 + $0x30] sm:$0xff]  }
 0x9ba   : > { %v3638_v45 = vpack.c.bf16 %v3637_v44, %v3637_v44 }
 0x9bc   : > { %9955 = vmatmul.mubr.msk.bf16.vlgmr.msra.gmra.mrb[36].mxu0 %vm2304_vm3, %v3638_v45  ;;  %v10829_v45 = vld [vmem:[%s13289_s4 + $0x38] sm:$0xff]  }
 0x9bd   : > { %9974 = vmatprep.mubr.msk.bf16.mxu0 %vm11383_vm2, %v11382_v33  ;;  %9971 = vmatpush3.bf16.msra.mxu0 %v10811_v17 }
 0x9be   : > { %9972 = vmatprep.subr.bf16.mxu0 %v11382_v33 }
 0x9c1   : > { %9973 = vmatpush3.bf16.msra.mxu0 %v10813_v19 }
 0x9c2   : > { %9978 = vmatprep.subr.bf16.mxu0 %v11382_v33 }
 0xa8f   : > { %v3699_v51 = vpop.f32.mrb[36].mxu0 }
 0xa90   : > { %v3700_v52 = vadd.f32 %v9277_v50, %v3699_v51  ;;  %v9956_v53 = vpop.f32.mrb[37].mxu0 }
 0xa91   : > { %v3702_v54 = vpop.f32.mrb[38].mxu0 }
 0xa92   : > { %v3706_v55 = vmul.f32 0.044715, %v3700_v52  ;;  %v9957_v56 = vpop.f32.mrb[39].mxu0  ;;  %v3705_v62 = vmul.f32 0.5, %v3700_v52 }
 0xa94   : > { %v3707_v57 = vmul.f32 %v3706_v55, %v3700_v52 }
 0xa96   : > { %v3708_v58 = vmul.f32 %v3707_v57, %v3700_v52 }
 0xa98   : > { %v3709_v59 = vadd.f32 %v3708_v58, %v3700_v52 }
 0xa9a   : > { %v3710_v60 = vmul.f32 0.7978846, %v3709_v59  ;;  %v9305_v59 = vld [vmem:[%s13292_s2] ss:$0 sm:$0xff]  ;;  %s13296_s2 = sld [smem:[#allocation50_spill]] }
 0xa9c   : > { %10927 = vtanh.f32 %v3710_v60 }
 0xaa0   : > { %s13297_s5 = smov %s13296_s2 }
 0xaa6   : > { %v10928_v61 = vpop.eup %10927 }
 0xaa7   : > { %v3712_v63 = vadd.f32 1.0, %v10928_v61 }
 0xaa9   : > { %v3713_v1 = vmul.f32 %v3712_v63, %v3705_v62 }
 0xaab   : > { %v3714_v2 = vpack.c.bf16 %v3713_v1, %v3713_v1 }
 0xaad   : > { %9967 = vmatmul.mubr.msk.bf16.vlgmr.msra.gmra.mrb[64].mxu1 %vm2126_vm0, %v3714_v2 }
 0xaae   : > { %9990 = vmatprep.mubr.msk.bf16.mxu1 %vm11383_vm2, %v11382_v33  ;;  %9987 = vmatpush3.bf16.msra.mxu1 %v10812_v18 }
 0xaaf   : > { %9988 = vmatprep.subr.bf16.mxu1 %v11382_v33 }
 0xab2   : > { %9989 = vmatpush3.bf16.msra.mxu1 %v10814_v20 }
 0xab3   : > { %10002 = vmatprep.subr.bf16.mxu1 %v11382_v33 }
 0xb80   : > { %v3791_v5 = vpop.f32.mrb[64].mxu1 }
 0xb81   : > { %v3792_v4 = vadd.f32 %v9281_v3, %v3791_v5  ;;  %v9968_v6 = vpop.f32.mrb[65].mxu1 }
 0xb82   : > { %v3794_v7 = vpop.f32.mrb[66].mxu1 }
 0xb83   : > { %v12176_v8 = vadd.f32 %v3792_v4, %v12147_v28  ;;  %v9969_v9 = vpop.f32.mrb[67].mxu1  ;;  %v9288_v28 = vld [vmem:[%s13288_s23] ss:$0 sm:$0xff]  ;;  %s13291_s23 = smov %s13290_s28  ;;  %s13294_s28 = sld [smem:[#allocation46_spill]] }
 0xb84   : > { %v10826_v42 = vld [vmem:[%s13291_s23 + $0x8] sm:$0xff]   ;;  %v10828_v44 = vld [vmem:[%s13291_s23 + $0x20] sm:$0xff]   ;;  %v10831_v47 = vld [vmem:[%s13291_s23 + $0x10] sm:$0xff]  }
 0xb85   : > { %v3800_v10 = vsel %vm2174_vm1, %v12176_v8, 0.0  ;;  %v10830_v46 = vld [vmem:[%s13291_s23 + $0x28] sm:$0xff]   ;;  %v10832_v48 = vld [vmem:[%s13291_s23 + $0x18] sm:$0xff]   ;;  %v10833_v49 = vld [vmem:[%s13291_s23 + $0x30] sm:$0xff]  }
 0xb86   : > { %3801 = vadd.xlane.f32.xlu0 %v3800_v10  ;;  %v10834_v50 = vld [vmem:[%s13291_s23 + $0x38] sm:$0xff]   ;;  %v9307_v10 = vld [vmem:[%s13293_s3 + $0x2] ss:$0 sm:$0xff] }
 0xb89   : > { %s13295_s4 = smov %s13294_s28  ;;  %v9289_v7 = vld [vmem:[%s13294_s28] ss:$0 sm:$0xff]  ;;  %s13298_s28 = sld [smem:[#allocation51_spill]] }
 0xc13   : > { %v3802_v11 = vpop.xlane.xlu0 %3801 }
 0xc14   : > { %v3803_v13 = vmul.f32 0.03125, %v3802_v11 }
 0xc16   : > { %v3804_v14 = vsub.f32 %v12176_v8, %v3803_v13 }
 0xc18   : > { %v3805_v15 = vmul.f32 %v3804_v14, %v3804_v14 }
 0xc1a   : > { %v3806_v16 = vsel %vm2174_vm1, %v3805_v15, 0.0 }
 0xc1b   : > { %3807 = vadd.xlane.f32.xlu1 %v3806_v16 }
 0xca8   : > { %v3808_v21 = vpop.xlane.xlu1 %3807 }
 0xca9   : > { %v3809_v22 = vmul.f32 0.03125, %v3808_v21 }
 0xcab   : > { %v3810_v12 = vadd.f32 1e-06, %v3809_v22 }
 0xcad   : > { %10929 = vrsqrt.f32 %v3810_v12 }
 0xcb7   : > { %v10930_v25 = vpop.eup %10929 }
 0xcb8   : > { %v3812_v27 = vmul.f32 %v10930_v25, %v3804_v14  ;;  %v9291_v25 = vld [vmem:[%s13295_s4 + $0x2] ss:$0 sm:$0xff] }
 0xcba   : > { %v3819_v24 = vmul.f32 %v9287_v26, %v3812_v27  ;;  %v9306_v27 = vld [vmem:[%s13293_s3 + $0x1] ss:$0 sm:$0xff] }
 0xcbc   : > { %v3826_v29 = vadd.f32 %v9288_v28, %v3819_v24  ;;  %v9321_v28 = vld [vmem:[%s13296_s2] ss:$0 sm:$0xff]  ;;  %s13300_s2 = sld [smem:[#allocation52_spill]] }
 0xcbe   : > { %v12194_v32 = vpack.c.bf16 %v3826_v29, %v3826_v29 }
 0xcc0   : > { %9975 = vmatmul.mubr.msk.bf16.vlgmr.msra.gmra.mrb[40].mxu0 %vm2304_vm3, %v12194_v32  ;;  %9991 = vmatmul.mubr.msk.bf16.vlgmr.msra.gmra.mrb[68].mxu1 %vm2304_vm3, %v12194_v32 }
 0xcc1   : > { %9979 = vmatpush3.bf16.msra.mxu0 %v10815_v30  ;;  %10003 = vmatpush3.bf16.msra.mxu1 %v10816_v31 }
 0xcc2   : > { %9980 = vmatprep.subr.bf16.mxu0 %v11382_v33  ;;  %10004 = vmatprep.subr.bf16.mxu1 %v11382_v33 }
 0xcc3   : > { %9982 = vmatprep.mubr.msk.bf16.mxu0 %vm11383_vm2, %v11382_v33  ;;  %10006 = vmatprep.mubr.msk.bf16.mxu1 %vm11383_vm2, %v11382_v33 }
 0xcc5   : > { %9981 = vmatpush3.bf16.msra.mxu0 %v10817_v34  ;;  %10005 = vmatpush3.bf16.msra.mxu1 %v10818_v35 }
 0xcc6   : > { %9994 = vmatprep.subr.bf16.mxu0 %v11382_v33  ;;  %10018 = vmatprep.subr.bf16.mxu1 %v11382_v33 }
 0xcc8   : > { %9983 = vmatmul.mubr.msk.bf16.vlgmr.msra.gmra.mrb[44].mxu0 %vm2304_vm3, %v12194_v32  ;;  %10007 = vmatmul.mubr.msk.bf16.vlgmr.msra.gmra.mrb[72].mxu1 %vm2304_vm3, %v12194_v32 }
 0xcc9   : > { %9995 = vmatpush3.bf16.msra.mxu0 %v10819_v36  ;;  %10019 = vmatpush3.bf16.msra.mxu1 %v10820_v23 }
 0xcca   : > { %9996 = vmatprep.subr.bf16.mxu0 %v11382_v33  ;;  %10020 = vmatprep.subr.bf16.mxu1 %v11382_v33 }
 0xccb   : > { %9998 = vmatprep.mubr.msk.bf16.mxu0 %vm11383_vm2, %v11382_v33  ;;  %10022 = vmatprep.mubr.msk.bf16.mxu1 %vm11383_vm2, %v11382_v33 }
 0xccd   : > { %9997 = vmatpush3.bf16.msra.mxu0 %v10821_v37  ;;  %10021 = vmatpush3.bf16.msra.mxu1 %v10822_v38 }
 0xcce   : > { %10010 = vmatprep.subr.bf16.mxu0 %v11382_v33  ;;  %10034 = vmatprep.subr.bf16.mxu1 %v11382_v33 }
 0xcd0   : > { %9999 = vmatmul.mubr.msk.bf16.vlgmr.msra.gmra.mrb[48].mxu0 %vm2304_vm3, %v12194_v32  ;;  %10023 = vmatmul.mubr.msk.bf16.vlgmr.msra.gmra.mrb[76].mxu1 %vm2304_vm3, %v12194_v32 }
 0xcd1   : > { %10011 = vmatpush3.bf16.msra.mxu0 %v10823_v39  ;;  %10035 = vmatpush3.bf16.msra.mxu1 %v10824_v40 }
 0xcd2   : > { %10012 = vmatprep.subr.bf16.mxu0 %v11382_v33  ;;  %10036 = vmatprep.subr.bf16.mxu1 %v11382_v33 }
 0xcd3   : > { %10014 = vmatprep.mubr.msk.bf16.mxu0 %vm11383_vm2, %v11382_v33  ;;  %10038 = vmatprep.mubr.msk.bf16.mxu1 %vm11383_vm2, %v11382_v33 }
 0xcd5   : > { %10013 = vmatpush3.bf16.msra.mxu0 %v10825_v41  ;;  %10037 = vmatpush3.bf16.msra.mxu1 %v10826_v42  ;;  %v9290_v42 = vld [vmem:[%s13295_s4 + $0x1] ss:$0 sm:$0xff] }
 0xcd6   : > { %10026 = vmatprep.subr.bf16.mxu0 %v11382_v33  ;;  %10050 = vmatprep.subr.bf16.mxu1 %v11382_v33 }
 0xcd8   : > { %10015 = vmatmul.mubr.msk.bf16.vlgmr.msra.gmra.mrb[52].mxu0 %vm2304_vm3, %v12194_v32  ;;  %10039 = vmatmul.mubr.msk.bf16.vlgmr.msra.gmra.mrb[80].mxu1 %vm2304_vm3, %v12194_v32 }
 0xcd9   : > { %10027 = vmatpush3.bf16.msra.mxu0 %v10827_v43  ;;  %10051 = vmatpush3.bf16.msra.mxu1 %v10828_v44 }
 0xcda   : > { %10028 = vmatprep.subr.bf16.mxu0 %v11382_v33  ;;  %10052 = vmatprep.subr.bf16.mxu1 %v11382_v33 }
 0xcdb   : > { %10030 = vmatprep.mubr.msk.bf16.mxu0 %vm11383_vm2, %v11382_v33  ;;  %10054 = vmatprep.mubr.msk.bf16.mxu1 %vm11383_vm2, %v11382_v33 }
 0xcdd   : > { %10029 = vmatpush3.bf16.msra.mxu0 %v10829_v45  ;;  %10053 = vmatpush3.bf16.msra.mxu1 %v10830_v46  ;;  %v9308_v45 = vld [vmem:[%s13293_s3 + $0x3] ss:$0 sm:$0xff]  ;;  %s13299_s3 = smov %s13298_s28 }
 0xcde   : > { %10042 = vmatprep.subr.bf16.mxu0 %v11382_v33  ;;  %10066 = vmatprep.subr.bf16.mxu1 %v11382_v33 }
 0xce0   : > { %10031 = vmatmul.mubr.msk.bf16.vlgmr.msra.gmra.mrb[56].mxu0 %vm2304_vm3, %v12194_v32  ;;  %10055 = vmatmul.mubr.msk.bf16.vlgmr.msra.gmra.mrb[84].mxu1 %vm2304_vm3, %v12194_v32 }
 0xce1   : > { %10043 = vmatpush3.bf16.msra.mxu0 %v10831_v47  ;;  %10046 = vmatprep.mubr.msk.bf16.mxu0 %vm11383_vm2, %v11382_v33 }
 0xce2   : > { %10044 = vmatprep.subr.bf16.mxu0 %v11382_v33  ;;  %10068 = vmatprep.mubr.msk.bf16.mxu1 %vm11383_vm2, %v11382_v33 }
 0xce5   : > { %10045 = vmatpush3.bf16.msra.mxu0 %v10832_v48 }
 0xce6   : > { %10058 = vmatprep.subr.bf16.mxu0 %v11382_v33 }
 0xce8   : > { %10047 = vmatmul.mubr.msk.bf16.vlgmr.msra.gmra.mrb[60].mxu0 %vm2304_vm3, %v12194_v32 }
 0xce9   : > { %10059 = vmatpush3.bf16.msra.mxu0 %v10833_v49  ;;  %10062 = vmatprep.mubr.msk.bf16.mxu0 %vm11383_vm2, %v11382_v33 }
 0xcea   : > { %10060 = vmatprep.subr.bf16.mxu0 %v11382_v33 }
 0xced   : > { %10061 = vmatpush3.bf16.msra.mxu0 %v10834_v50 }
 0xcee   : > { %10072 = vmatprep.subr.bf16.mxu0 %v11382_v33 }
 0xcf0   : > { %10063 = vmatmul.mubr.msk.bf16.vlgmr.msra.gmra.mrb[64].mxu0 %vm2304_vm3, %v12194_v32 }
 0xcf1   : > { %10074 = vmatprep.mubr.msk.bf16.mxu0 %vm11383_vm2, %v11382_v33 }
 0xd93   : > { %v3965_v51 = vpop.f32.mrb[40].mxu0  ;;  %v4069_v52 = vpop.f32.mrb[68].mxu1 }
 0xd94   : > { %v9976_v53 = vpop.f32.mrb[41].mxu0  ;;  %v9992_v54 = vpop.f32.mrb[69].mxu1  ;;  %v3966_v11 = vadd.f32 %v9289_v7, %v3965_v51  ;;  %v4070_v24 = vadd.f32 %v9291_v25, %v4069_v52 }
 0xd95   : > { %v3968_v55 = vpop.f32.mrb[42].mxu0  ;;  %v4072_v56 = vpop.f32.mrb[70].mxu1 }
 0xd96   : > { %v9977_v57 = vpop.f32.mrb[43].mxu0  ;;  %v9993_v58 = vpop.f32.mrb[71].mxu1  ;;  %v4591_v20 = vpack.c.bf16 %v3966_v11, %v3966_v11  ;;  %v4593_v37 = vpack.c.bf16 %v4070_v24, %v4070_v24 }
 0xd97   : > { %v9292_v58 = vld [vmem:[%s13295_s4 + $0x3] ss:$0 sm:$0xff]  ;;  %s13303_s4 = sld [smem:[#allocation53_spill]] }
 0xd9b   : > { %v4017_v60 = vpop.f32.mrb[44].mxu0  ;;  %v4197_v61 = vpop.f32.mrb[72].mxu1 }
 0xd9c   : > { %v4198_v62 = vadd.f32 %v9305_v59, %v4197_v61  ;;  %v9984_v63 = vpop.f32.mrb[45].mxu0  ;;  %v10008_v1 = vpop.f32.mrb[73].mxu1  ;;  %v4018_v46 = vadd.f32 %v9290_v42, %v4017_v60  ;;  %v9322_v60 = vld [vmem:[%s13297_s5 + $0x1] ss:$0 sm:$0xff] }
 0xd9d   : > { %v4020_v2 = vpop.f32.mrb[46].mxu0  ;;  %v4200_v3 = vpop.f32.mrb[74].mxu1 }
 0xd9e   : > { %v4595_v5 = vpack.c.bf16 %v4198_v62, %v4198_v62  ;;  %v9985_v4 = vpop.f32.mrb[47].mxu0  ;;  %v10009_v6 = vpop.f32.mrb[75].mxu1  ;;  %v4592_v54 = vpack.c.bf16 %v4018_v46, %v4018_v46 }
 0xda0   : > { %v4603_v9 = vsel %vm2976_vm4, %v4595_v5, 0 }
 0xda1   : > { %10067 = vmatpush3.bf16.xpose.msra.mxu1 %v4603_v9 }
 0xda2   : > { %10078 = vmatprep.subr.bf16.mxu1 %v11382_v33 }
 0xda3   : > { %v4121_v13 = vpop.f32.mrb[48].mxu0  ;;  %v4301_v14 = vpop.f32.mrb[76].mxu1 }
 0xda4   : > { %v4302_v15 = vadd.f32 %v9307_v10, %v4301_v14  ;;  %v10000_v16 = vpop.f32.mrb[49].mxu0  ;;  %v10024_v17 = vpop.f32.mrb[77].mxu1  ;;  %v4122_v61 = vadd.f32 %v9292_v58, %v4121_v13 }
 0xda5   : > { %v4124_v18 = vpop.f32.mrb[50].mxu0  ;;  %v4304_v19 = vpop.f32.mrb[78].mxu1 }
 0xda6   : > { %v4597_v21 = vpack.c.bf16 %v4302_v15, %v4302_v15  ;;  %v10001_v22 = vpop.f32.mrb[51].mxu0  ;;  %v10025_v12 = vpop.f32.mrb[79].mxu1  ;;  %v4594_v3 = vpack.c.bf16 %v4122_v61, %v4122_v61 }
 0xda8   : > { %v4695_v26 = vsel %vm2976_vm4, %v4597_v21, 0  ;;  %10069 = vmatmul.mubr.msk.bf16.vlgmr.msra.gmra.mrb[88].mxu1 %vm2976_vm4, %v4591_v20 }
 0xda9   : > { %10079 = vmatpush3.bf16.xpose.msra.mxu1 %v4695_v26  ;;  %10080 = vmatprep.mubr.msk.bf16.mxu1 %vm11383_vm2, %v11382_v33 }
 0xdaa   : > { %10090 = vmatprep.subr.bf16.mxu1 %v11382_v33 }
 0xdab   : > { %v4249_v29 = vpop.f32.mrb[52].mxu0  ;;  %v4429_v30 = vpop.f32.mrb[80].mxu1 }
 0xdac   : > { %v4250_v31 = vadd.f32 %v9306_v27, %v4249_v29  ;;  %v4430_v32 = vadd.f32 %v9321_v28, %v4429_v30  ;;  %v10016_v34 = vpop.f32.mrb[53].mxu0  ;;  %v10040_v35 = vpop.f32.mrb[81].mxu1 }
 0xdad   : > { %v4252_v36 = vpop.f32.mrb[54].mxu0  ;;  %v4432_v23 = vpop.f32.mrb[82].mxu1 }
 0xdae   : > { %v4596_v38 = vpack.c.bf16 %v4250_v31, %v4250_v31  ;;  %v4835_v39 = vpack.c.bf16 %v4430_v32, %v4430_v32  ;;  %v10017_v40 = vpop.f32.mrb[55].mxu0  ;;  %v10041_v41 = vpop.f32.mrb[83].mxu1 }
 0xdb0   : > { %v4649_v43 = vsel %vm2976_vm4, %v4596_v38, 0  ;;  %v4843_v44 = vsel %vm3222_vm5, %v4835_v39, 0  ;;  %10081 = vmatmul.mubr.msk.bf16.vlgmr.msra.gmra.mrb[92].mxu1 %vm2976_vm4, %v4593_v37 }
 0xdb1   : > { %10073 = vmatpush3.bf16.xpose.msra.mxu0 %v4649_v43  ;;  %10091 = vmatpush3.bf16.msra.mxu1 %v4843_v44 }
 0xdb2   : > { %10084 = vmatprep.subr.bf16.mxu0 %v11382_v33  ;;  %10092 = vmatprep.mubr.msk.bf16.mxu1 %vm11383_vm2, %v11382_v33 }
 0xdb3   : > { %v4353_v47 = vpop.f32.mrb[56].mxu0  ;;  %v12303_v48 = vpop.f32.mrb[84].mxu1  ;;  %10102 = vmatprep.subr.bf16.mxu1 %v11382_v33 }
 0xdb4   : > { %v4354_v49 = vadd.f32 %v9308_v45, %v4353_v47  ;;  %v10032_v50 = vpop.f32.mrb[57].mxu0  ;;  %v10056_v51 = vpop.f32.mrb[85].mxu1 }
 0xdb5   : > { %v4356_v52 = vpop.f32.mrb[58].mxu0  ;;  %v4536_v53 = vpop.f32.mrb[86].mxu1 }
 0xdb6   : > { %v4598_v55 = vpack.c.bf16 %v4354_v49, %v4354_v49  ;;  %v10033_v56 = vpop.f32.mrb[59].mxu0  ;;  %v10057_v57 = vpop.f32.mrb[87].mxu1 }
 0xdb8   : > { %v4741_v59 = vsel %vm2976_vm4, %v4598_v55, 0  ;;  %10075 = vmatmul.mubr.msk.bf16.vlgmr.msra.gmra.mrb[68].mxu0 %vm2976_vm4, %v4592_v54 }
 0xdb9   : > { %10085 = vmatpush3.bf16.xpose.msra.mxu0 %v4741_v59  ;;  %10086 = vmatprep.mubr.msk.bf16.mxu0 %vm11383_vm2, %v11382_v33  ;;  %v9323_v59 = vld [vmem:[%s13297_s5 + $0x2] ss:$0 sm:$0xff] }
 0xdba   : > { %10096 = vmatprep.subr.bf16.mxu0 %v11382_v33 }
 0xdbb   : > { %v4481_v62 = vpop.f32.mrb[60].mxu0 }
 0xdbc   : > { %v4482_v63 = vadd.f32 %v9322_v60, %v4481_v62  ;;  %v10048_v1 = vpop.f32.mrb[61].mxu0  ;;  %v4534_v60 = vadd.f32 %v9323_v59, %v12303_v48 }
 0xdbd   : > { %v4484_v2 = vpop.f32.mrb[62].mxu0 }
 0xdbe   : > { %v4836_v5 = vpack.c.bf16 %v4482_v63, %v4482_v63  ;;  %v10049_v4 = vpop.f32.mrb[63].mxu0  ;;  %v4837_v63 = vpack.c.bf16 %v4534_v60, %v4534_v60 }
 0xdc0   : > { %v4889_v6 = vsel %vm3222_vm5, %v4836_v5, 0  ;;  %10087 = vmatmul.mubr.msk.bf16.vlgmr.msra.gmra.mrb[72].mxu0 %vm2976_vm4, %v4594_v3  ;;  %v4935_v3 = vsel %vm3222_vm5, %v4837_v63, 0 }
 0xdc1   : > { %10097 = vmatpush3.bf16.msra.mxu0 %v4889_v6  ;;  %10098 = vmatprep.mubr.msk.bf16.mxu0 %vm11383_vm2, %v11382_v33  ;;  %v9324_v6 = vld [vmem:[%s13297_s5 + $0x3] ss:$0 sm:$0xff]  ;;  %s13304_s5 = sld [smem:[#allocation54_spill]] }
 0xdc2   : > { %10108 = vmatprep.subr.bf16.mxu0 %v11382_v33 }
 0xdc3   : > { %v12318_v7 = vpop.f32.mrb[64].mxu0 }
 0xdc4   : > { %v10064_v9 = vpop.f32.mrb[65].mxu0 }
 0xdc5   : > { %v4588_v10 = vpop.f32.mrb[66].mxu0 }
 0xdc6   : > { %v10065_v11 = vpop.f32.mrb[67].mxu0  ;;  %v4586_v10 = vadd.f32 %v9324_v6, %v12318_v7 }
 0xe7b   : > { %v4639_v13 = vpop.f32.mrb[88].mxu1 }
 0xe7c   : > { %v4783_v14 = vmul.f32 0.35355338, %v4639_v13  ;;  %v10070_v15 = vpop.f32.mrb[89].mxu1 }
 0xe7d   : > { %v4642_v16 = vpop.f32.mrb[90].mxu1 }
 0xe7e   : > { %v10071_v17 = vpop.f32.mrb[91].mxu1  ;;  %v4787_v18 = vsel %vm3165_vm6, %v4783_v14, -inf }
 0xe7f   : > { %4788 = vmax.xlane.f32.xlu0 %v4787_v18 }
 0xe83   : > { %v4731_v19 = vpop.f32.mrb[92].mxu1 }
 0xe84   : > { %v4785_v20 = vmul.f32 0.35355338, %v4731_v19  ;;  %v10082_v21 = vpop.f32.mrb[93].mxu1 }
 0xe85   : > { %v4734_v22 = vpop.f32.mrb[94].mxu1 }
 0xe86   : > { %v10083_v12 = vpop.f32.mrb[95].mxu1  ;;  %v4793_v25 = vsel %vm3165_vm6, %v4785_v20, -inf  ;;  %v3876_v22 = vld [vmem:[%s13299_s3 + $0x4] sm:$0xf] }
 0xe87   : > { %4794 = vmax.xlane.f32.xlu0 %v4793_v25  ;;  %v5077_v12 = vsel %vm3411_vm8, %v3876_v22, 0  ;;  %v3877_v25 = vld [vmem:[%s13299_s3 + $0x8] sm:$0xf] }
 0xe8b   : > { %v4685_v26 = vpop.f32.mrb[68].mxu0 }
 0xe8c   : > { %v4784_v27 = vmul.f32 0.35355338, %v4685_v26  ;;  %v10076_v28 = vpop.f32.mrb[69].mxu0 }
 0xe8d   : > { %v4688_v24 = vpop.f32.mrb[70].mxu0 }
 0xe8e   : > { %v10077_v29 = vpop.f32.mrb[71].mxu0  ;;  %v4790_v30 = vsel %vm3165_vm6, %v4784_v27, -inf  ;;  %v5123_v24 = vsel %vm3411_vm8, %v3877_v25, 0  ;;  %v9350_v25 = vld [vmem:[%s13303_s4] ss:$0 sm:$0xff]  ;;  %s13309_s4 = sld [smem:[#allocation61_spill]] }
 0xe8f   : > { %4791 = vmax.xlane.f32.xlu1 %v4790_v30 }
 0xe93   : > { %v4777_v31 = vpop.f32.mrb[72].mxu0 }
 0xe94   : > { %v4786_v32 = vmul.f32 0.35355338, %v4777_v31  ;;  %v10088_v34 = vpop.f32.mrb[73].mxu0 }
 0xe95   : > { %v4780_v35 = vpop.f32.mrb[74].mxu0 }
 0xe96   : > { %v10089_v36 = vpop.f32.mrb[75].mxu0  ;;  %v4796_v23 = vsel %vm3165_vm6, %v4786_v32, -inf }
 0xe97   : > { %4797 = vmax.xlane.f32.xlu1 %v4796_v23  ;;  %v3878_v23 = vld [vmem:[%s13299_s3 + $0xc] sm:$0xf] }
 0xf0c   : > { %v4789_v37 = vpop.xlane.xlu0 %4788 }
 0xf0d   : > { %v4799_v38 = vsub.f32 %v4783_v14, %v4789_v37  ;;  %v4838_v14 = vpack.c.bf16 %v4586_v10, %v4586_v10  ;;  %v9349_v10 = vld [vmem:[%s13300_s2] ss:$0 sm:$0xff]  ;;  %s13305_s2 = sld [smem:[#allocation57_spill]] }
 0xf0f   : > { %v4803_v39 = vmul.f32 1.442695, %v4799_v38  ;;  %v4981_v17 = vsel %vm3222_vm5, %v4838_v14, 0 }
 0xf11   : > { %10931 = vpow2.f32 %v4803_v39 }
 0xf13   : > { %s13306_s6 = smov %s13305_s2 }
 0xf14   : > { %v4795_v40 = vpop.xlane.xlu0 %4794 }
 0xf15   : > { %v4801_v41 = vsub.f32 %v4785_v20, %v4795_v40  ;;  %v3875_v20 = vld [vmem:[%s13298_s28] sm:$0xf]  ;;  %v5169_v40 = vsel %vm3411_vm8, %v3878_v23, 0  ;;  %s13301_s28 = sld [smem:[#allocation55_spill]] }
 0xf16   : > { %v5031_v21 = vsel %vm3411_vm8, %v3875_v20, 0 }
 0xf17   : > { %v4807_v42 = vmul.f32 1.442695, %v4801_v41 }
 0xf19   : > { %10933 = vpow2.f32 %v4807_v42 }
 0xf1b   : > { %v10932_v43 = vpop.eup %10931  ;;  %s13302_s3 = smov %s13301_s28 }
 0xf1c   : > { %v4792_v44 = vpop.xlane.xlu1 %4791  ;;  %v4811_v45 = vsel %vm3165_vm6, %v10932_v43, 0.0  ;;  %v10836_v20 = vld [vmem:[%s13302_s3 + $0x8] sm:$0xff]  }
 0xf1d   : > { %v4800_v46 = vsub.f32 %v4784_v27, %v4792_v44  ;;  %4812 = vadd.xlane.f32.xlu0 %v4811_v45 }
 0xf1f   : > { %v4805_v47 = vmul.f32 1.442695, %v4800_v46 }
 0xf21   : > { %10935 = vpow2.f32 %v4805_v47 }
 0xf23   : > { %v10934_v49 = vpop.eup %10933 }
 0xf24   : > { %v4798_v50 = vpop.xlane.xlu1 %4797  ;;  %v4817_v51 = vsel %vm3165_vm6, %v10934_v49, 0.0 }
 0xf25   : > { %v4802_v52 = vsub.f32 %v4786_v32, %v4798_v50  ;;  %4818 = vadd.xlane.f32.xlu0 %v4817_v51 }
 0xf27   : > { %v4809_v53 = vmul.f32 1.442695, %v4802_v52 }
 0xf29   : > { %10937 = vpow2.f32 %v4809_v53 }
 0xf2b   : > { %v10936_v54 = vpop.eup %10935 }
 0xf2c   : > { %v4814_v55 = vsel %vm3165_vm6, %v10936_v54, 0.0 }
 0xf2d   : > { %4815 = vadd.xlane.f32.xlu1 %v4814_v55 }
 0xf33   : > { %v10938_v56 = vpop.eup %10937 }
 0xf34   : > { %v4820_v57 = vsel %vm3165_vm6, %v10938_v56, 0.0 }
 0xf35   : > { %4821 = vadd.xlane.f32.xlu1 %v4820_v57 }
 0xfaa   : > { %v4813_v58 = vpop.xlane.xlu0 %4812 }
 0xfab   : > { %10939 = vrcp.f32 %v4813_v58 }
 0xfb2   : > { %v4819_v61 = vpop.xlane.xlu0 %4818 }
 0xfb3   : > { %10941 = vrcp.f32 %v4819_v61 }
 0xfb5   : > { %v10940_v62 = vpop.eup %10939 }
 0xfb6   : > { %v4827_v1 = vmul.f32 %v10940_v62, %v10932_v43 }
 0xfb8   : > { %v4831_v2 = vpack.c.bf16 %v4827_v1, %v4827_v1 }
 0xfba   : > { %v4816_v5 = vpop.xlane.xlu1 %4815  ;;  %10093 = vmatmul.mubr.msk.bf16.vlgmr.msra.gmra.mrb[96].mxu1 %vm3218_vm7, %v4831_v2 }
 0xfbb   : > { %10943 = vrcp.f32 %v4816_v5  ;;  %10103 = vmatpush3.bf16.msra.mxu1 %v4935_v3  ;;  %10104 = vmatprep.mubr.msk.bf16.mxu1 %vm11383_vm2, %v11382_v33 }
 0xfbc   : > { %10114 = vmatprep.subr.bf16.mxu1 %v11382_v33 }
 0xfbd   : > { %v10942_v48 = vpop.eup %10941 }
 0xfbe   : > { %v4829_v4 = vmul.f32 %v10942_v48, %v10934_v49 }
 0xfc0   : > { %v4833_v9 = vpack.c.bf16 %v4829_v4, %v4829_v4 }
 0xfc2   : > { %v4822_v11 = vpop.xlane.xlu1 %4821  ;;  %10105 = vmatmul.mubr.msk.bf16.vlgmr.msra.gmra.mrb[100].mxu1 %vm3218_vm7, %v4833_v9 }
 0xfc3   : > { %10945 = vrcp.f32 %v4822_v11  ;;  %10116 = vmatprep.mubr.msk.bf16.mxu1 %vm11383_vm2, %v11382_v33  ;;  %10115 = vmatpush3.bf16.msra.mxu1 %v5031_v21 }
 0xfc4   : > { %10126 = vmatprep.subr.bf16.mxu1 %v11382_v33 }
 0xfc5   : > { %v10944_v13 = vpop.eup %10943 }
 0xfc6   : > { %v4828_v15 = vmul.f32 %v10944_v13, %v10936_v54 }
 0xfc8   : > { %v4832_v16 = vpack.c.bf16 %v4828_v15, %v4828_v15 }
 0xfca   : > { %10099 = vmatmul.mubr.msk.bf16.vlgmr.msra.gmra.mrb[76].mxu0 %vm3218_vm7, %v4832_v16 }
 0xfcb   : > { %10109 = vmatpush3.bf16.msra.mxu0 %v4981_v17  ;;  %10110 = vmatprep.mubr.msk.bf16.mxu0 %vm11383_vm2, %v11382_v33 }
 0xfcc   : > { %10120 = vmatprep.subr.bf16.mxu0 %v11382_v33 }
 0xfcd   : > { %v10946_v7 = vpop.eup %10945 }
 0xfce   : > { %v4830_v18 = vmul.f32 %v10946_v7, %v10938_v56 }
 0xfd0   : > { %v4834_v19 = vpack.c.bf16 %v4830_v18, %v4830_v18 }
 0xfd2   : > { %10111 = vmatmul.mubr.msk.bf16.vlgmr.msra.gmra.mrb[80].mxu0 %vm3218_vm7, %v4834_v19  ;;  %v10835_v19 = vld [vmem:[%s13301_s28] sm:$0xff]   ;;  %s13307_s28 = sld [smem:[#allocation56_spill]] }
 0xfd3   : > { %10122 = vmatprep.mubr.msk.bf16.mxu0 %vm11383_vm2, %v11382_v33  ;;  %10121 = vmatpush3.bf16.msra.mxu0 %v5077_v12 }
 0xfd4   : > { %10132 = vmatprep.subr.bf16.mxu0 %v11382_v33 }
0x108d   : > { %v4879_v26 = vpop.f32.mrb[96].mxu1 }
0x108e   : > { %v5023_v27 = vpack.c.bf16 %v4879_v26, %v4879_v26  ;;  %v10094_v28 = vpop.f32.mrb[97].mxu1 }
0x108f   : > { %v4882_v29 = vpop.f32.mrb[98].mxu1 }
0x1090   : > { %v10095_v30 = vpop.f32.mrb[99].mxu1  ;;  %10117 = vmatmul.mubr.msk.bf16.vlgmr.msra.gmra.mrb[104].mxu1 %vm2976_vm4, %v5023_v27  ;;  %v9351_v27 = vld [vmem:[%s13304_s5] ss:$0 sm:$0xff]  ;;  %s13308_s5 = sld [smem:[#allocation58_spill]] }
0x1091   : > { %10127 = vmatpush3.bf16.msra.mxu1 %v5123_v24  ;;  %10128 = vmatprep.mubr.msk.bf16.mxu1 %vm11383_vm2, %v11382_v33  ;;  %v10837_v30 = vld [vmem:[%s13305_s2] sm:$0xff]   ;;  %s13310_s2 = sld [smem:[#allocation25_spill]] }
0x1092   : > { %10138 = vmatprep.subr.bf16.mxu1 %v11382_v33 }
0x1095   : > { %v4971_v31 = vpop.f32.mrb[100].mxu1 }
0x1096   : > { %v5025_v32 = vpack.c.bf16 %v4971_v31, %v4971_v31  ;;  %v10106_v34 = vpop.f32.mrb[101].mxu1  ;;  %v10838_v31 = vld [vmem:[%s13306_s6 + $0x8] sm:$0xff]  }
0x1097   : > { %v4974_v35 = vpop.f32.mrb[102].mxu1  ;;  %v10840_v34 = vld [vmem:[%s13306_s6 + $0x18] sm:$0xff]  }
0x1098   : > { %v10107_v36 = vpop.f32.mrb[103].mxu1  ;;  %10129 = vmatmul.mubr.msk.bf16.vlgmr.msra.gmra.mrb[108].mxu1 %vm2976_vm4, %v5025_v32  ;;  %v10839_v32 = vld [vmem:[%s13306_s6 + $0x10] sm:$0xff]   ;;  %v9352_v35 = vld [vmem:[%s13307_s28] ss:$0 sm:$0xff]  ;;  %s2015_s28 = scalar_lea.vmem %s13310_s2, %s11910_s26  ;;  %s13323_s6 = sld [smem:[#allocation69_spill]] }
0x1099   : > { %10142 = vmatprep.mubr.msk.bf16.mxu1 %vm11383_vm2, %v11382_v33  ;;  %10139 = vmatpush3.bf16.msra.mxu1 %v10835_v19 }
0x109a   : > { %10140 = vmatprep.subr.bf16.mxu1 %v11382_v33 }
0x109d   : > { %v4925_v37 = vpop.f32.mrb[76].mxu0  ;;  %10141 = vmatpush3.bf16.msra.mxu1 %v10836_v20 }
0x109e   : > { %v5024_v38 = vpack.c.bf16 %v4925_v37, %v4925_v37  ;;  %v10100_v39 = vpop.f32.mrb[77].mxu0  ;;  %10146 = vmatprep.subr.bf16.mxu1 %v11382_v33 }
0x109f   : > { %v4928_v41 = vpop.f32.mrb[78].mxu0 }
0x10a0   : > { %v10101_v42 = vpop.f32.mrb[79].mxu0  ;;  %10123 = vmatmul.mubr.msk.bf16.vlgmr.msra.gmra.mrb[84].mxu0 %vm2976_vm4, %v5024_v38 }
0x10a1   : > { %10133 = vmatpush3.bf16.msra.mxu0 %v5169_v40  ;;  %10134 = vmatprep.mubr.msk.bf16.mxu0 %vm11383_vm2, %v11382_v33 }
0x10a2   : > { %10174 = vmatprep.subr.bf16.mxu0 %v11382_v33 }
0x10a5   : > { %v5017_v43 = vpop.f32.mrb[80].mxu0 }
0x10a6   : > { %v5026_v44 = vpack.c.bf16 %v5017_v43, %v5017_v43  ;;  %v10112_v45 = vpop.f32.mrb[81].mxu0 }
0x10a7   : > { %v5020_v46 = vpop.f32.mrb[82].mxu0 }
0x10a8   : > { %v10113_v47 = vpop.f32.mrb[83].mxu0  ;;  %10135 = vmatmul.mubr.msk.bf16.vlgmr.msra.gmra.mrb[88].mxu0 %vm2976_vm4, %v5026_v44 }
0x10a9   : > { %10178 = vmatprep.mubr.msk.bf16.mxu0 %vm11383_vm2, %v11382_v33 }
0x1163   : > { %v5067_v49 = vpop.f32.mrb[104].mxu1 }
0x1164   : > { %v10118_v50 = vpop.f32.mrb[105].mxu1  ;;  %v5211_v58 = vsel %vm2174_vm1, %v5067_v49, 0.0 }
0x1165   : > { %v5070_v51 = vpop.f32.mrb[106].mxu1 }
0x1166   : > { %v10119_v52 = vpop.f32.mrb[107].mxu1  ;;  %v9356_v51 = vld [vmem:[%s13308_s5] ss:$0 sm:$0xff]  ;;  %s13311_s5 = sld [smem:[#allocation24_spill]] }
0x116b   : > { %v5159_v53 = vpop.f32.mrb[108].mxu1 }
0x116c   : > { %v10130_v54 = vpop.f32.mrb[109].mxu1  ;;  %v5214_v63 = vsel %vm2174_vm1, %v5159_v53, 0.0  ;;  %s2011_s2 = scalar_lea.vmem %s13311_s5, %s11910_s26  ;;  %s13314_s26 = sld [smem:[#allocation64_spill]] }
0x116d   : > { %v5162_v55 = vpop.f32.mrb[110].mxu1  ;;  %s13315_s5 = sld [smem:[#allocation65_spill]] }
0x116e   : > { %v10131_v56 = vpop.f32.mrb[111].mxu1 }
0x1173   : > { %v5113_v57 = vpop.f32.mrb[84].mxu0 }
0x1174   : > { %v5212_v59 = vsel %vm2174_vm1, %v5113_v57, 0.0  ;;  %v10124_v60 = vpop.f32.mrb[85].mxu0 }
0x1175   : > { %v5213_v61 = vadd.f32 %v5212_v59, %v5211_v58  ;;  %v5116_v62 = vpop.f32.mrb[86].mxu0 }
0x1176   : > { %v10125_v1 = vpop.f32.mrb[87].mxu0 }
0x1177   : > { %v5215_v2 = vadd.f32 %v5214_v63, %v5213_v61  ;;  %v10841_v1 = vld [vmem:[%s13309_s4] sm:$0xff]  }
0x117b   : > { %v5205_v3 = vpop.f32.mrb[88].mxu0 }
0x117c   : > { %v5216_v5 = vsel %vm2174_vm1, %v5205_v3, 0.0  ;;  %v10136_v48 = vpop.f32.mrb[89].mxu0  ;;  %v5517_v3 = vld [vmem:[%s2015_s28] sm:$0xff]  ;;  %s13312_s28 = sld [smem:[#allocation63_spill]] }
0x117d   : > { %v5217_v4 = vadd.f32 %v5216_v5, %v5215_v2  ;;  %v5208_v6 = vpop.f32.mrb[90].mxu0  ;;  %v10842_v2 = vld [vmem:[%s13309_s4 + $0x8] sm:$0xff]   ;;  %vm5518_vm9 = vcmp.gt.f32.partialorder %v5517_v3, 0.0  ;;  %s13317_s4 = sld [smem:[#allocation27_spill]] }
0x117e   : > { %v10137_v9 = vpop.f32.mrb[91].mxu0  ;;  %v5519_v5 = vsel %vm5518_vm9, 1, %v11381_v0  ;;  %v5514_v0 = vld [vmem:[%s2011_s2] sm:$0xff]  ;;  %s13167_s2 = smov 4  }
0x117f   : > { %v5218_v11 = vadd.f32 %v5217_v4, %v12176_v8  ;;  %v5515_v19 = vmul.f32 5.656854, %v5514_v0 }
0x1181   : > { %v12378_v13 = vadd.f32 %v9349_v10, %v5218_v11  ;;  %v9362_v10 = vld [vmem:[#allocation2] ss:$0 sm:$0xff] }
0x1182   : > { %s13313_s3 = smov %s13312_s28 }
0x1183   : > { %v5229_v14 = vsel %vm2174_vm1, %v12378_v13, 0.0 }
0x1184   : > { %5230 = vadd.xlane.f32.xlu0 %v5229_v14 }
0x1211   : > { %v5231_v15 = vpop.xlane.xlu0 %5230 }
0x1212   : > { %v5232_v16 = vmul.f32 0.03125, %v5231_v15 }
0x1214   : > { %v5233_v17 = vsub.f32 %v12378_v13, %v5232_v16 }
0x1216   : > { %v5234_v7 = vmul.f32 %v5233_v17, %v5233_v17 }
0x1218   : > { %v5235_v18 = vsel %vm2174_vm1, %v5234_v7, 0.0 }
0x1219   : > { %5236 = vadd.xlane.f32.xlu1 %v5235_v18 }
0x12a6   : > { %v5237_v8 = vpop.xlane.xlu1 %5236 }
0x12a7   : > { %v5238_v21 = vmul.f32 0.03125, %v5237_v8 }
0x12a9   : > { %v5239_v22 = vadd.f32 1e-06, %v5238_v21 }
0x12ab   : > { %10947 = vrsqrt.f32 %v5239_v22 }
0x12b5   : > { %v10948_v12 = vpop.eup %10947 }
0x12b6   : > { %v5241_v26 = vmul.f32 %v10948_v12, %v5233_v17  ;;  %v9364_v17 = vld [vmem:[#allocation7] ss:$0 sm:$0xff] }
0x12b8   : > { %v5248_v28 = vmul.f32 %v9350_v25, %v5241_v26 }
0x12ba   : > { %v5255_v24 = vadd.f32 %v9351_v27, %v5248_v28  ;;  %v10843_v28 = vld [vmem:[%s13312_s28] sm:$0xff]   ;;  %s13165_s28 = smov 124  }
0x12bc   : > { %v5256_v29 = vpack.c.bf16 %v5255_v24, %v5255_v24  ;;  %v10844_v24 = vld [vmem:[%s13313_s3 + $0x10] sm:$0xff]  }
0x12bd   : > { %10175 = vmatpush3.bf16.msra.mxu0 %v10844_v24 }
0x12be   : > { %10143 = vmatmul.mubr.msk.bf16.vlgmr.msra.gmra.mrb[112].mxu1 %vm2304_vm3, %v5256_v29  ;;  %10176 = vmatprep.subr.bf16.mxu0 %v11382_v33  ;;  %v10845_v29 = vld [vmem:[%s13313_s3 + $0x8] sm:$0xff]  }
0x12bf   : > { %10154 = vmatprep.mubr.msk.bf16.mxu1 %vm11383_vm2, %v11382_v33  ;;  %10147 = vmatpush3.bf16.msra.mxu1 %v10837_v30  ;;  %v10846_v30 = vld [vmem:[%s13313_s3 + $0x18] sm:$0xff]  }
0x12c0   : > { %10148 = vmatprep.subr.bf16.mxu1 %v11382_v33 }
0x12c1   : > { %10177 = vmatpush3.bf16.msra.mxu0 %v10846_v30 }
0x12c2   : > { %10190 = vmatprep.subr.bf16.mxu0 %v11382_v33 }
0x12c3   : > { %10149 = vmatpush3.bf16.msra.mxu1 %v10838_v31 }
0x12c4   : > { %10150 = vmatprep.subr.bf16.mxu1 %v11382_v33 }
0x12c7   : > { %10151 = vmatpush3.bf16.msra.mxu1 %v10839_v32 }
0x12c8   : > { %10152 = vmatprep.subr.bf16.mxu1 %v11382_v33 }
0x12cb   : > { %10153 = vmatpush3.bf16.msra.mxu1 %v10840_v34  ;;  %v5536_v34 = vlaneseq }
0x12cc   : > { %10158 = vmatprep.subr.bf16.mxu1 %v11382_v33 }
0x1391   : > { %v5317_v36 = vpop.f32.mrb[112].mxu1 }
0x1392   : > { %v5318_v23 = vadd.f32 %v9352_v35, %v5317_v36  ;;  %v10144_v37 = vpop.f32.mrb[113].mxu1  ;;  %v5537_v36 = vshrl.u32 %v5536_v34, 7 }
0x1393   : > { %v5320_v38 = vpop.f32.mrb[114].mxu1 }
0x1394   : > { %v5324_v39 = vmul.f32 0.044715, %v5318_v23  ;;  %v10145_v40 = vpop.f32.mrb[115].mxu1  ;;  %v5323_v46 = vmul.f32 0.5, %v5318_v23  ;;  %v12435_v38 = vsub.s32 0, %v5537_v36 }
0x1396   : > { %v5325_v41 = vmul.f32 %v5324_v39, %v5318_v23 }
0x1398   : > { %v5326_v42 = vmul.f32 %v5325_v41, %v5318_v23 }
0x139a   : > { %v5327_v43 = vadd.f32 %v5326_v42, %v5318_v23  ;;  %v5525_v23 = vld [vmem:[#allocation8] sm:$0x1] }
0x139b   : > { %v5534_v37 = vadd.f32 1.0, %v5525_v23 }
0x139c   : > { %v5328_v44 = vmul.f32 0.7978846, %v5327_v43  ;;  %v10847_v43 = vld [vmem:[%s13313_s3 + $0x20] sm:$0xff]  }
0x139d   : > { %v5539_v39 = vrot.slane %v5534_v37, %v12435_v38 }
0x139e   : > { %10949 = vtanh.f32 %v5328_v44  ;;  %v10848_v44 = vld [vmem:[%s13313_s3 + $0x30] sm:$0xff]  }
0x13a8   : > { %v10950_v45 = vpop.eup %10949 }
0x13a9   : > { %v5330_v47 = vadd.f32 1.0, %v10950_v45 }
0x13ab   : > { %v5331_v49 = vmul.f32 %v5330_v47, %v5323_v46  ;;  %v10849_v46 = vld [vmem:[%s13313_s3 + $0x28] sm:$0xff]   ;;  %v10850_v47 = vld [vmem:[%s13313_s3 + $0x38] sm:$0xff]   ;;  %s13316_s3 = sld [smem:[#allocation26_spill]] }
0x13ad   : > { %v5332_v50 = vpack.c.bf16 %v5331_v49, %v5331_v49  ;;  %v10851_v49 = vld [vmem:[%s13314_s26] sm:$0xff]  }
0x13af   : > { %10155 = vmatmul.mubr.msk.bf16.vlgmr.msra.gmra.mrb[116].mxu1 %vm2126_vm0, %v5332_v50  ;;  %v10852_v50 = vld [vmem:[%s13314_s26 + $0x10] sm:$0xff]  }
0x13b0   : > { %10162 = vmatprep.mubr.msk.bf16.mxu1 %vm11383_vm2, %v11382_v33  ;;  %10159 = vmatpush3.bf16.msra.mxu1 %v10841_v1  ;;  %v10866_v1 = vld [vmem:[%s13315_s5 + $0x38] sm:$0xff]  }
0x13b1   : > { %10160 = vmatprep.subr.bf16.mxu1 %v11382_v33 }
0x13b4   : > { %10161 = vmatpush3.bf16.msra.mxu1 %v10842_v2 }
0x13b5   : > { %10166 = vmatprep.subr.bf16.mxu1 %v11382_v33 }
0x1482   : > { %v5409_v52 = vpop.f32.mrb[116].mxu1 }
0x1483   : > { %v5410_v53 = vadd.f32 %v9356_v51, %v5409_v52  ;;  %v10156_v54 = vpop.f32.mrb[117].mxu1  ;;  %v10853_v51 = vld [vmem:[%s13314_s26 + $0x8] sm:$0xff]   ;;  %v10854_v52 = vld [vmem:[%s13314_s26 + $0x18] sm:$0xff]  }
0x1484   : > { %v5412_v55 = vpop.f32.mrb[118].mxu1  ;;  %v10856_v54 = vld [vmem:[%s13314_s26 + $0x30] sm:$0xff]  }
0x1485   : > { %v10157_v56 = vpop.f32.mrb[119].mxu1  ;;  %v5415_v57 = vadd.f32 %v5410_v53, %v12378_v13  ;;  %v9363_v13 = vld [vmem:[#allocation5] ss:$0 sm:$0xff]  ;;  %v10857_v55 = vld [vmem:[%s13314_s26 + $0x28] sm:$0xff]  }
0x1486   : > { %v10855_v53 = vld [vmem:[%s13314_s26 + $0x20] sm:$0xff]   ;;  %v10858_v56 = vld [vmem:[%s13314_s26 + $0x38] sm:$0xff]  }
0x1487   : > { %v5418_v58 = vsel %vm2174_vm1, %v5415_v57, 0.0 }
0x1488   : > { %5419 = vadd.xlane.f32.xlu0 %v5418_v58  ;;  %v10860_v58 = vld [vmem:[%s13315_s5 + $0x10] sm:$0xff]  }
0x149e   : > { %5521 = vperm.xlu0 %10767, %v5519_v5  }
0x1515   : > { %v5420_v59 = vpop.xlane.xlu0 %5419 }
0x1516   : > { %v5421_v60 = vmul.f32 0.03125, %v5420_v59  ;;  %v10861_v59 = vld [vmem:[%s13315_s5 + $0x8] sm:$0xff]  }
0x1518   : > { %v5422_v61 = vsub.f32 %v5415_v57, %v5421_v60  ;;  %v10859_v57 = vld [vmem:[%s13315_s5] sm:$0xff]   ;;  %v10862_v60 = vld [vmem:[%s13315_s5 + $0x18] sm:$0xff]  }
0x151a   : > { %v5423_v62 = vmul.f32 %v5422_v61, %v5422_v61 }
0x151c   : > { %v5424_v63 = vsel %vm2174_vm1, %v5423_v62, 0.0  ;;  %v10864_v62 = vld [vmem:[%s13315_s5 + $0x30] sm:$0xff]  }
0x151d   : > { %5425 = vadd.xlane.f32.xlu1 %v5424_v63  ;;  %v5522_v7 = vpop.permute.xlu0 %5521  ;;  %v10865_v63 = vld [vmem:[%s13315_s5 + $0x28] sm:$0xff]  }
0x151e   : > { %vm5523_vm10 = vcmp.eq.s32.totalorder %v5522_v7, 1 }
0x15aa   : > { %v5426_v48 = vpop.xlane.xlu1 %5425 }
0x15ab   : > { %v5427_v4 = vmul.f32 0.03125, %v5426_v48 }
0x15ad   : > { %v5428_v6 = vadd.f32 1e-06, %v5427_v4 }
0x15af   : > { %10951 = vrsqrt.f32 %v5428_v6 }
0x15b9   : > { %v10952_v9 = vpop.eup %10951 }
0x15ba   : > { %v5430_v11 = vmul.f32 %v10952_v9, %v5422_v61  ;;  %v10863_v61 = vld [vmem:[%s13315_s5 + $0x20] sm:$0xff]   ;;  %s13322_s5 = sld [smem:[#allocation68_spill]] }
0x15bc   : > { %v5437_v14 = vmul.f32 %v9362_v10, %v5430_v11 }
0x15be   : > { %v5444_v15 = vadd.f32 %v9363_v13, %v5437_v14 }
0x15c0   : > { %v5445_v16 = vpack.c.bf16 %v5444_v15, %v5444_v15 }
0x15c2   : > { %10163 = vmatmul.mubr.msk.bf16.vlgmr.msra.gmra.mrb[120].mxu1 %vm2304_vm3, %v5445_v16 }
0x15c3   : > { %10170 = vmatprep.mubr.msk.bf16.mxu1 %vm11383_vm2, %v11382_v33  ;;  %10167 = vmatpush3.bf16.msra.mxu1 %v10843_v28 }
0x15c4   : > { %10168 = vmatprep.subr.bf16.mxu1 %v11382_v33 }
0x15c7   : > { %10169 = vmatpush3.bf16.msra.mxu1 %v10845_v29 }
0x15c8   : > { %10182 = vmatprep.subr.bf16.mxu1 %v11382_v33 }
0x1695   : > { %v5506_v18 = vpop.f32.mrb[120].mxu1 }
0x1696   : > { %v5507_v20 = vadd.f32 %v9364_v17, %v5506_v18  ;;  %v10164_v8 = vpop.f32.mrb[121].mxu1 }
0x1697   : > { %v5509_v21 = vpop.f32.mrb[122].mxu1 }
0x1698   : > { %v5516_v22 = vsel %vm3411_vm8, %v5507_v20, 0.0  ;;  %v10165_v12 = vpop.f32.mrb[123].mxu1 }
0x1699   : > { %v12422_v25 = vsel %vm5523_vm10, %v5516_v22, %v5515_v19 }
0x169a   : > { %v5526_v26 = vmul.f32 %v12422_v25, %v12422_v25 }
0x169c   : > { %v5527_v27 = vsel %vm2304_vm3, %v5526_v26, 0.0 }
0x169d   : > { %5528 = vadd.xlane.f32.xlu1 %v5527_v27 }
0x172a   : > { %v5529_v31 = vpop.xlane.xlu1 %5528 }
0x172b   : > { %v5530_v32 = vmul.f32 0.03125, %v5529_v31 }
0x172d   : > { %v5531_v35 = vadd.f32 1e-06, %v5530_v32 }
0x172f   : > { %10953 = vrsqrt.f32 %v5531_v35 }
0x1739   : > { %v10954_v40 = vpop.eup %10953 }
0x173a   : > { %v5533_v41 = vmul.f32 %v10954_v40, %v12422_v25 }
0x173c   : > { %v5541_v42 = vmul.f32 %v5539_v39, %v5533_v41 }
0x173e   : > { %v12441_v45 = vpack.c.bf16 %v5541_v42, %v5541_v42 }
0x1740   : > { %10171 = vmatmul.mubr.msk.bf16.vlgmr.msra.gmra.mrb[124].mxu1 %vm2304_vm3, %v12441_v45  ;;  %10179 = vmatmul.mubr.msk.bf16.vlgmr.msra.gmra.mrb[92].mxu0 %vm2304_vm3, %v12441_v45 }
0x1741   : > { %10183 = vmatpush3.bf16.msra.mxu1 %v10847_v43  ;;  %10191 = vmatpush3.bf16.msra.mxu0 %v10848_v44 }
0x1742   : > { %10184 = vmatprep.subr.bf16.mxu1 %v11382_v33  ;;  %10192 = vmatprep.subr.bf16.mxu0 %v11382_v33 }
0x1743   : > { %10186 = vmatprep.mubr.msk.bf16.mxu1 %vm11383_vm2, %v11382_v33  ;;  %10194 = vmatprep.mubr.msk.bf16.mxu0 %vm11383_vm2, %v11382_v33 }
0x1745   : > { %10185 = vmatpush3.bf16.msra.mxu1 %v10849_v46  ;;  %10193 = vmatpush3.bf16.msra.mxu0 %v10850_v47 }
0x1746   : > { %10198 = vmatprep.subr.bf16.mxu1 %v11382_v33  ;;  %10206 = vmatprep.subr.bf16.mxu0 %v11382_v33 }
0x1748   : > { %10187 = vmatmul.mubr.msk.bf16.vlgmr.msra.gmra.mrb[128].mxu1 %vm2304_vm3, %v12441_v45  ;;  %10195 = vmatmul.mubr.msk.bf16.vlgmr.msra.gmra.mrb[96].mxu0 %vm2304_vm3, %v12441_v45 }
0x1749   : > { %10199 = vmatpush3.bf16.msra.mxu1 %v10851_v49  ;;  %10207 = vmatpush3.bf16.msra.mxu0 %v10852_v50 }
0x174a   : > { %10200 = vmatprep.subr.bf16.mxu1 %v11382_v33  ;;  %10208 = vmatprep.subr.bf16.mxu0 %v11382_v33 }
0x174b   : > { %10202 = vmatprep.mubr.msk.bf16.mxu1 %vm11383_vm2, %v11382_v33  ;;  %10210 = vmatprep.mubr.msk.bf16.mxu0 %vm11383_vm2, %v11382_v33 }
0x174d   : > { %10201 = vmatpush3.bf16.msra.mxu1 %v10853_v51  ;;  %10209 = vmatpush3.bf16.msra.mxu0 %v10854_v52 }
0x174e   : > { %10214 = vmatprep.subr.bf16.mxu1 %v11382_v33  ;;  %10222 = vmatprep.subr.bf16.mxu0 %v11382_v33 }
0x1750   : > { %10203 = vmatmul.mubr.msk.bf16.vlgmr.msra.gmra.mrb[132].mxu1 %vm2304_vm3, %v12441_v45  ;;  %10211 = vmatmul.mubr.msk.bf16.vlgmr.msra.gmra.mrb[100].mxu0 %vm2304_vm3, %v12441_v45 }
0x1751   : > { %10215 = vmatpush3.bf16.msra.mxu1 %v10855_v53  ;;  %10223 = vmatpush3.bf16.msra.mxu0 %v10856_v54 }
0x1752   : > { %10216 = vmatprep.subr.bf16.mxu1 %v11382_v33  ;;  %10224 = vmatprep.subr.bf16.mxu0 %v11382_v33 }
0x1753   : > { %10218 = vmatprep.mubr.msk.bf16.mxu1 %vm11383_vm2, %v11382_v33  ;;  %10226 = vmatprep.mubr.msk.bf16.mxu0 %vm11383_vm2, %v11382_v33 }
0x1755   : > { %10217 = vmatpush3.bf16.msra.mxu1 %v10857_v55  ;;  %10225 = vmatpush3.bf16.msra.mxu0 %v10858_v56 }
0x1756   : > { %10230 = vmatprep.subr.bf16.mxu1 %v11382_v33  ;;  %10238 = vmatprep.subr.bf16.mxu0 %v11382_v33 }
0x1758   : > { %10219 = vmatmul.mubr.msk.bf16.vlgmr.msra.gmra.mrb[136].mxu1 %vm2304_vm3, %v12441_v45  ;;  %10227 = vmatmul.mubr.msk.bf16.vlgmr.msra.gmra.mrb[104].mxu0 %vm2304_vm3, %v12441_v45 }
0x1759   : > { %10231 = vmatpush3.bf16.msra.mxu1 %v10859_v57  ;;  %10239 = vmatpush3.bf16.msra.mxu0 %v10860_v58 }
0x175a   : > { %10232 = vmatprep.subr.bf16.mxu1 %v11382_v33  ;;  %10240 = vmatprep.subr.bf16.mxu0 %v11382_v33 }
0x175b   : > { %10234 = vmatprep.mubr.msk.bf16.mxu1 %vm11383_vm2, %v11382_v33  ;;  %10242 = vmatprep.mubr.msk.bf16.mxu0 %vm11383_vm2, %v11382_v33 }
0x175d   : > { %10233 = vmatpush3.bf16.msra.mxu1 %v10861_v59  ;;  %10241 = vmatpush3.bf16.msra.mxu0 %v10862_v60 }
0x175e   : > { %10246 = vmatprep.subr.bf16.mxu1 %v11382_v33  ;;  %10254 = vmatprep.subr.bf16.mxu0 %v11382_v33 }
0x1760   : > { %10235 = vmatmul.mubr.msk.bf16.vlgmr.msra.gmra.mrb[140].mxu1 %vm2304_vm3, %v12441_v45  ;;  %10243 = vmatmul.mubr.msk.bf16.vlgmr.msra.gmra.mrb[108].mxu0 %vm2304_vm3, %v12441_v45 }
0x1761   : > { %10247 = vmatpush3.bf16.msra.mxu1 %v10863_v61  ;;  %10255 = vmatpush3.bf16.msra.mxu0 %v10864_v62 }
0x1762   : > { %10248 = vmatprep.subr.bf16.mxu1 %v11382_v33  ;;  %10256 = vmatprep.subr.bf16.mxu0 %v11382_v33 }
0x1763   : > { %10250 = vmatprep.mubr.msk.bf16.mxu1 %vm11383_vm2, %v11382_v33  ;;  %10258 = vmatprep.mubr.msk.bf16.mxu0 %vm11383_vm2, %v11382_v33 }
0x1765   : > { %10249 = vmatpush3.bf16.msra.mxu1 %v10865_v63  ;;  %10257 = vmatpush3.bf16.msra.mxu0 %v10866_v1 }
0x1766   : > { %10262 = vmatprep.subr.bf16.mxu1 %v11382_v33  ;;  %10268 = vmatprep.subr.bf16.mxu0 %v11382_v33 }
0x1768   : > { %10251 = vmatmul.mubr.msk.bf16.vlgmr.msra.gmra.mrb[144].mxu1 %vm2304_vm3, %v12441_v45  ;;  %10259 = vmatmul.mubr.msk.bf16.vlgmr.msra.gmra.mrb[112].mxu0 %vm2304_vm3, %v12441_v45 }
0x1769   : > { %10264 = vmatprep.mubr.msk.bf16.mxu1 %vm11383_vm2, %v11382_v33  ;;  %10270 = vmatprep.mubr.msk.bf16.mxu0 %vm11383_vm2, %v11382_v33 }
0x1813   : > { %v12529_v2 = vpop.f32.mrb[124].mxu1  ;;  %v12531_v3 = vpop.f32.mrb[92].mxu0 }
0x1814   : > { %6248 = vrot.lane.b32.xlu0 %v12531_v3, %s13167_s2  ;;  %v10180_v5 = vpop.f32.mrb[93].mxu0  ;;  %6246 = vrot.lane.b32.xlu1 %v12529_v2, %s13167_s2  ;;  %v10172_v48 = vpop.f32.mrb[125].mxu1  ;;  %v6222_v9 = vsub.f32 0.0, %v12529_v2  ;;  %v6223_v13 = vsub.f32 0.0, %v12531_v3 }
0x1815   : > { %v5647_v4 = vpop.f32.mrb[126].mxu1  ;;  %v5699_v6 = vpop.f32.mrb[94].mxu0 }
0x1816   : > { %v10173_v10 = vpop.f32.mrb[127].mxu1  ;;  %v10181_v11 = vpop.f32.mrb[95].mxu0  ;;  %v12582_v4 = vld [vmem:[%s13316_s3] sm:$0xff] }
0x1817   : > { %v12585_v6 = vld [vmem:[%s13317_s4] sm:$0xff] }
0x1818   : > { %6230 = vrot.lane.b32.xlu1 %v6222_v9, %s13165_s28 }
0x181b   : > { %v12540_v14 = vpop.f32.mrb[128].mxu1  ;;  %v12542_v15 = vpop.f32.mrb[96].mxu0 }
0x181c   : > { %v10196_v16 = vpop.f32.mrb[97].mxu0  ;;  %6232 = vrot.lane.b32.xlu1 %v6223_v13, %s13165_s28  ;;  %v10188_v0 = vpop.f32.mrb[129].mxu1  ;;  %v6224_v50 = vsub.f32 0.0, %v12540_v14  ;;  %v6225_v57 = vsub.f32 0.0, %v12542_v15 }
0x181d   : > { %v5751_v17 = vpop.f32.mrb[130].mxu1  ;;  %v5803_v7 = vpop.f32.mrb[98].mxu0 }
0x181e   : > { %v10189_v18 = vpop.f32.mrb[131].mxu1  ;;  %v10197_v19 = vpop.f32.mrb[99].mxu0 }
0x1823   : > { %v5852_v20 = vpop.f32.mrb[132].mxu1  ;;  %v12545_v8 = vpop.f32.mrb[100].mxu0 }
0x1824   : > { %v10212_v21 = vpop.f32.mrb[101].mxu0  ;;  %6298 = vrot.lane.b32.xlu1 %v5852_v20, %s13167_s2  ;;  %v10204_v22 = vpop.f32.mrb[133].mxu1  ;;  %v6274_v24 = vsub.f32 0.0, %v5852_v20  ;;  %v6275_v36 = vsub.f32 0.0, %v12545_v8  ;;  %v6314_v10 = vmul.f32 %v5852_v20, %v12582_v4  ;;  %v6315_v18 = vmul.f32 %v12545_v8, %v12582_v4 }
0x1825   : > { %v5855_v12 = vpop.f32.mrb[134].mxu1  ;;  %v5907_v26 = vpop.f32.mrb[102].mxu0  ;;  %v6262_v20 = vmul.f32 %v12529_v2, %v12582_v4  ;;  %v6263_v2 = vmul.f32 %v12531_v3, %v12582_v4 }
0x1826   : > { %v10205_v27 = vpop.f32.mrb[135].mxu1  ;;  %v10213_v28 = vpop.f32.mrb[103].mxu0 }
0x1828   : > { %6300 = vrot.lane.b32.xlu1 %v12545_v8, %s13167_s2 }
0x182b   : > { %v12550_v29 = vpop.f32.mrb[136].mxu1  ;;  %v12552_v30 = vpop.f32.mrb[104].mxu0 }
0x182c   : > { %v10228_v31 = vpop.f32.mrb[105].mxu0  ;;  %6282 = vrot.lane.b32.xlu1 %v6274_v24, %s13165_s28  ;;  %6302 = vrot.lane.b32.xlu0 %v12550_v29, %s13167_s2  ;;  %v10220_v32 = vpop.f32.mrb[137].mxu1  ;;  %v6276_v39 = vsub.f32 0.0, %v12550_v29  ;;  %v6277_v46 = vsub.f32 0.0, %v12552_v30 }
0x182d   : > { %v5959_v34 = vpop.f32.mrb[138].mxu1  ;;  %v6011_v35 = vpop.f32.mrb[106].mxu0  ;;  %v6316_v31 = vmul.f32 %v12550_v29, %v12582_v4  ;;  %v6317_v29 = vmul.f32 %v12552_v30, %v12582_v4 }
0x182e   : > { %v10221_v23 = vpop.f32.mrb[139].mxu1  ;;  %v10229_v37 = vpop.f32.mrb[107].mxu0 }
0x1830   : > { %6284 = vrot.lane.b32.xlu1 %v6275_v36, %s13165_s28  ;;  %6304 = vrot.lane.b32.xlu0 %v12552_v30, %s13167_s2  ;;  %v6264_v30 = vmul.f32 %v12540_v14, %v12582_v4 }
0x1833   : > { %v12562_v40 = vpop.f32.mrb[140].mxu1  ;;  %v12564_v41 = vpop.f32.mrb[108].mxu0 }
0x1834   : > { %v10244_v42 = vpop.f32.mrb[109].mxu0  ;;  %6250 = vrot.lane.b32.xlu0 %v12540_v14, %s13167_s2  ;;  %6286 = vrot.lane.b32.xlu1 %v6276_v39, %s13165_s28  ;;  %v10236_v43 = vpop.f32.mrb[141].mxu1  ;;  %v6265_v14 = vmul.f32 %v12542_v15, %v12582_v4 }
0x1835   : > { %v6063_v44 = vpop.f32.mrb[142].mxu1  ;;  %v6115_v45 = vpop.f32.mrb[110].mxu0 }
0x1836   : > { %v10237_v47 = vpop.f32.mrb[143].mxu1  ;;  %v10245_v49 = vpop.f32.mrb[111].mxu0 }
0x1838   : > { %6252 = vrot.lane.b32.xlu0 %v12542_v15, %s13167_s2  ;;  %6288 = vrot.lane.b32.xlu1 %v6277_v46, %s13165_s28 }
0x183b   : > { %v12574_v51 = vpop.f32.mrb[144].mxu1  ;;  %v12576_v52 = vpop.f32.mrb[112].mxu0 }
0x183c   : > { %v10260_v53 = vpop.f32.mrb[113].mxu0  ;;  %6234 = vrot.lane.b32.xlu1 %v6224_v50, %s13165_s28  ;;  %v10252_v54 = vpop.f32.mrb[145].mxu1 }
0x183d   : > { %v6167_v55 = vpop.f32.mrb[146].mxu1  ;;  %v6219_v56 = vpop.f32.mrb[114].mxu0 }
0x183e   : > { %v10253_v58 = vpop.f32.mrb[147].mxu1  ;;  %v10261_v59 = vpop.f32.mrb[115].mxu0 }
0x1840   : > { %6236 = vrot.lane.b32.xlu1 %v6225_v57, %s13165_s28  ;;  %v6570_v57 = vpack.c.bf16 %v12562_v40, %v12562_v40  ;;  %s13318_s28 = sld [smem:[#allocation66_spill]] }
0x1842   : > { %v6578_v40 = vsel %vm3411_vm8, %v6570_v57, 0 }
0x1846   : > { %s13319_s2 = smov %s13318_s28 }
0x1886   : > { %v6247_v60 = vpop.permute.xlu1 %6246  ;;  %v6249_v5 = vpop.permute.xlu0 %6248 }
0x188a   : > { %v6231_v61 = vpop.permute.xlu1 %6230 }
0x188b   : > { %v6258_v16 = vsel %vm3218_vm7, %v6231_v61, %v6247_v60 }
0x188c   : > { %v6266_v19 = vmul.f32 %v6258_v16, %v12585_v6 }
0x188e   : > { %v6233_v62 = vpop.permute.xlu1 %6232  ;;  %v6270_v32 = vadd.f32 %v6266_v19, %v6262_v20 }
0x188f   : > { %v6259_v12 = vsel %vm3218_vm7, %v6233_v62, %v6249_v5  ;;  %v6571_v5 = vpack.c.bf16 %v12564_v41, %v12564_v41 }
0x1890   : > { %v6267_v34 = vmul.f32 %v6259_v12, %v12585_v6  ;;  %v6326_v43 = vpack.c.bf16 %v6270_v32, %v6270_v32 }
0x1891   : > { %v6624_v15 = vsel %vm3411_vm8, %v6571_v5, 0 }
0x1892   : > { %v6271_v44 = vadd.f32 %v6267_v34, %v6263_v2 }
0x1894   : > { %v6327_v54 = vpack.c.bf16 %v6271_v44, %v6271_v44 }
0x1896   : > { %v6299_v63 = vpop.permute.xlu1 %6298 }
0x189a   : > { %v6301_v1 = vpop.permute.xlu1 %6300 }
0x189e   : > { %v6283_v48 = vpop.permute.xlu1 %6282  ;;  %v6303_v13 = vpop.permute.xlu0 %6302 }
0x189f   : > { %v6310_v9 = vsel %vm3218_vm7, %v6283_v48, %v6299_v63 }
0x18a0   : > { %v6318_v11 = vmul.f32 %v6310_v9, %v12585_v6 }
0x18a2   : > { %v6322_v0 = vadd.f32 %v6318_v11, %v6314_v10  ;;  %v6285_v17 = vpop.permute.xlu1 %6284  ;;  %v6305_v27 = vpop.permute.xlu0 %6304 }
0x18a3   : > { %v6311_v7 = vsel %vm3218_vm7, %v6285_v17, %v6301_v1 }
0x18a4   : > { %v6330_v21 = vpack.c.bf16 %v6322_v0, %v6322_v0  ;;  %v6319_v22 = vmul.f32 %v6311_v7, %v12585_v6 }
0x18a6   : > { %v6323_v26 = vadd.f32 %v6319_v22, %v6315_v18  ;;  %v6287_v28 = vpop.permute.xlu1 %6286  ;;  %v6338_v24 = vsel %vm2976_vm4, %v6330_v21, 0  ;;  %v6251_v45 = vpop.permute.xlu0 %6250 }
0x18a7   : > { %v6312_v8 = vsel %vm3218_vm7, %v6287_v28, %v6303_v13  ;;  %10263 = vmatpush3.bf16.xpose.msra.mxu1 %v6338_v24 }
0x18a8   : > { %v6331_v35 = vpack.c.bf16 %v6323_v26, %v6323_v26  ;;  %v6320_v36 = vmul.f32 %v6312_v8, %v12585_v6  ;;  %10274 = vmatprep.subr.bf16.mxu1 %v11382_v33 }
0x18aa   : > { %v6324_v23 = vadd.f32 %v6320_v36, %v6316_v31  ;;  %v6289_v37 = vpop.permute.xlu1 %6288  ;;  %v6384_v39 = vsel %vm2976_vm4, %v6331_v35, 0  ;;  %v6253_v58 = vpop.permute.xlu0 %6252 }
0x18ab   : > { %v6313_v42 = vsel %vm3218_vm7, %v6289_v37, %v6305_v27  ;;  %10269 = vmatpush3.bf16.xpose.msra.mxu0 %v6384_v39 }
0x18ac   : > { %v6332_v46 = vpack.c.bf16 %v6324_v23, %v6324_v23  ;;  %v6321_v47 = vmul.f32 %v6313_v42, %v12585_v6  ;;  %10280 = vmatprep.subr.bf16.mxu0 %v11382_v33 }
0x18ae   : > { %v6325_v49 = vadd.f32 %v6321_v47, %v6317_v29  ;;  %10265 = vmatmul.mubr.msk.bf16.vlgmr.msra.gmra.mrb[148].mxu1 %vm2976_vm4, %v6326_v43  ;;  %v6235_v3 = vpop.permute.xlu1 %6234  ;;  %v6430_v50 = vsel %vm2976_vm4, %v6332_v46, 0 }
0x18af   : > { %v6260_v53 = vsel %vm3218_vm7, %v6235_v3, %v6251_v45  ;;  %10275 = vmatpush3.bf16.xpose.msra.mxu1 %v6430_v50  ;;  %10276 = vmatprep.mubr.msk.bf16.mxu1 %vm11383_vm2, %v11382_v33 }
0x18b0   : > { %v6333_v55 = vpack.c.bf16 %v6325_v49, %v6325_v49  ;;  %v6268_v56 = vmul.f32 %v6260_v53, %v12585_v6  ;;  %10286 = vmatprep.subr.bf16.mxu1 %v11382_v33 }
0x18b2   : > { %v6272_v59 = vadd.f32 %v6268_v56, %v6264_v30  ;;  %10271 = vmatmul.mubr.msk.bf16.vlgmr.msra.gmra.mrb[116].mxu0 %vm2976_vm4, %v6327_v54  ;;  %v6237_v60 = vpop.permute.xlu1 %6236  ;;  %v6476_v61 = vsel %vm2976_vm4, %v6333_v55, 0 }
0x18b3   : > { %v6261_v62 = vsel %vm3218_vm7, %v6237_v60, %v6253_v58  ;;  %10281 = vmatpush3.bf16.xpose.msra.mxu0 %v6476_v61  ;;  %10282 = vmatprep.mubr.msk.bf16.mxu0 %vm11383_vm2, %v11382_v33 }
0x18b4   : > { %v6328_v63 = vpack.c.bf16 %v6272_v59, %v6272_v59  ;;  %v6269_v1 = vmul.f32 %v6261_v62, %v12585_v6  ;;  %10292 = vmatprep.subr.bf16.mxu0 %v11382_v33  ;;  %v6572_v62 = vpack.c.bf16 %v12574_v51, %v12574_v51 }
0x18b6   : > { %v6273_v48 = vadd.f32 %v6269_v1, %v6265_v14  ;;  %10277 = vmatmul.mubr.msk.bf16.vlgmr.msra.gmra.mrb[152].mxu1 %vm2976_vm4, %v6328_v63  ;;  %v6670_v5 = vsel %vm3411_vm8, %v6572_v62, 0 }
0x18b7   : > { %10287 = vmatpush3.bf16.msra.mxu1 %v6578_v40  ;;  %10288 = vmatprep.mubr.msk.bf16.mxu1 %vm11383_vm2, %v11382_v33 }
0x18b8   : > { %v6329_v9 = vpack.c.bf16 %v6273_v48, %v6273_v48  ;;  %10298 = vmatprep.subr.bf16.mxu1 %v11382_v33  ;;  %v6573_v48 = vpack.c.bf16 %v12576_v52, %v12576_v52 }
0x18ba   : > { %10283 = vmatmul.mubr.msk.bf16.vlgmr.msra.gmra.mrb[120].mxu0 %vm2976_vm4, %v6329_v9 }
0x18bb   : > { %10293 = vmatpush3.bf16.msra.mxu0 %v6624_v15  ;;  %10294 = vmatprep.mubr.msk.bf16.mxu0 %vm11383_vm2, %v11382_v33 }
0x18bc   : > { %10304 = vmatprep.subr.bf16.mxu0 %v11382_v33 }
0x1981   : > { %v6374_v41 = vpop.f32.mrb[148].mxu1 }
0x1982   : > { %v6518_v10 = vmul.f32 0.35355338, %v6374_v41  ;;  %v10266_v11 = vpop.f32.mrb[149].mxu1  ;;  %v5590_v41 = vld [vmem:[%s13318_s28] sm:$0xf]  ;;  %s13320_s28 = sld [smem:[#allocation67_spill]] }
0x1983   : > { %v6377_v13 = vpop.f32.mrb[150].mxu1 }
0x1984   : > { %v10267_v16 = vpop.f32.mrb[151].mxu1  ;;  %v6522_v0 = vsel %vm2976_vm4, %v6518_v10, -inf  ;;  %v6766_v13 = vsel %vm3411_vm8, %v5590_v41, 0 }
0x1985   : > { %v6420_v17 = vpop.f32.mrb[116].mxu0  ;;  %6523 = vmax.xlane.f32.xlu1 %v6522_v0 }
0x1986   : > { %v6519_v7 = vmul.f32 0.35355338, %v6420_v17  ;;  %v10272_v18 = vpop.f32.mrb[117].mxu0 }
0x1987   : > { %v6423_v19 = vpop.f32.mrb[118].mxu0 }
0x1988   : > { %v10273_v21 = vpop.f32.mrb[119].mxu0  ;;  %v6525_v22 = vsel %vm2976_vm4, %v6519_v7, -inf  ;;  %v5592_v19 = vld [vmem:[%s13319_s2 + $0x8] sm:$0xf] }
0x1989   : > { %6526 = vmax.xlane.f32.xlu0 %v6525_v22  ;;  %v6466_v12 = vpop.f32.mrb[152].mxu1 }
0x198a   : > { %v6520_v20 = vmul.f32 0.35355338, %v6466_v12  ;;  %v10278_v26 = vpop.f32.mrb[153].mxu1 }
0x198b   : > { %v6469_v27 = vpop.f32.mrb[154].mxu1 }
0x198c   : > { %v10279_v28 = vpop.f32.mrb[155].mxu1  ;;  %v6528_v24 = vsel %vm2976_vm4, %v6520_v20, -inf  ;;  %v5593_v27 = vld [vmem:[%s13319_s2 + $0xc] sm:$0xf] }
0x198d   : > { %v6512_v31 = vpop.f32.mrb[120].mxu0  ;;  %6529 = vmax.xlane.f32.xlu0 %v6528_v24 }
0x198e   : > { %v6521_v8 = vmul.f32 0.35355338, %v6512_v31  ;;  %v10284_v32 = vpop.f32.mrb[121].mxu0 }
0x198f   : > { %v6515_v34 = vpop.f32.mrb[122].mxu0  ;;  %v6904_v32 = vsel %vm3411_vm8, %v5593_v27, 0  ;;  %v10873_v27 = vld [vmem:[%s13323_s6 + $0x10] sm:$0xff]  }
0x1990   : > { %v10285_v35 = vpop.f32.mrb[123].mxu0  ;;  %v6531_v36 = vsel %vm2976_vm4, %v6521_v8, -inf }
0x1991   : > { %6532 = vmax.xlane.f32.xlu1 %v6531_v36 }
0x1a12   : > { %v6524_v2 = vpop.xlane.xlu1 %6523 }
0x1a13   : > { %v6534_v23 = vsub.f32 %v6518_v10, %v6524_v2  ;;  %v6716_v10 = vsel %vm3411_vm8, %v6573_v48, 0 }
0x1a15   : > { %v6538_v37 = vmul.f32 1.442695, %v6534_v23 }
0x1a16   : > { %v6527_v39 = vpop.xlane.xlu0 %6526 }
0x1a17   : > { %10955 = vpow2.f32 %v6538_v37  ;;  %v6535_v29 = vsub.f32 %v6519_v7, %v6527_v39  ;;  %v5591_v7 = vld [vmem:[%s13319_s2 + $0x4] sm:$0xf]  ;;  %s13321_s2 = smov %s13320_s28 }
0x1a18   : > { %v6812_v18 = vsel %vm3411_vm8, %v5591_v7, 0 }
0x1a19   : > { %v6540_v42 = vmul.f32 1.442695, %v6535_v29 }
0x1a1a   : > { %v6530_v43 = vpop.xlane.xlu0 %6529 }
0x1a1b   : > { %10957 = vpow2.f32 %v6540_v42  ;;  %v6536_v44 = vsub.f32 %v6520_v20, %v6530_v43  ;;  %v6858_v20 = vsel %vm3411_vm8, %v5592_v19, 0 }
0x1a1d   : > { %v6542_v45 = vmul.f32 1.442695, %v6536_v44 }
0x1a1e   : > { %v6533_v46 = vpop.xlane.xlu1 %6532 }
0x1a1f   : > { %10959 = vpow2.f32 %v6542_v45  ;;  %v6537_v47 = vsub.f32 %v6521_v8, %v6533_v46 }
0x1a21   : > { %v10956_v49 = vpop.eup %10955  ;;  %v6544_v3 = vmul.f32 1.442695, %v6537_v47 }
0x1a22   : > { %v6546_v50 = vsel %vm2976_vm4, %v10956_v49, 0.0 }
0x1a23   : > { %10961 = vpow2.f32 %v6544_v3  ;;  %6547 = vadd.xlane.f32.xlu0 %v6546_v50 }
0x1a25   : > { %v10958_v53 = vpop.eup %10957 }
0x1a26   : > { %v6549_v30 = vsel %vm2976_vm4, %v10958_v53, 0.0 }
0x1a27   : > { %6550 = vadd.xlane.f32.xlu1 %v6549_v30 }
0x1a29   : > { %v10960_v54 = vpop.eup %10959 }
0x1a2a   : > { %v6552_v55 = vsel %vm2976_vm4, %v10960_v54, 0.0 }
0x1a2b   : > { %6553 = vadd.xlane.f32.xlu0 %v6552_v55 }
0x1a2d   : > { %v10962_v56 = vpop.eup %10961 }
0x1a2e   : > { %v6555_v57 = vsel %vm2976_vm4, %v10962_v56, 0.0 }
0x1a2f   : > { %6556 = vadd.xlane.f32.xlu1 %v6555_v57 }
0x1ab0   : > { %v6548_v58 = vpop.xlane.xlu0 %6547 }
0x1ab1   : > { %10963 = vrcp.f32 %v6548_v58 }
0x1ab4   : > { %v6551_v59 = vpop.xlane.xlu1 %6550 }
0x1ab5   : > { %10965 = vrcp.f32 %v6551_v59 }
0x1ab8   : > { %v6554_v60 = vpop.xlane.xlu0 %6553 }
0x1ab9   : > { %10967 = vrcp.f32 %v6554_v60 }
0x1abb   : > { %v10964_v61 = vpop.eup %10963 }
0x1abc   : > { %v6562_v14 = vmul.f32 %v10964_v61, %v10956_v49  ;;  %v6557_v63 = vpop.xlane.xlu1 %6556 }
0x1abd   : > { %10969 = vrcp.f32 %v6557_v63 }
0x1abe   : > { %v6566_v1 = vpack.c.bf16 %v6562_v14, %v6562_v14 }
0x1abf   : > { %v10966_v40 = vpop.eup %10965 }
0x1ac0   : > { %v6563_v9 = vmul.f32 %v10966_v40, %v10958_v53  ;;  %10289 = vmatmul.mubr.msk.bf16.vlgmr.msra.gmra.mrb[156].mxu1 %vm2976_vm4, %v6566_v1 }
0x1ac1   : > { %10299 = vmatpush3.bf16.msra.mxu1 %v6670_v5  ;;  %10300 = vmatprep.mubr.msk.bf16.mxu1 %vm11383_vm2, %v11382_v33 }
0x1ac2   : > { %v6567_v15 = vpack.c.bf16 %v6563_v9, %v6563_v9  ;;  %10310 = vmatprep.subr.bf16.mxu1 %v11382_v33 }
0x1ac3   : > { %v10968_v51 = vpop.eup %10967 }
0x1ac4   : > { %v6564_v11 = vmul.f32 %v10968_v51, %v10960_v54  ;;  %10295 = vmatmul.mubr.msk.bf16.vlgmr.msra.gmra.mrb[124].mxu0 %vm2976_vm4, %v6567_v15 }
0x1ac5   : > { %10305 = vmatpush3.bf16.msra.mxu0 %v6716_v10  ;;  %10306 = vmatprep.mubr.msk.bf16.mxu0 %vm11383_vm2, %v11382_v33  ;;  %v10867_v10 = vld [vmem:[%s13320_s28] sm:$0xff]   ;;  %s13324_s28 = sld [smem:[#allocation71_spill]] }
0x1ac6   : > { %v6568_v52 = vpack.c.bf16 %v6564_v11, %v6564_v11  ;;  %10316 = vmatprep.subr.bf16.mxu0 %v11382_v33  ;;  %v10868_v11 = vld [vmem:[%s13322_s5] sm:$0xff]  }
0x1ac7   : > { %v10970_v16 = vpop.eup %10969 }
0x1ac8   : > { %v6565_v0 = vmul.f32 %v10970_v16, %v10962_v56  ;;  %10301 = vmatmul.mubr.msk.bf16.vlgmr.msra.gmra.mrb[160].mxu1 %vm2976_vm4, %v6568_v52  ;;  %v10869_v52 = vld [vmem:[%s13321_s2 + $0x8] sm:$0xff]  }
0x1ac9   : > { %10311 = vmatpush3.bf16.msra.mxu1 %v6766_v13  ;;  %10312 = vmatprep.mubr.msk.bf16.mxu1 %vm11383_vm2, %v11382_v33  ;;  %v10870_v13 = vld [vmem:[%s13322_s5 + $0x8] sm:$0xff]   ;;  %s13326_s5 = sld [smem:[#allocation72_spill]] }
0x1aca   : > { %v6569_v17 = vpack.c.bf16 %v6565_v0, %v6565_v0  ;;  %10322 = vmatprep.subr.bf16.mxu1 %v11382_v33 }
0x1acb   : > { %s13325_s2 = smov %s13324_s28 }
0x1acc   : > { %10307 = vmatmul.mubr.msk.bf16.vlgmr.msra.gmra.mrb[128].mxu0 %vm2976_vm4, %v6569_v17  ;;  %v6954_v17 = vld [vmem:[#allocation10] sm:$0x1] }
0x1acd   : > { %10318 = vmatprep.mubr.msk.bf16.mxu0 %vm11383_vm2, %v11382_v33  ;;  %10317 = vmatpush3.bf16.msra.mxu0 %v6812_v18  ;;  %v6963_v7 = vadd.f32 1.0, %v6954_v17 }
0x1ace   : > { %10328 = vmatprep.subr.bf16.mxu0 %v11382_v33 }
0x1acf   : > { %v6968_v18 = vrot.slane %v6963_v7, %v12435_v38  ;;  %v10889_v7 = vld [vmem:[%s13326_s5 + $0x18] sm:$0xff]  }
0x1b93   : > { %v6614_v21 = vpop.f32.mrb[156].mxu1 }
0x1b94   : > { %v6758_v22 = vpack.c.bf16 %v6614_v21, %v6614_v21  ;;  %v10290_v12 = vpop.f32.mrb[157].mxu1 }
0x1b95   : > { %v6617_v26 = vpop.f32.mrb[158].mxu1 }
0x1b96   : > { %v10291_v28 = vpop.f32.mrb[159].mxu1  ;;  %10313 = vmatmul.mubr.msk.bf16.vlgmr.msra.gmra.mrb[164].mxu1 %vm2976_vm4, %v6758_v22  ;;  %v10872_v26 = vld [vmem:[%s13323_s6 + $0x8] sm:$0xff]  }
0x1b97   : > { %v6660_v24 = vpop.f32.mrb[124].mxu0  ;;  %10323 = vmatpush3.bf16.msra.mxu1 %v6858_v20  ;;  %10324 = vmatprep.mubr.msk.bf16.mxu1 %vm11383_vm2, %v11382_v33  ;;  %v10871_v20 = vld [vmem:[%s13323_s6] sm:$0xff]   ;;  %v10874_v28 = vld [vmem:[%s13323_s6 + $0x18] sm:$0xff]  }
0x1b98   : > { %v6759_v31 = vpack.c.bf16 %v6660_v24, %v6660_v24  ;;  %v10296_v8 = vpop.f32.mrb[125].mxu0  ;;  %10334 = vmatprep.subr.bf16.mxu1 %v11382_v33 }
0x1b99   : > { %v6663_v34 = vpop.f32.mrb[126].mxu0 }
0x1b9a   : > { %v10297_v35 = vpop.f32.mrb[127].mxu0  ;;  %10319 = vmatmul.mubr.msk.bf16.vlgmr.msra.gmra.mrb[132].mxu0 %vm2976_vm4, %v6759_v31 }
0x1b9b   : > { %v6706_v36 = vpop.f32.mrb[160].mxu1  ;;  %10329 = vmatpush3.bf16.msra.mxu0 %v6904_v32  ;;  %10330 = vmatprep.mubr.msk.bf16.mxu0 %vm11383_vm2, %v11382_v33 }
0x1b9c   : > { %v6760_v2 = vpack.c.bf16 %v6706_v36, %v6706_v36  ;;  %v10302_v23 = vpop.f32.mrb[161].mxu1  ;;  %10342 = vmatprep.subr.bf16.mxu0 %v11382_v33 }
0x1b9d   : > { %v6709_v37 = vpop.f32.mrb[162].mxu1 }
0x1b9e   : > { %v10303_v39 = vpop.f32.mrb[163].mxu1  ;;  %10325 = vmatmul.mubr.msk.bf16.vlgmr.msra.gmra.mrb[168].mxu1 %vm2976_vm4, %v6760_v2 }
0x1b9f   : > { %v6752_v29 = vpop.f32.mrb[128].mxu0  ;;  %10338 = vmatprep.mubr.msk.bf16.mxu1 %vm11383_vm2, %v11382_v33  ;;  %10335 = vmatpush3.bf16.msra.mxu1 %v10867_v10  ;;  %v10881_v10 = vld [vmem:[%s13325_s2 + $0x18] sm:$0xff]  }
0x1ba0   : > { %v6761_v42 = vpack.c.bf16 %v6752_v29, %v6752_v29  ;;  %v10308_v43 = vpop.f32.mrb[129].mxu0  ;;  %10336 = vmatprep.subr.bf16.mxu1 %v11382_v33 }
0x1ba1   : > { %v6755_v44 = vpop.f32.mrb[130].mxu0 }
0x1ba2   : > { %v10309_v45 = vpop.f32.mrb[131].mxu0  ;;  %10331 = vmatmul.mubr.msk.bf16.vlgmr.msra.gmra.mrb[136].mxu0 %vm2976_vm4, %v6761_v42 }
0x1ba3   : > { %10346 = vmatprep.mubr.msk.bf16.mxu0 %vm11383_vm2, %v11382_v33  ;;  %10343 = vmatpush3.bf16.msra.mxu0 %v10868_v11  ;;  %v10882_v11 = vld [vmem:[%s13326_s5 + $0x8] sm:$0xff]  }
0x1ba4   : > { %10344 = vmatprep.subr.bf16.mxu0 %v11382_v33  ;;  %10337 = vmatpush3.bf16.msra.mxu1 %v10869_v52  ;;  %v10883_v52 = vld [vmem:[%s13325_s2 + $0x30] sm:$0xff]  }
0x1ba5   : > { %10350 = vmatprep.subr.bf16.mxu1 %v11382_v33 }
0x1ba7   : > { %10345 = vmatpush3.bf16.msra.mxu0 %v10870_v13  ;;  %v10884_v13 = vld [vmem:[%s13326_s5 + $0x20] sm:$0xff]  }
0x1ba8   : > { %10362 = vmatprep.subr.bf16.mxu0 %v11382_v33 }
0x1c69   : > { %v6802_v46 = vpop.f32.mrb[164].mxu1 }
0x1c6a   : > { %v10314_v47 = vpop.f32.mrb[165].mxu1  ;;  %v6946_v53 = vsel %vm2304_vm3, %v6802_v46, 0.0 }
0x1c6b   : > { %v6805_v49 = vpop.f32.mrb[166].mxu1 }
0x1c6c   : > { %v10315_v3 = vpop.f32.mrb[167].mxu1 }
0x1c6d   : > { %v6848_v50 = vpop.f32.mrb[132].mxu0 }
0x1c6e   : > { %v6947_v30 = vsel %vm2304_vm3, %v6848_v50, 0.0  ;;  %v10320_v54 = vpop.f32.mrb[133].mxu0 }
0x1c6f   : > { %v6948_v55 = vadd.f32 %v6947_v30, %v6946_v53  ;;  %v6851_v56 = vpop.f32.mrb[134].mxu0 }
0x1c70   : > { %v10321_v57 = vpop.f32.mrb[135].mxu0 }
0x1c71   : > { %v6894_v58 = vpop.f32.mrb[168].mxu1  ;;  %v10875_v57 = vld [vmem:[%s13324_s28] sm:$0xff]   ;;  %s13327_s28 = sld [smem:[#allocation73_spill]] }
0x1c72   : > { %v6949_v59 = vsel %vm2304_vm3, %v6894_v58, 0.0  ;;  %v10326_v60 = vpop.f32.mrb[169].mxu1  ;;  %v10876_v58 = vld [vmem:[%s13325_s2 + $0x20] sm:$0xff]  }
0x1c73   : > { %v6950_v61 = vadd.f32 %v6949_v59, %v6948_v55  ;;  %v6897_v62 = vpop.f32.mrb[170].mxu1  ;;  %v10877_v59 = vld [vmem:[%s13325_s2 + $0x8] sm:$0xff]  }
0x1c74   : > { %v10327_v14 = vpop.f32.mrb[171].mxu1  ;;  %v10878_v60 = vld [vmem:[%s13325_s2 + $0x28] sm:$0xff]  }
0x1c75   : > { %v6940_v63 = vpop.f32.mrb[136].mxu0 }
0x1c76   : > { %v6951_v1 = vsel %vm2304_vm3, %v6940_v63, 0.0  ;;  %v10332_v40 = vpop.f32.mrb[137].mxu0  ;;  %v7174_v63 = vld [vmem:[#allocation11] sm:$0x1] }
0x1c77   : > { %v6952_v5 = vadd.f32 %v6951_v1, %v6950_v61  ;;  %v6943_v48 = vpop.f32.mrb[138].mxu0  ;;  %v7183_v1 = vadd.f32 1.0, %v7174_v63  ;;  %s13328_s6 = smov %s13327_s28  ;;  %v10888_v17 = vld [vmem:[%s13327_s28] sm:$0xff]   ;;  %s13329_s28 = smov 4  }
0x1c78   : > { %v10333_v9 = vpop.f32.mrb[139].mxu0 }
0x1c79   : > { %v12703_v15 = vadd.f32 %v6952_v5, %v12422_v25  ;;  %v7188_v40 = vrot.slane %v7183_v1, %v12435_v38 }
0x1c7b   : > { %v6955_v51 = vmul.f32 %v12703_v15, %v12703_v15 }
0x1c7d   : > { %v6956_v41 = vsel %vm2304_vm3, %v6955_v51, 0.0  ;;  %v10880_v51 = vld [vmem:[%s13326_s5] sm:$0xff]  }
0x1c7e   : > { %6957 = vadd.xlane.f32.xlu0 %v6956_v41 }
0x1d0b   : > { %v6958_v25 = vpop.xlane.xlu0 %6957 }
0x1d0c   : > { %v6959_v16 = vmul.f32 0.03125, %v6958_v25  ;;  %v10885_v25 = vld [vmem:[%s13325_s2 + $0x38] sm:$0xff]  }
0x1d0e   : > { %v6960_v0 = vadd.f32 1e-06, %v6959_v16  ;;  %v10886_v16 = vld [vmem:[%s13326_s5 + $0x28] sm:$0xff]  }
0x1d10   : > { %10971 = vrsqrt.f32 %v6960_v0  ;;  %v10887_v0 = vld [vmem:[%s13326_s5 + $0x10] sm:$0xff]  }
0x1d1a   : > { %v10972_v19 = vpop.eup %10971 }
0x1d1b   : > { %v6962_v21 = vmul.f32 %v10972_v19, %v12703_v15  ;;  %v10891_v19 = vld [vmem:[%s13326_s5 + $0x30] sm:$0xff]  }
0x1d1d   : > { %v6970_v22 = vmul.f32 %v6968_v18, %v6962_v21  ;;  %v10890_v18 = vld [vmem:[%s13328_s6 + $0x8] sm:$0xff]   ;;  %v10892_v21 = vld [vmem:[%s13328_s6 + $0x20] sm:$0xff]  }
0x1d1f   : > { %v6971_v12 = vpack.c.bf16 %v6970_v22, %v6970_v22  ;;  %v10893_v22 = vld [vmem:[%s13326_s5 + $0x38] sm:$0xff]   ;;  %s9488_s5 = sshll.u32 %s11738_s0, 7 }
0x1d21   : > { %10339 = vmatmul.mubr.msk.bf16.vlgmr.msra.gmra.mrb[172].mxu1 %vm2304_vm3, %v6971_v12  ;;  %10347 = vmatmul.mubr.msk.bf16.vlgmr.msra.gmra.mrb[140].mxu0 %vm2304_vm3, %v6971_v12  ;;  %v10894_v12 = vld [vmem:[%s13328_s6 + $0x28] sm:$0xff]  }
0x1d22   : > { %10358 = vmatprep.mubr.msk.bf16.mxu1 %vm11383_vm2, %v11382_v33  ;;  %10366 = vmatprep.mubr.msk.bf16.mxu0 %vm11383_vm2, %v11382_v33 }
0x1d23   : > { %10351 = vmatpush3.bf16.msra.mxu1 %v10871_v20  ;;  %10363 = vmatpush3.bf16.msra.mxu0 %v10875_v57  ;;  %v10895_v20 = vld [vmem:[%s13328_s6 + $0x10] sm:$0xff]  }
0x1d24   : > { %10352 = vmatprep.subr.bf16.mxu1 %v11382_v33  ;;  %10364 = vmatprep.subr.bf16.mxu0 %v11382_v33 }
0x1d27   : > { %10353 = vmatpush3.bf16.msra.mxu1 %v10872_v26  ;;  %10365 = vmatpush3.bf16.msra.mxu0 %v10877_v59  ;;  %v10896_v26 = vld [vmem:[%s13328_s6 + $0x18] sm:$0xff]  }
0x1d28   : > { %10354 = vmatprep.subr.bf16.mxu1 %v11382_v33  ;;  %10370 = vmatprep.subr.bf16.mxu0 %v11382_v33 }
0x1d2b   : > { %10355 = vmatpush3.bf16.msra.mxu1 %v10873_v27  ;;  %v10897_v27 = vld [vmem:[%s13328_s6 + $0x30] sm:$0xff]  }
0x1d2c   : > { %10356 = vmatprep.subr.bf16.mxu1 %v11382_v33 }
0x1d2f   : > { %10357 = vmatpush3.bf16.msra.mxu1 %v10874_v28  ;;  %v10898_v28 = vld [vmem:[%s13328_s6 + $0x38] sm:$0xff]   ;;  %s13075_s6 = scalar_lea.hbm %s11715_s24, %s9488_s5 }
0x1d30   : > { %10378 = vmatprep.subr.bf16.mxu1 %v11382_v33 }
0x1df4   : > { %v7025_v24 = vpop.f32.mrb[172].mxu1  ;;  %v7090_v31 = vpop.f32.mrb[140].mxu0 }
0x1df5   : > { %v7032_v8 = vmul.f32 0.044715, %v7025_v24  ;;  %v10340_v32 = vpop.f32.mrb[173].mxu1  ;;  %v10348_v34 = vpop.f32.mrb[141].mxu0  ;;  %v7031_v44 = vmul.f32 0.5, %v7025_v24 }
0x1df6   : > { %v7028_v35 = vpop.f32.mrb[174].mxu1  ;;  %v7093_v36 = vpop.f32.mrb[142].mxu0 }
0x1df7   : > { %v7033_v2 = vmul.f32 %v7032_v8, %v7025_v24  ;;  %v10341_v23 = vpop.f32.mrb[175].mxu1  ;;  %v10349_v37 = vpop.f32.mrb[143].mxu0 }
0x1df9   : > { %v7034_v39 = vmul.f32 %v7033_v2, %v7025_v24 }
0x1dfb   : > { %v7035_v29 = vadd.f32 %v7034_v39, %v7025_v24 }
0x1dfd   : > { %v7036_v42 = vmul.f32 0.7978846, %v7035_v29 }
0x1dff   : > { %10973 = vtanh.f32 %v7036_v42 }
0x1e09   : > { %v10974_v43 = vpop.eup %10973 }
0x1e0a   : > { %v7038_v45 = vadd.f32 1.0, %v10974_v43 }
0x1e0c   : > { %v7039_v46 = vmul.f32 %v7038_v45, %v7031_v44 }
0x1e0e   : > { %v7096_v47 = vmul.f32 %v7090_v31, %v7039_v46 }
0x1e10   : > { %v7097_v49 = vpack.c.bf16 %v7096_v47, %v7096_v47 }
0x1e12   : > { %10359 = vmatmul.mubr.msk.bf16.vlgmr.msra.gmra.mrb[176].mxu1 %vm2126_vm0, %v7097_v49 }
0x1e13   : > { %10382 = vmatprep.mubr.msk.bf16.mxu1 %vm11383_vm2, %v11382_v33  ;;  %10379 = vmatpush3.bf16.msra.mxu1 %v10876_v58 }
0x1e14   : > { %10380 = vmatprep.subr.bf16.mxu1 %v11382_v33 }
0x1e17   : > { %10381 = vmatpush3.bf16.msra.mxu1 %v10878_v60 }
0x1e18   : > { %10394 = vmatprep.subr.bf16.mxu1 %v11382_v33 }
0x1ee5   : > { %v7167_v3 = vpop.f32.mrb[176].mxu1 }
0x1ee6   : > { %v12736_v50 = vadd.f32 %v7167_v3, %v12703_v15  ;;  %v10360_v53 = vpop.f32.mrb[177].mxu1  ;;  %v10879_v15 = vld [vmem:[%s13325_s2 + $0x10] sm:$0xff]   ;;  %s13330_s2 = smov 124  }
0x1ee7   : > { %v7170_v30 = vpop.f32.mrb[178].mxu1 }
0x1ee8   : > { %v10361_v54 = vpop.f32.mrb[179].mxu1  ;;  %v7175_v55 = vmul.f32 %v12736_v50, %v12736_v50 }
0x1eea   : > { %v7176_v56 = vsel %vm2304_vm3, %v7175_v55, 0.0 }
0x1eeb   : > { %7177 = vadd.xlane.f32.xlu1 %v7176_v56 }
0x1f78   : > { %v7178_v61 = vpop.xlane.xlu1 %7177 }
0x1f79   : > { %v7179_v62 = vmul.f32 0.03125, %v7178_v61 }
0x1f7b   : > { %v7180_v14 = vadd.f32 1e-06, %v7179_v62 }
0x1f7d   : > { %10975 = vrsqrt.f32 %v7180_v14 }
0x1f87   : > { %v10976_v5 = vpop.eup %10975 }
0x1f88   : > { %v7182_v48 = vmul.f32 %v10976_v5, %v12736_v50 }
0x1f8a   : > { %v7190_v9 = vmul.f32 %v7188_v40, %v7182_v48 }
0x1f8c   : > { %v12753_v41 = vpack.c.bf16 %v7190_v9, %v7190_v9 }
0x1f8e   : > { %10367 = vmatmul.mubr.msk.bf16.vlgmr.msra.gmra.mrb[144].mxu0 %vm2304_vm3, %v12753_v41  ;;  %10383 = vmatmul.mubr.msk.bf16.vlgmr.msra.gmra.mrb[180].mxu1 %vm2304_vm3, %v12753_v41 }
0x1f8f   : > { %10371 = vmatpush3.bf16.msra.mxu0 %v10879_v15  ;;  %10395 = vmatpush3.bf16.msra.mxu1 %v10880_v51 }
0x1f90   : > { %10372 = vmatprep.subr.bf16.mxu0 %v11382_v33  ;;  %10396 = vmatprep.subr.bf16.mxu1 %v11382_v33 }
0x1f91   : > { %10374 = vmatprep.mubr.msk.bf16.mxu0 %vm11383_vm2, %v11382_v33  ;;  %10398 = vmatprep.mubr.msk.bf16.mxu1 %vm11383_vm2, %v11382_v33 }
0x1f93   : > { %10373 = vmatpush3.bf16.msra.mxu0 %v10881_v10  ;;  %10397 = vmatpush3.bf16.msra.mxu1 %v10882_v11 }
0x1f94   : > { %10386 = vmatprep.subr.bf16.mxu0 %v11382_v33  ;;  %10410 = vmatprep.subr.bf16.mxu1 %v11382_v33 }
0x1f96   : > { %10375 = vmatmul.mubr.msk.bf16.vlgmr.msra.gmra.mrb[148].mxu0 %vm2304_vm3, %v12753_v41  ;;  %10399 = vmatmul.mubr.msk.bf16.vlgmr.msra.gmra.mrb[184].mxu1 %vm2304_vm3, %v12753_v41 }
0x1f97   : > { %10387 = vmatpush3.bf16.msra.mxu0 %v10883_v52  ;;  %10411 = vmatpush3.bf16.msra.mxu1 %v10884_v13 }
0x1f98   : > { %10388 = vmatprep.subr.bf16.mxu0 %v11382_v33  ;;  %10412 = vmatprep.subr.bf16.mxu1 %v11382_v33 }
0x1f99   : > { %10390 = vmatprep.mubr.msk.bf16.mxu0 %vm11383_vm2, %v11382_v33  ;;  %10414 = vmatprep.mubr.msk.bf16.mxu1 %vm11383_vm2, %v11382_v33 }
0x1f9b   : > { %10389 = vmatpush3.bf16.msra.mxu0 %v10885_v25  ;;  %10413 = vmatpush3.bf16.msra.mxu1 %v10886_v16 }
0x1f9c   : > { %10402 = vmatprep.subr.bf16.mxu0 %v11382_v33  ;;  %10426 = vmatprep.subr.bf16.mxu1 %v11382_v33 }
0x1f9e   : > { %10391 = vmatmul.mubr.msk.bf16.vlgmr.msra.gmra.mrb[152].mxu0 %vm2304_vm3, %v12753_v41  ;;  %10415 = vmatmul.mubr.msk.bf16.vlgmr.msra.gmra.mrb[188].mxu1 %vm2304_vm3, %v12753_v41 }
0x1f9f   : > { %10403 = vmatpush3.bf16.msra.mxu0 %v10887_v0  ;;  %10427 = vmatpush3.bf16.msra.mxu1 %v10888_v17 }
0x1fa0   : > { %10404 = vmatprep.subr.bf16.mxu0 %v11382_v33  ;;  %10428 = vmatprep.subr.bf16.mxu1 %v11382_v33 }
0x1fa1   : > { %10406 = vmatprep.mubr.msk.bf16.mxu0 %vm11383_vm2, %v11382_v33  ;;  %10430 = vmatprep.mubr.msk.bf16.mxu1 %vm11383_vm2, %v11382_v33 }
0x1fa3   : > { %10405 = vmatpush3.bf16.msra.mxu0 %v10889_v7  ;;  %10429 = vmatpush3.bf16.msra.mxu1 %v10890_v18 }
0x1fa4   : > { %10418 = vmatprep.subr.bf16.mxu0 %v11382_v33  ;;  %10442 = vmatprep.subr.bf16.mxu1 %v11382_v33 }
0x1fa6   : > { %10407 = vmatmul.mubr.msk.bf16.vlgmr.msra.gmra.mrb[156].mxu0 %vm2304_vm3, %v12753_v41  ;;  %10431 = vmatmul.mubr.msk.bf16.vlgmr.msra.gmra.mrb[192].mxu1 %vm2304_vm3, %v12753_v41 }
0x1fa7   : > { %10419 = vmatpush3.bf16.msra.mxu0 %v10891_v19  ;;  %10443 = vmatpush3.bf16.msra.mxu1 %v10892_v21 }
0x1fa8   : > { %10420 = vmatprep.subr.bf16.mxu0 %v11382_v33  ;;  %10444 = vmatprep.subr.bf16.mxu1 %v11382_v33 }
0x1fa9   : > { %10422 = vmatprep.mubr.msk.bf16.mxu0 %vm11383_vm2, %v11382_v33  ;;  %10446 = vmatprep.mubr.msk.bf16.mxu1 %vm11383_vm2, %v11382_v33 }
0x1fab   : > { %10421 = vmatpush3.bf16.msra.mxu0 %v10893_v22  ;;  %10445 = vmatpush3.bf16.msra.mxu1 %v10894_v12 }
0x1fac   : > { %10434 = vmatprep.subr.bf16.mxu0 %v11382_v33  ;;  %10458 = vmatprep.subr.bf16.mxu1 %v11382_v33 }
0x1fae   : > { %10423 = vmatmul.mubr.msk.bf16.vlgmr.msra.gmra.mrb[160].mxu0 %vm2304_vm3, %v12753_v41  ;;  %10447 = vmatmul.mubr.msk.bf16.vlgmr.msra.gmra.mrb[196].mxu1 %vm2304_vm3, %v12753_v41 }
0x1faf   : > { %10435 = vmatpush3.bf16.msra.mxu0 %v10895_v20  ;;  %10438 = vmatprep.mubr.msk.bf16.mxu0 %vm11383_vm2, %v11382_v33 }
0x1fb0   : > { %10436 = vmatprep.subr.bf16.mxu0 %v11382_v33  ;;  %10460 = vmatprep.mubr.msk.bf16.mxu1 %vm11383_vm2, %v11382_v33 }
0x1fb3   : > { %10437 = vmatpush3.bf16.msra.mxu0 %v10896_v26 }
0x1fb4   : > { %10450 = vmatprep.subr.bf16.mxu0 %v11382_v33 }
0x1fb6   : > { %10439 = vmatmul.mubr.msk.bf16.vlgmr.msra.gmra.mrb[164].mxu0 %vm2304_vm3, %v12753_v41 }
0x1fb7   : > { %10451 = vmatpush3.bf16.msra.mxu0 %v10897_v27  ;;  %10454 = vmatprep.mubr.msk.bf16.mxu0 %vm11383_vm2, %v11382_v33 }
0x1fb8   : > { %10452 = vmatprep.subr.bf16.mxu0 %v11382_v33 }
0x1fbb   : > { %10453 = vmatpush3.bf16.msra.mxu0 %v10898_v28 }
0x1fbc   : > { %10464 = vmatprep.subr.bf16.mxu0 %v11382_v33 }
0x1fbe   : > { %10455 = vmatmul.mubr.msk.bf16.vlgmr.msra.gmra.mrb[168].mxu0 %vm2304_vm3, %v12753_v41 }
0x1fbf   : > { %10466 = vmatprep.mubr.msk.bf16.mxu0 %vm11383_vm2, %v11382_v33 }
0x2061   : > { %v12841_v24 = vpop.f32.mrb[144].mxu0  ;;  %v12843_v31 = vpop.f32.mrb[180].mxu1 }
0x2062   : > { %v7871_v8 = vsub.f32 0.0, %v12841_v24  ;;  %7895 = vrot.lane.b32.xlu0 %v12841_v24, %s13329_s28  ;;  %v10368_v32 = vpop.f32.mrb[145].mxu0  ;;  %v10384_v34 = vpop.f32.mrb[181].mxu1  ;;  %v7873_v16 = vsub.f32 0.0, %v12843_v31 }
0x2063   : > { %v7296_v35 = vpop.f32.mrb[146].mxu0  ;;  %v7400_v36 = vpop.f32.mrb[182].mxu1 }
0x2064   : > { %7879 = vrot.lane.b32.xlu1 %v7871_v8, %s13330_s2  ;;  %v10369_v2 = vpop.f32.mrb[147].mxu0  ;;  %v10385_v23 = vpop.f32.mrb[183].mxu1 }
0x2069   : > { %v12849_v37 = vpop.f32.mrb[148].mxu0  ;;  %v12851_v39 = vpop.f32.mrb[184].mxu1 }
0x206a   : > { %v7923_v29 = vsub.f32 0.0, %v12851_v39  ;;  %v10376_v42 = vpop.f32.mrb[149].mxu0  ;;  %7947 = vrot.lane.b32.xlu1 %v12851_v39, %s13329_s28  ;;  %v10400_v43 = vpop.f32.mrb[185].mxu1  ;;  %v7872_v48 = vsub.f32 0.0, %v12849_v37  ;;  %v7963_v34 = vmul.f32 %v12851_v39, %v12582_v4 }
0x206b   : > { %v7348_v44 = vpop.f32.mrb[150].mxu0  ;;  %v7504_v45 = vpop.f32.mrb[186].mxu1  ;;  %v7911_v42 = vmul.f32 %v12841_v24, %v12582_v4 }
0x206c   : > { %v10377_v46 = vpop.f32.mrb[151].mxu0  ;;  %7931 = vrot.lane.b32.xlu0 %v7923_v29, %s13330_s2  ;;  %v10401_v47 = vpop.f32.mrb[187].mxu1 }
0x2071   : > { %v12857_v49 = vpop.f32.mrb[152].mxu0  ;;  %v12859_v3 = vpop.f32.mrb[188].mxu1 }
0x2072   : > { %v7925_v53 = vsub.f32 0.0, %v12859_v3  ;;  %v10392_v30 = vpop.f32.mrb[153].mxu0  ;;  %7951 = vrot.lane.b32.xlu0 %v12859_v3, %s13329_s28  ;;  %v10416_v54 = vpop.f32.mrb[189].mxu1  ;;  %v7874_v17 = vsub.f32 0.0, %v12857_v49  ;;  %v7965_v39 = vmul.f32 %v12859_v3, %v12582_v4  ;;  %v10999_v4 = vld [vmem:[%s13316_s3] sm:$0xff]  ;;  %s13334_s3 = sld [smem:[#allocation76_spill]] }
0x2073   : > { %v7452_v55 = vpop.f32.mrb[154].mxu0  ;;  %v7608_v56 = vpop.f32.mrb[190].mxu1  ;;  %v11000_v3 = vld [vmem:[%s13317_s4] sm:$0xff] }
0x2074   : > { %v10393_v57 = vpop.f32.mrb[155].mxu0  ;;  %7935 = vrot.lane.b32.xlu1 %v7925_v53, %s13330_s2  ;;  %v10417_v58 = vpop.f32.mrb[191].mxu1 }
0x2079   : > { %v12865_v59 = vpop.f32.mrb[156].mxu0  ;;  %v12867_v60 = vpop.f32.mrb[192].mxu1 }
0x207a   : > { %v7924_v61 = vsub.f32 0.0, %v12865_v59  ;;  %v10408_v62 = vpop.f32.mrb[157].mxu0  ;;  %7949 = vrot.lane.b32.xlu0 %v12865_v59, %s13329_s28  ;;  %v10432_v14 = vpop.f32.mrb[193].mxu1 }
0x207b   : > { %v7556_v63 = vpop.f32.mrb[158].mxu0  ;;  %v7712_v1 = vpop.f32.mrb[194].mxu1 }
0x207c   : > { %v10409_v40 = vpop.f32.mrb[159].mxu0  ;;  %7933 = vrot.lane.b32.xlu1 %v7924_v61, %s13330_s2  ;;  %v10433_v5 = vpop.f32.mrb[195].mxu1 }
0x207e   : > { %7897 = vrot.lane.b32.xlu0 %v12849_v37, %s13329_s28 }
0x2080   : > { %7881 = vrot.lane.b32.xlu1 %v7872_v48, %s13330_s2 }
0x2081   : > { %v12877_v9 = vpop.f32.mrb[160].mxu0  ;;  %v12879_v15 = vpop.f32.mrb[196].mxu1 }
0x2082   : > { %v7926_v51 = vsub.f32 0.0, %v12877_v9  ;;  %v10424_v41 = vpop.f32.mrb[161].mxu0  ;;  %7953 = vrot.lane.b32.xlu0 %v12877_v9, %s13329_s28  ;;  %v10448_v10 = vpop.f32.mrb[197].mxu1 }
0x2083   : > { %v7660_v11 = vpop.f32.mrb[162].mxu0  ;;  %v7816_v52 = vpop.f32.mrb[198].mxu1 }
0x2084   : > { %v10425_v13 = vpop.f32.mrb[163].mxu0  ;;  %7937 = vrot.lane.b32.xlu1 %v7926_v51, %s13330_s2  ;;  %v10449_v25 = vpop.f32.mrb[199].mxu1  ;;  %v7912_v51 = vmul.f32 %v10999_v4, %v12849_v37 }
0x2086   : > { %7899 = vrot.lane.b32.xlu0 %v12843_v31, %s13329_s28 }
0x2088   : > { %7883 = vrot.lane.b32.xlu1 %v7873_v16, %s13330_s2 }
0x2089   : > { %v12889_v0 = vpop.f32.mrb[164].mxu0 }
0x208a   : > { %v10440_v7 = vpop.f32.mrb[165].mxu0  ;;  %7901 = vrot.lane.b32.xlu0 %v12857_v49, %s13329_s28  ;;  %s13332_s28 = sld [smem:[#allocation75_spill]] }
0x208b   : > { %v7764_v18 = vpop.f32.mrb[166].mxu0 }
0x208c   : > { %v10441_v19 = vpop.f32.mrb[167].mxu0  ;;  %7885 = vrot.lane.b32.xlu1 %v7874_v17, %s13330_s2  ;;  %v7913_v18 = vmul.f32 %v10999_v4, %v12843_v31  ;;  %v7914_v31 = vmul.f32 %v10999_v4, %v12857_v49  ;;  %s13331_s2 = sld [smem:[#allocation74_spill]] }
0x2091   : > { %v12895_v21 = vpop.f32.mrb[168].mxu0 }
0x2092   : > { %v10456_v22 = vpop.f32.mrb[169].mxu0 }
0x2093   : > { %v7868_v12 = vpop.f32.mrb[170].mxu0 }
0x2094   : > { %v10457_v20 = vpop.f32.mrb[171].mxu0  ;;  %v8219_v12 = vpack.c.bf16 %v12867_v60, %v12867_v60 }
0x2096   : > { %v8227_v60 = vsel %vm3411_vm8, %v8219_v12, 0 }
0x20d4   : > { %v7896_v26 = vpop.permute.xlu0 %7895 }
0x20d6   : > { %v7880_v27 = vpop.permute.xlu1 %7879 }
0x20d7   : > { %v7907_v36 = vsel %vm3218_vm7, %v7880_v27, %v7896_v26 }
0x20d8   : > { %v7915_v23 = vmul.f32 %v7907_v36, %v12585_v6 }
0x20da   : > { %v7919_v47 = vadd.f32 %v7915_v23, %v7911_v42 }
0x20dc   : > { %v7948_v28 = vpop.permute.xlu1 %7947  ;;  %v7975_v54 = vpack.c.bf16 %v7919_v47, %v7919_v47 }
0x20de   : > { %v7932_v8 = vpop.permute.xlu0 %7931 }
0x20df   : > { %v7959_v32 = vsel %vm3218_vm7, %v7932_v8, %v7948_v28 }
0x20e0   : > { %v7967_v35 = vmul.f32 %v7959_v32, %v12585_v6 }
0x20e2   : > { %v7971_v2 = vadd.f32 %v7967_v35, %v7963_v34  ;;  %v8220_v34 = vpack.c.bf16 %v12889_v0, %v12889_v0 }
0x20e4   : > { %v7979_v29 = vpack.c.bf16 %v7971_v2, %v7971_v2  ;;  %v7952_v43 = vpop.permute.xlu0 %7951  ;;  %v8273_v49 = vsel %vm3411_vm8, %v8220_v34, 0 }
0x20e6   : > { %v7936_v44 = vpop.permute.xlu1 %7935  ;;  %v7987_v45 = vsel %vm2976_vm4, %v7979_v29, 0 }
0x20e7   : > { %v7961_v46 = vsel %vm3218_vm7, %v7936_v44, %v7952_v43  ;;  %10459 = vmatpush3.bf16.xpose.msra.mxu1 %v7987_v45 }
0x20e8   : > { %v7969_v53 = vmul.f32 %v7961_v46, %v12585_v6  ;;  %10470 = vmatprep.subr.bf16.mxu1 %v11382_v33  ;;  %v7964_v6 = vmul.f32 %v10999_v4, %v12865_v59  ;;  %v7966_v59 = vmul.f32 %v10999_v4, %v12877_v9 }
0x20ea   : > { %v7973_v30 = vadd.f32 %v7969_v53, %v7965_v39 }
0x20ec   : > { %v7981_v24 = vpack.c.bf16 %v7973_v30, %v7973_v30  ;;  %v7950_v55 = vpop.permute.xlu0 %7949 }
0x20ee   : > { %10461 = vmatmul.mubr.msk.bf16.vlgmr.msra.gmra.mrb[200].mxu1 %vm2976_vm4, %v7975_v54  ;;  %v7934_v56 = vpop.permute.xlu1 %7933  ;;  %v8079_v57 = vsel %vm2976_vm4, %v7981_v24, 0 }
0x20ef   : > { %v7960_v58 = vsel %vm3218_vm7, %v7934_v56, %v7950_v55  ;;  %10471 = vmatpush3.bf16.xpose.msra.mxu1 %v8079_v57  ;;  %10472 = vmatprep.mubr.msk.bf16.mxu1 %vm11383_vm2, %v11382_v33 }
0x20f0   : > { %v7968_v61 = vmul.f32 %v11000_v3, %v7960_v58  ;;  %v7898_v62 = vpop.permute.xlu0 %7897  ;;  %10482 = vmatprep.subr.bf16.mxu1 %v11382_v33 }
0x20f2   : > { %v7972_v14 = vadd.f32 %v7968_v61, %v7964_v6  ;;  %v7882_v63 = vpop.permute.xlu1 %7881 }
0x20f3   : > { %v7908_v1 = vsel %vm3218_vm7, %v7882_v63, %v7898_v62 }
0x20f4   : > { %v7980_v40 = vpack.c.bf16 %v7972_v14, %v7972_v14  ;;  %v7916_v5 = vmul.f32 %v11000_v3, %v7908_v1  ;;  %v7954_v48 = vpop.permute.xlu0 %7953 }
0x20f6   : > { %v7938_v41 = vpop.permute.xlu1 %7937  ;;  %v8033_v10 = vsel %vm2976_vm4, %v7980_v40, 0  ;;  %v7920_v52 = vadd.f32 %v7916_v5, %v7912_v51 }
0x20f7   : > { %v7962_v11 = vsel %vm3218_vm7, %v7938_v41, %v7954_v48  ;;  %10465 = vmatpush3.bf16.xpose.msra.mxu0 %v8033_v10 }
0x20f8   : > { %v7970_v13 = vmul.f32 %v11000_v3, %v7962_v11  ;;  %v7900_v25 = vpop.permute.xlu0 %7899  ;;  %10476 = vmatprep.subr.bf16.mxu0 %v11382_v33  ;;  %v7976_v37 = vpack.c.bf16 %v7920_v52, %v7920_v52 }
0x20fa   : > { %v7974_v16 = vadd.f32 %v7970_v13, %v7966_v59  ;;  %v7884_v17 = vpop.permute.xlu1 %7883 }
0x20fb   : > { %v7909_v7 = vsel %vm3218_vm7, %v7884_v17, %v7900_v25 }
0x20fc   : > { %v7982_v19 = vpack.c.bf16 %v7974_v16, %v7974_v16  ;;  %v7917_v22 = vmul.f32 %v11000_v3, %v7909_v7  ;;  %v7902_v26 = vpop.permute.xlu0 %7901 }
0x20fe   : > { %v7921_v20 = vadd.f32 %v7917_v22, %v7913_v18  ;;  %10467 = vmatmul.mubr.msk.bf16.vlgmr.msra.gmra.mrb[172].mxu0 %vm2976_vm4, %v7976_v37  ;;  %v7886_v9 = vpop.permute.xlu1 %7885  ;;  %v8125_v27 = vsel %vm2976_vm4, %v7982_v19, 0 }
0x20ff   : > { %v7910_v28 = vsel %vm3218_vm7, %v7886_v9, %v7902_v26  ;;  %10477 = vmatpush3.bf16.xpose.msra.mxu0 %v8125_v27  ;;  %10478 = vmatprep.mubr.msk.bf16.mxu0 %vm11383_vm2, %v11382_v33 }
0x2100   : > { %v7977_v8 = vpack.c.bf16 %v7921_v20, %v7921_v20  ;;  %v7918_v32 = vmul.f32 %v11000_v3, %v7910_v28  ;;  %10488 = vmatprep.subr.bf16.mxu0 %v11382_v33  ;;  %v8221_v20 = vpack.c.bf16 %v12879_v15, %v12879_v15  ;;  %v8222_v15 = vpack.c.bf16 %v12895_v21, %v12895_v21 }
0x2102   : > { %v7922_v35 = vadd.f32 %v7918_v32, %v7914_v31  ;;  %10473 = vmatmul.mubr.msk.bf16.vlgmr.msra.gmra.mrb[204].mxu1 %vm2976_vm4, %v7977_v8  ;;  %v8319_v27 = vsel %vm3411_vm8, %v8221_v20, 0 }
0x2103   : > { %10483 = vmatpush3.bf16.msra.mxu1 %v8227_v60  ;;  %10484 = vmatprep.mubr.msk.bf16.mxu1 %vm11383_vm2, %v11382_v33 }
0x2104   : > { %v7978_v36 = vpack.c.bf16 %v7922_v35, %v7922_v35  ;;  %10494 = vmatprep.subr.bf16.mxu1 %v11382_v33 }
0x2106   : > { %10479 = vmatmul.mubr.msk.bf16.vlgmr.msra.gmra.mrb[176].mxu0 %vm2976_vm4, %v7978_v36  ;;  %v8365_v36 = vsel %vm3411_vm8, %v8222_v15, 0 }
0x2107   : > { %10489 = vmatpush3.bf16.msra.mxu0 %v8273_v49  ;;  %10490 = vmatprep.mubr.msk.bf16.mxu0 %vm11383_vm2, %v11382_v33 }
0x2108   : > { %10500 = vmatprep.subr.bf16.mxu0 %v11382_v33 }
0x21c1   : > { %v8023_v0 = vpop.f32.mrb[200].mxu1 }
0x21c2   : > { %v8167_v2 = vmul.f32 0.35355338, %v8023_v0  ;;  %v10462_v23 = vpop.f32.mrb[201].mxu1 }
0x21c3   : > { %v8026_v29 = vpop.f32.mrb[202].mxu1 }
0x21c4   : > { %v10463_v42 = vpop.f32.mrb[203].mxu1  ;;  %v8171_v43 = vsel %vm2976_vm4, %v8167_v2, -inf  ;;  %v7239_v29 = vld [vmem:[%s13331_s2] sm:$0xf] }
0x21c5   : > { %8172 = vmax.xlane.f32.xlu1 %v8171_v43  ;;  %v8415_v42 = vsel %vm3411_vm8, %v7239_v29, 0  ;;  %v7240_v43 = vld [vmem:[%s13331_s2 + $0x4] sm:$0xf] }
0x21d1   : > { %v8069_v44 = vpop.f32.mrb[172].mxu0 }
0x21d2   : > { %v8168_v45 = vmul.f32 0.35355338, %v8069_v44  ;;  %v10468_v46 = vpop.f32.mrb[173].mxu0  ;;  %v8461_v44 = vsel %vm3411_vm8, %v7240_v43, 0 }
0x21d3   : > { %v8072_v39 = vpop.f32.mrb[174].mxu0 }
0x21d4   : > { %v10469_v47 = vpop.f32.mrb[175].mxu0  ;;  %v8174_v53 = vsel %vm2976_vm4, %v8168_v45, -inf }
0x21d5   : > { %8175 = vmax.xlane.f32.xlu0 %v8174_v53  ;;  %v8115_v30 = vpop.f32.mrb[204].mxu1 }
0x21d6   : > { %v8169_v54 = vmul.f32 0.35355338, %v8115_v30  ;;  %v10474_v24 = vpop.f32.mrb[205].mxu1 }
0x21d7   : > { %v8118_v55 = vpop.f32.mrb[206].mxu1  ;;  %v7242_v24 = vld [vmem:[%s13331_s2 + $0xc] sm:$0xf] }
0x21d8   : > { %v10475_v56 = vpop.f32.mrb[207].mxu1  ;;  %v8177_v57 = vsel %vm2976_vm4, %v8169_v54, -inf }
0x21d9   : > { %v8161_v58 = vpop.f32.mrb[176].mxu0  ;;  %8178 = vmax.xlane.f32.xlu0 %v8177_v57 }
0x21da   : > { %v8170_v4 = vmul.f32 0.35355338, %v8161_v58  ;;  %v10480_v6 = vpop.f32.mrb[177].mxu0  ;;  %v8553_v58 = vsel %vm3411_vm8, %v7242_v24, 0 }
0x21db   : > { %v8164_v3 = vpop.f32.mrb[178].mxu0 }
0x21dc   : > { %v10481_v61 = vpop.f32.mrb[179].mxu0  ;;  %v8180_v62 = vsel %vm2976_vm4, %v8170_v4, -inf }
0x21dd   : > { %8181 = vmax.xlane.f32.xlu1 %v8180_v62 }
0x2252   : > { %v8173_v14 = vpop.xlane.xlu1 %8172 }
0x2253   : > { %v8183_v63 = vsub.f32 %v8167_v2, %v8173_v14 }
0x2255   : > { %v8187_v1 = vmul.f32 1.442695, %v8183_v63 }
0x2257   : > { %10977 = vpow2.f32 %v8187_v1 }
0x2261   : > { %v10978_v40 = vpop.eup %10977 }
0x2262   : > { %v8176_v5 = vpop.xlane.xlu0 %8175  ;;  %v8195_v48 = vsel %vm2976_vm4, %v10978_v40, 0.0 }
0x2263   : > { %v8184_v51 = vsub.f32 %v8168_v45, %v8176_v5  ;;  %8196 = vadd.xlane.f32.xlu0 %v8195_v48  ;;  %v7241_v45 = vld [vmem:[%s13331_s2 + $0x8] sm:$0xf]  ;;  %s13333_s2 = smov %s13332_s28 }
0x2264   : > { %v8507_v53 = vsel %vm3411_vm8, %v7241_v45, 0 }
0x2265   : > { %v8189_v41 = vmul.f32 1.442695, %v8184_v51 }
0x2266   : > { %v8179_v10 = vpop.xlane.xlu0 %8178 }
0x2267   : > { %10979 = vpow2.f32 %v8189_v41  ;;  %v8185_v11 = vsub.f32 %v8169_v54, %v8179_v10 }
0x2269   : > { %v8191_v59 = vmul.f32 1.442695, %v8185_v11 }
0x226a   : > { %v8182_v52 = vpop.xlane.xlu1 %8181 }
0x226b   : > { %10981 = vpow2.f32 %v8191_v59  ;;  %v8186_v13 = vsub.f32 %v8170_v4, %v8182_v52 }
0x226d   : > { %v8193_v25 = vmul.f32 1.442695, %v8186_v13 }
0x226f   : > { %10983 = vpow2.f32 %v8193_v25 }
0x2271   : > { %v10980_v16 = vpop.eup %10979 }
0x2272   : > { %v8198_v17 = vsel %vm2976_vm4, %v10980_v16, 0.0 }
0x2273   : > { %8199 = vadd.xlane.f32.xlu1 %v8198_v17 }
0x2275   : > { %v10982_v7 = vpop.eup %10981 }
0x2276   : > { %v8201_v18 = vsel %vm2976_vm4, %v10982_v7, 0.0 }
0x2277   : > { %8202 = vadd.xlane.f32.xlu0 %v8201_v18 }
0x2279   : > { %v10984_v37 = vpop.eup %10983 }
0x227a   : > { %v8204_v19 = vsel %vm2976_vm4, %v10984_v37, 0.0 }
0x227b   : > { %8205 = vadd.xlane.f32.xlu1 %v8204_v19 }
0x22f0   : > { %v8197_v22 = vpop.xlane.xlu0 %8196 }
0x22f1   : > { %10985 = vrcp.f32 %v8197_v22 }
0x22fb   : > { %v10986_v12 = vpop.eup %10985 }
0x22fc   : > { %v8211_v26 = vmul.f32 %v10986_v12, %v10978_v40 }
0x22fe   : > { %v8215_v9 = vpack.c.bf16 %v8211_v26, %v8211_v26 }
0x2300   : > { %v8200_v28 = vpop.xlane.xlu1 %8199  ;;  %10485 = vmatmul.mubr.msk.bf16.vlgmr.msra.gmra.mrb[208].mxu1 %vm2976_vm4, %v8215_v9 }
0x2301   : > { %10987 = vrcp.f32 %v8200_v28  ;;  %10495 = vmatpush3.bf16.msra.mxu1 %v8319_v27  ;;  %10496 = vmatprep.mubr.msk.bf16.mxu1 %vm11383_vm2, %v11382_v33 }
0x2302   : > { %10506 = vmatprep.subr.bf16.mxu1 %v11382_v33 }
0x2304   : > { %v8203_v31 = vpop.xlane.xlu0 %8202 }
0x2305   : > { %10989 = vrcp.f32 %v8203_v31 }
0x2308   : > { %v8206_v8 = vpop.xlane.xlu1 %8205 }
0x2309   : > { %10991 = vrcp.f32 %v8206_v8 }
0x230b   : > { %v10988_v32 = vpop.eup %10987 }
0x230c   : > { %v8212_v60 = vmul.f32 %v10988_v32, %v10980_v16 }
0x230e   : > { %v8216_v34 = vpack.c.bf16 %v8212_v60, %v8212_v60 }
0x230f   : > { %v10990_v35 = vpop.eup %10989 }
0x2310   : > { %v8213_v49 = vmul.f32 %v10990_v35, %v10982_v7  ;;  %10491 = vmatmul.mubr.msk.bf16.vlgmr.msra.gmra.mrb[180].mxu0 %vm2976_vm4, %v8216_v34  ;;  %v10899_v35 = vld [vmem:[%s13332_s28] sm:$0xff]   ;;  %s2000_s28 = sand.u32 1, %s11299_s1  }
0x2311   : > { %10501 = vmatpush3.bf16.msra.mxu0 %v8365_v36  ;;  %10502 = vmatprep.mubr.msk.bf16.mxu0 %vm11383_vm2, %v11382_v33  ;;  %v10900_v36 = vld [vmem:[%s13334_s3] sm:$0xff]   ;;  %s8934_s8 = scalar_lea.sflag [#allocation4], %s2000_s28 }
0x2312   : > { %v8217_v0 = vpack.c.bf16 %v8213_v49, %v8213_v49  ;;  %10512 = vmatprep.subr.bf16.mxu0 %v11382_v33  ;;  %v10901_v49 = vld [vmem:[%s13333_s2 + $0x8] sm:$0xff]   ;;  %s9193_s2 = sshll.u32 %s2000_s28, 3 }
0x2313   : > { %v10992_v2 = vpop.eup %10991 }
0x2314   : > { %v8214_v21 = vmul.f32 %v10992_v2, %v10984_v37  ;;  %10497 = vmatmul.mubr.msk.bf16.vlgmr.msra.gmra.mrb[212].mxu1 %vm2976_vm4, %v8217_v0  ;;  %v10902_v0 = vld [vmem:[%s13334_s3 + $0x8] sm:$0xff]   ;;  %s2002_s3 = scalar_lea.vmem [#allocation16], %s9193_s2  ;;  %s11386_s2 = smov [#allocation16]  }
0x2315   : > { %10508 = vmatprep.mubr.msk.bf16.mxu1 %vm11383_vm2, %v11382_v33  ;;  %10507 = vmatpush3.bf16.msra.mxu1 %v8415_v42  ;;  %s8947_s4 = sshll.u32 %s2002_s3, 4  ;;  %s11229_s10 = sshll.u32 %s11386_s2, 4  ;;  %s13072_s4 = int_to_ptr.vmem [resolvable:$true] %s8947_s4  ;;  %s11230_s10 = int_to_ptr.vmem [resolvable:$false] %s11229_s10 }
0x2316   : > { %v8218_v23 = vpack.c.bf16 %v8214_v21, %v8214_v21  ;;  %10518 = vmatprep.subr.bf16.mxu1 %v11382_v33  ;;  %s11225_s9 = scalar_lea.vmem %s13072_s4, 128  ;;  %s11231_s0 = scalar_lea.vmem %s11230_s10, 256 }
0x2317   : > { %p11226_p8 = scmp.ne.s32.totalorder %s13072_s4, %s11225_s9  ;;  %p11232_p2 = scmp.lt.s32.totalorder %s13072_s4, %s11230_s10 }
0x2318   : > { %10503 = vmatmul.mubr.msk.bf16.vlgmr.msra.gmra.mrb[184].mxu0 %vm2976_vm4, %v8218_v23  ;;  %v8603_v23 = vld [vmem:[#allocation13] sm:$0x1]  ;;  %p11233_p0 = scmp.lt.s32.totalorder %s11231_s0, %s11225_s9 }
0x2319   : > { %10514 = vmatprep.mubr.msk.bf16.mxu0 %vm11383_vm2, %v11382_v33  ;;  %10513 = vmatpush3.bf16.msra.mxu0 %v8461_v44  ;;  %v8612_v29 = vadd.f32 1.0, %v8603_v23  ;;  %v8853_v23 = vld [vmem:[%s11710_s20 + $0x60] sm:$0xff]  ;;  %p11227_p13 = pnand %p11226_p8, %p13335_p11 }
0x231a   : > { %10524 = vmatprep.subr.bf16.mxu0 %v11382_v33  ;;  %p11234_p3 = por %p11233_p0, %p11232_p2 }
0x231b   : > { %v8617_v42 = vrot.slane %v8612_v29, %v12435_v38  ;;  %v8854_v29 = vld [vmem:[%s11710_s20 + $0x68] sm:$0xff]  ;;  %p11228_p1 = pneg %p11227_p13 }
0x231d   : > { %p11235_p4 = pnand %p11234_p3, %p11228_p1 }
0x23d3   : > { %v8263_v46 = vpop.f32.mrb[208].mxu1 }
0x23d4   : > { %v8407_v39 = vpack.c.bf16 %v8263_v46, %v8263_v46  ;;  %v10486_v47 = vpop.f32.mrb[209].mxu1 }
0x23d5   : > { %v8266_v30 = vpop.f32.mrb[210].mxu1  ;;  %v10904_v47 = vld [vmem:[%s11700_s30 + $0x8] sm:$0xff]  }
0x23d6   : > { %v10487_v54 = vpop.f32.mrb[211].mxu1  ;;  %10509 = vmatmul.mubr.msk.bf16.vlgmr.msra.gmra.mrb[216].mxu1 %vm2976_vm4, %v8407_v39  ;;  %v10903_v39 = vld [vmem:[%s11700_s30] sm:$0xff]   ;;  %v10906_v30 = vld [vmem:[%s11700_s30 + $0x18] sm:$0xff]  }
0x23d7   : > { %10519 = vmatpush3.bf16.msra.mxu1 %v8507_v53  ;;  %10520 = vmatprep.mubr.msk.bf16.mxu1 %vm11383_vm2, %v11382_v33  ;;  %v10905_v53 = vld [vmem:[%s11700_s30 + $0x10] sm:$0xff]  }
0x23d8   : > { %10530 = vmatprep.subr.bf16.mxu1 %v11382_v33 }
0x23e3   : > { %v8309_v55 = vpop.f32.mrb[180].mxu0 }
0x23e4   : > { %v8408_v56 = vpack.c.bf16 %v8309_v55, %v8309_v55  ;;  %v10492_v57 = vpop.f32.mrb[181].mxu0 }
0x23e5   : > { %v8312_v4 = vpop.f32.mrb[182].mxu0 }
0x23e6   : > { %v10493_v6 = vpop.f32.mrb[183].mxu0  ;;  %10515 = vmatmul.mubr.msk.bf16.vlgmr.msra.gmra.mrb[188].mxu0 %vm2976_vm4, %v8408_v56 }
0x23e7   : > { %v8355_v3 = vpop.f32.mrb[212].mxu1  ;;  %10525 = vmatpush3.bf16.msra.mxu0 %v8553_v58  ;;  %10526 = vmatprep.mubr.msk.bf16.mxu0 %vm11383_vm2, %v11382_v33 }
0x23e8   : > { %v8409_v61 = vpack.c.bf16 %v8355_v3, %v8355_v3  ;;  %v10498_v62 = vpop.f32.mrb[213].mxu1  ;;  %10538 = vmatprep.subr.bf16.mxu0 %v11382_v33 }
0x23e9   : > { %v8358_v14 = vpop.f32.mrb[214].mxu1 }
0x23ea   : > { %v10499_v63 = vpop.f32.mrb[215].mxu1  ;;  %10521 = vmatmul.mubr.msk.bf16.vlgmr.msra.gmra.mrb[220].mxu1 %vm2976_vm4, %v8409_v61 }
0x23eb   : > { %v8401_v1 = vpop.f32.mrb[184].mxu0  ;;  %10534 = vmatprep.mubr.msk.bf16.mxu1 %vm11383_vm2, %v11382_v33  ;;  %10531 = vmatpush3.bf16.msra.mxu1 %v10899_v35 }
0x23ec   : > { %v8410_v40 = vpack.c.bf16 %v8401_v1, %v8401_v1  ;;  %v10504_v5 = vpop.f32.mrb[185].mxu0  ;;  %10532 = vmatprep.subr.bf16.mxu1 %v11382_v33 }
0x23ed   : > { %v8404_v48 = vpop.f32.mrb[186].mxu0 }
0x23ee   : > { %v10505_v51 = vpop.f32.mrb[187].mxu0  ;;  %10527 = vmatmul.mubr.msk.bf16.vlgmr.msra.gmra.mrb[192].mxu0 %vm2976_vm4, %v8410_v40 }
0x23ef   : > { %10542 = vmatprep.mubr.msk.bf16.mxu0 %vm11383_vm2, %v11382_v33  ;;  %10539 = vmatpush3.bf16.msra.mxu0 %v10900_v36 }
0x23f0   : > { %10540 = vmatprep.subr.bf16.mxu0 %v11382_v33  ;;  %10533 = vmatpush3.bf16.msra.mxu1 %v10901_v49 }
0x23f1   : > { %10546 = vmatprep.subr.bf16.mxu1 %v11382_v33 }
0x23f3   : > { %10541 = vmatpush3.bf16.msra.mxu0 %v10902_v0 }
0x23f4   : > { %10558 = vmatprep.subr.bf16.mxu0 %v11382_v33 }
0x24a9   : > { %v8451_v41 = vpop.f32.mrb[216].mxu1 }
0x24aa   : > { %v10510_v10 = vpop.f32.mrb[217].mxu1  ;;  %v8595_v13 = vsel %vm2304_vm3, %v8451_v41, 0.0 }
0x24ab   : > { %v8454_v11 = vpop.f32.mrb[218].mxu1  ;;  %v8841_v10 = vld [vmem:[%s11710_s20] sm:$0xff] }
0x24ac   : > { %v10511_v59 = vpop.f32.mrb[219].mxu1  ;;  %v8842_v11 = vld [vmem:[%s11710_s20 + $0x8] sm:$0xff] }
0x24ad   : > { %v8857_v59 = vpack.c.bf16 %v8842_v11, %v8841_v10 }
0x24b9   : > { %v8497_v52 = vpop.f32.mrb[188].mxu0 }
0x24ba   : > { %v8596_v25 = vsel %vm2304_vm3, %v8497_v52, 0.0  ;;  %v10516_v16 = vpop.f32.mrb[189].mxu0  ;;  %v8843_v52 = vld [vmem:[%s11710_s20 + $0x10] sm:$0xff] }
0x24bb   : > { %v8597_v17 = vadd.f32 %v8596_v25, %v8595_v13  ;;  %v8500_v7 = vpop.f32.mrb[190].mxu0  ;;  %v8844_v13 = vld [vmem:[%s11710_s20 + $0x18] sm:$0xff]  ;;  %v8869_v25 = vsel %vm2304_vm3, %v8857_v59, 0 }
0x24bc   : > { %v10517_v18 = vpop.f32.mrb[191].mxu0  ;;  %v8858_v16 = vpack.c.bf16 %v8844_v13, %v8843_v52  ;;  %v8845_v7 = vld [vmem:[%s11710_s20 + $0x20] sm:$0xff] }
0x24bd   : > { %v8543_v37 = vpop.f32.mrb[220].mxu1  ;;  %v8846_v18 = vld [vmem:[%s11710_s20 + $0x28] sm:$0xff] }
0x24be   : > { %v8598_v19 = vsel %vm2304_vm3, %v8543_v37, 0.0  ;;  %v10522_v22 = vpop.f32.mrb[221].mxu1  ;;  %v8859_v37 = vpack.c.bf16 %v8846_v18, %v8845_v7 }
0x24bf   : > { %v8599_v12 = vadd.f32 %v8598_v19, %v8597_v17  ;;  %v8546_v20 = vpop.f32.mrb[222].mxu1  ;;  %v8872_v17 = vsel %vm2304_vm3, %v8858_v16, 0  ;;  %v8847_v22 = vld [vmem:[%s11710_s20 + $0x30] sm:$0xff] }
0x24c0   : > { %v10523_v26 = vpop.f32.mrb[223].mxu1  ;;  %v8875_v19 = vsel %vm2304_vm3, %v8859_v37, 0 }
0x24c1   : > { %v8589_v9 = vpop.f32.mrb[192].mxu0 }
0x24c2   : > { %v8600_v27 = vsel %vm2304_vm3, %v8589_v9, 0.0  ;;  %v10528_v28 = vpop.f32.mrb[193].mxu0  ;;  %v8849_v9 = vld [vmem:[%s11710_s20 + $0x40] sm:$0xff] }
0x24c3   : > { %v8601_v31 = vadd.f32 %v8600_v27, %v8599_v12  ;;  %v8592_v8 = vpop.f32.mrb[194].mxu0  ;;  %v8848_v12 = vld [vmem:[%s11710_s20 + $0x38] sm:$0xff]  ;;  %v8850_v27 = vld [vmem:[%s11710_s20 + $0x48] sm:$0xff] }
0x24c4   : > { %v10529_v32 = vpop.f32.mrb[195].mxu0  ;;  %v8860_v20 = vpack.c.bf16 %v8848_v12, %v8847_v22  ;;  %v8861_v28 = vpack.c.bf16 %v8850_v27, %v8849_v9  ;;  %v8851_v8 = vld [vmem:[%s11710_s20 + $0x50] sm:$0xff] }
0x24c5   : > { %v13006_v15 = vadd.f32 %v8601_v31, %v12736_v50  ;;  %v8852_v32 = vld [vmem:[%s11710_s20 + $0x58] sm:$0xff] }
0x24c6   : > { %v8878_v26 = vsel %vm2304_vm3, %v8860_v20, 0  ;;  %v8881_v31 = vsel %vm2304_vm3, %v8861_v28, 0 }
0x24c7   : > { %v8604_v60 = vmul.f32 %v13006_v15, %v13006_v15 }
0x24c9   : > { %v8605_v34 = vsel %vm2304_vm3, %v8604_v60, 0.0  ;;  %v8862_v60 = vpack.c.bf16 %v8852_v32, %v8851_v8 }
0x24ca   : > { %8606 = vadd.xlane.f32.xlu0 %v8605_v34 }
0x24cb   : > { %v8884_v34 = vsel %vm2304_vm3, %v8862_v60, 0 }
0x2557   : > { %v8607_v50 = vpop.xlane.xlu0 %8606 }
0x2558   : > { %v8608_v2 = vmul.f32 0.03125, %v8607_v50 }
0x255a   : > { %v8609_v21 = vadd.f32 1e-06, %v8608_v2 }
0x255c   : > { %10993 = vrsqrt.f32 %v8609_v21 }
0x2566   : > { %v10994_v43 = vpop.eup %10993 }
0x2567   : > { %v8611_v44 = vmul.f32 %v10994_v43, %v13006_v15 }
0x2569   : > { %v8619_v45 = vmul.f32 %v8617_v42, %v8611_v44  ;;  %v8863_v42 = vpack.c.bf16 %v8854_v29, %v8853_v23  ;;  %v8855_v44 = vld [vmem:[%s11710_s20 + $0x70] sm:$0xff] }
0x256b   : > { %v8620_v46 = vpack.c.bf16 %v8619_v45, %v8619_v45  ;;  %v8887_v43 = vsel %vm2304_vm3, %v8863_v42, 0  ;;  %v8856_v45 = vld [vmem:[%s11710_s20 + $0x78] sm:$0xff] }
0x256d   : > { %10535 = vmatmul.mubr.msk.bf16.vlgmr.msra.gmra.mrb[224].mxu1 %vm2304_vm3, %v8620_v46  ;;  %10543 = vmatmul.mubr.msk.bf16.vlgmr.msra.gmra.mrb[196].mxu0 %vm2304_vm3, %v8620_v46  ;;  %v8864_v46 = vpack.c.bf16 %v8856_v45, %v8855_v44 }
0x256e   : > { %10554 = vmatprep.mubr.msk.bf16.mxu1 %vm11383_vm2, %v11382_v33  ;;  %10574 = vmatprep.mubr.msk.bf16.mxu0 %vm11383_vm2, %v11382_v33 }
0x256f   : > { %10547 = vmatpush3.bf16.msra.mxu1 %v10903_v39  ;;  %10559 = vmatpush3.bf16.xpose.msra.mxu0 %v8869_v25 }
0x2570   : > { %10548 = vmatprep.subr.bf16.mxu1 %v11382_v33  ;;  %10560 = vmatprep.subr.bf16.mxu0 %v11382_v33 }
0x2573   : > { %10549 = vmatpush3.bf16.msra.mxu1 %v10904_v47 }
0x2574   : > { %10550 = vmatprep.subr.bf16.mxu1 %v11382_v33 }
0x2577   : > { %10551 = vmatpush3.bf16.msra.mxu1 %v10905_v53  ;;  %10561 = vmatpush3.bf16.xpose.msra.mxu0 %v8872_v17 }
0x2578   : > { %10552 = vmatprep.subr.bf16.mxu1 %v11382_v33  ;;  %10562 = vmatprep.subr.bf16.mxu0 %v11382_v33 }
0x257b   : > { %10553 = vmatpush3.bf16.msra.mxu1 %v10906_v30  ;;  %v8823_v30 = vld [vmem:[#allocation14] sm:$0x1] }
0x257f   : > { %10563 = vmatpush3.bf16.xpose.msra.mxu0 %v8875_v19 }
0x2580   : > { %10564 = vmatprep.subr.bf16.mxu0 %v11382_v33 }
0x2587   : > { %10565 = vmatpush3.bf16.xpose.msra.mxu0 %v8878_v26 }
0x2588   : > { %10566 = vmatprep.subr.bf16.mxu0 %v11382_v33 }
0x258f   : > { %10567 = vmatpush3.bf16.xpose.msra.mxu0 %v8881_v31 }
0x2590   : > { %10568 = vmatprep.subr.bf16.mxu0 %v11382_v33 }
0x2597   : > { %10569 = vmatpush3.bf16.xpose.msra.mxu0 %v8884_v34 }
0x2598   : > { %10570 = vmatprep.subr.bf16.mxu0 %v11382_v33 }
0x259f   : > { %10571 = vmatpush3.bf16.xpose.msra.mxu0 %v8887_v43 }
0x25a0   : > { %10572 = vmatprep.subr.bf16.mxu0 %v11382_v33 }
0x2640   : > { %v8674_v54 = vpop.f32.mrb[224].mxu1  ;;  %v8739_v24 = vpop.f32.mrb[196].mxu0 }
0x2641   : > { %v8681_v55 = vmul.f32 0.044715, %v8674_v54  ;;  %v10536_v56 = vpop.f32.mrb[225].mxu1  ;;  %v10544_v57 = vpop.f32.mrb[197].mxu0  ;;  %v8680_v40 = vmul.f32 0.5, %v8674_v54 }
0x2642   : > { %v8677_v58 = vpop.f32.mrb[226].mxu1  ;;  %v8742_v4 = vpop.f32.mrb[198].mxu0 }
0x2643   : > { %v8682_v6 = vmul.f32 %v8681_v55, %v8674_v54  ;;  %v10537_v3 = vpop.f32.mrb[227].mxu1  ;;  %v10545_v61 = vpop.f32.mrb[199].mxu0 }
0x2645   : > { %v8683_v62 = vmul.f32 %v8682_v6, %v8674_v54 }
0x2647   : > { %v8684_v14 = vadd.f32 %v8683_v62, %v8674_v54  ;;  %v8832_v54 = vadd.f32 1.0, %v8823_v30 }
0x2649   : > { %v8685_v63 = vmul.f32 0.7978846, %v8684_v14 }
0x264b   : > { %10995 = vtanh.f32 %v8685_v63 }
0x2655   : > { %v10996_v1 = vpop.eup %10995 }
0x2656   : > { %v8687_v5 = vadd.f32 1.0, %v10996_v1 }
0x2658   : > { %v8688_v48 = vmul.f32 %v8687_v5, %v8680_v40 }
0x265a   : > { %v8745_v51 = vmul.f32 %v8739_v24, %v8688_v48  ;;  %v8837_v24 = vrot.slane %v8832_v54, %v12435_v38 }
0x265c   : > { %v8746_v41 = vpack.c.bf16 %v8745_v51, %v8745_v51 }
0x265e   : > { %10555 = vmatmul.mubr.msk.bf16.vlgmr.msra.gmra.mrb[228].mxu1 %vm2126_vm0, %v8746_v41 }
0x2731   : > { %v8816_v35 = vpop.f32.mrb[228].mxu1 }
0x2732   : > { %v8822_v36 = vadd.f32 %v8816_v35, %v13006_v15  ;;  %v10556_v49 = vpop.f32.mrb[229].mxu1  ;;  %v8890_v15 = vsel %vm2304_vm3, %v8864_v46, 0 }
0x2733   : > { %v8819_v0 = vpop.f32.mrb[230].mxu1  ;;  %10573 = vmatpush3.bf16.xpose.msra.mxu0 %v8890_v15 }
0x2734   : > { %v10557_v50 = vpop.f32.mrb[231].mxu1  ;;  %v8824_v2 = vmul.f32 %v8822_v36, %v8822_v36 }
0x2736   : > { %v8825_v21 = vsel %vm2304_vm3, %v8824_v2, 0.0 }
0x2737   : > { %8826 = vadd.xlane.f32.xlu1 %v8825_v21 }
0x27c4   : > { %v8827_v39 = vpop.xlane.xlu1 %8826 }
0x27c5   : > { %v8828_v47 = vmul.f32 0.03125, %v8827_v39 }
0x27c7   : > { %v8829_v53 = vadd.f32 1e-06, %v8828_v47 }
0x27c9   : > { %10997 = vrsqrt.f32 %v8829_v53 }
0x27d3   : > { %v10998_v55 = vpop.eup %10997 }
0x27d4   : > { %v8831_v56 = vmul.f32 %v10998_v55, %v8822_v36 }
0x27d6   : > { %v8839_v33 = vmul.f32 %v8837_v24, %v8831_v56 }
0x27d8   : > { %v8840_v57 = vpack.c.bf16 %v8839_v33, %v8839_v33 }
0x27da   : > { %10575 = vmatmul.mubr.msk.bf16.vlgmr.msra.gmra.mrb[200].mxu0 %vm2304_vm3, %v8840_v57 }
0x28ad   : > { %v8926_v38 = vpop.f32.mrb[200].mxu0 }
0x28ae   : > { %8932 = vst [vmem:[%s2002_s3] sm:$0xff] %v8926_v38  ;;  %v10576_v58 = vpop.f32.mrb[201].mxu0 }
0x28af   : > { %v8929_v4 = vpop.f32.mrb[202].mxu0 }
0x28b0   : > { %11238 = shalt.err (!%p11235_p4)
}
0x28b1   : > { %s11239_s3 = scalar_lea.hbm %s13075_s6, 128  ;;  %s11243_s5 = scalar_lea.hbm %s11715_s24, 256 }
0x28b2   : > { %p11240_p12 = scmp.ne.s32.totalorder %s13075_s6, %s11239_s3  ;;  %p11244_p9 = scmp.lt.u32.totalorder %s13075_s6, %s11715_s24 }
0x28b3   : > { %p11245_p10 = scmp.lt.u32.totalorder %s11243_s5, %s11239_s3  ;;  %p11247_p8 = scmp.lt.u32.totalorder %s11239_s3, %s13075_s6 }
0x28b4   : > { %p11241_p5 = pnand %p11240_p12, %p13335_p11 }
0x28b5   : > { %p11246_p7 = por %p11245_p10, %p11244_p9 }
0x28b6   : > { %p11242_p6 = pneg %p11241_p5 }
0x28b7   : > { %p11248_p13 = por %p11247_p8, %p11246_p7 }
0x28b9   : > { %p11249_p1 = pnand %p11248_p13, %p11242_p6 }
0x28bb   : > { %11252 = shalt.err (!%p11249_p1)
}
0x28bc   : > { %10610 = dma.vmem_to_hbm [thread:$0]  (%p13335_p11), %s13072_s4, 128, %s13075_s6, %s8934_s8   ;;  %v10577_v6 = vpop.f32.mrb[203].mxu0 }
0x28bd PF: > { %s13336_s9 = sld [smem:[#allocation77_spill]]  ;;  %s13337_s10 = sld [smem:[#allocation81_spill]] }
0x28be   : > { %p10657_p2 = scmp.ge.s32.totalorder %s11307_s7, 2 }
0x28c3   : > { %s8959_s28 = sand.u32 1, %s13336_s9   ;;  %p13338_p0 = scmp.ne.s32.totalorder %s13337_s10, 0 }
0x28c4   : > { %s8960_s2 = scalar_lea.sflag [#allocation4], %s8959_s28 }
0x28c5   : > { %p10638_p3 = pnand %p10657_p2, %p13338_p0 }
0x28c7   : > { %11290 = dma.done.wait (!%p10638_p3), %s8960_s2, 128  }
0x28c8   : > { %11292 = vsyncadd (!%p10638_p3), %s8960_s2, 4294967168  ;;  %s13339_s7 = sld [smem:[#allocation79_spill]]  ;;  %s13340_s0 = sld [smem:[#allocation78_spill]] }
0x28c9   : > { %s13341_s2 = sld [smem:[#allocation80_spill]]  ;;  %s13342_s28 = smov %s11299_s1 }
0x28ce   : > { %p144_p4 = scmp.ge.s32.totalorder %s13339_s7, 4   ;;  %s13343_s1 = smov %s13340_s0 }
0x28cf   : > { %13344 = sst [smem:[#allocation77_spill]] %s13341_s2 }
0x28d0   :  { %146 = sbr.rel (!%p144_p4) target bundleno = 139 (0x8b), region = 414 }
0x28d7   :  { %8965 = vsyncpa [#allocation3], 1 }
0x28d8   :  { %8967 = vsyncpa [#allocation3 + $0x1], 1 }
0x28d9   :  { %8968 = vsyncpa [#allocation6], 1 }
0x28da   :  { %8969 = vsyncpa [#allocation9], 1 }
0x28db   :  { %8970 = vsyncpa [#allocation12], 1 }
0x28dc   :  { %8971 = vsyncpa [#allocation15], 1 }
0x28dd   :  { %8972 = vsyncpa [#allocation4], 1 }
0x28de   :  { %8974 = vsyncpa [#allocation4 + $0x1], 1 }

</bundles_post_ra>
